<compile_context>
chip_gen: v5e
topology: v5e:2x2
jax: 0.10.0
libtpu: 0.0.40
codegen_flags: <defaults>
</compile_context>

<pallas_src>
import functools

import jax
import jax.numpy as jnp
import numpy as np
from jax import lax
from jax.experimental import pallas as pl
from jax.experimental.pallas import tpu as pltpu

EPS = 1e-5


def _resblock_kernel(x_ref, w1_ref, w2_ref, o_ref, pad_sc, *, use_im2col):
    # x_ref  : (1, H, W, C)   one batch element per grid step, NHWC (C on lanes)
    # w*_ref : (9*C, C) bf16 if use_im2col else (3, 3, C, C) bf16  [kh, kw, Cin, Cout]
    # o_ref  : (1, H, W, C)
    # pad_sc : (H+2, W+2, C) bf16 VMEM scratch: zero border + current conv input
    _, H, W, C = x_ref.shape
    Hp, Wp = H + 2, W + 2

    # Zero only the border of the padded scratch (once per grid step; the interior
    # is fully overwritten before each conv, so nothing persists across steps).
    zrow = jnp.zeros((1, Wp, C), pad_sc.dtype)
    zcol = jnp.zeros((Hp, 1, C), pad_sc.dtype)
    pad_sc[0:1, :, :] = zrow
    pad_sc[Hp - 1:Hp, :, :] = zrow
    pad_sc[:, 0:1, :] = zcol
    pad_sc[:, Wp - 1:Wp, :] = zcol

    def write_interior(v_hwc):
        # Cast once here; all matmul reads below are already bf16 (no per-tap casts).
        pad_sc[1:1 + H, 1:1 + W, :] = v_hwc.astype(pad_sc.dtype)

    def conv3x3(w_ref):
        # 3x3 conv, stride 1, zero pad 1, over the padded scratch.
        # Conv bias omitted: exactly cancelled by the affine-free InstanceNorm below.
        if use_im2col:
            # Small C: gather the 9 taps once along the lane axis and do a single
            # fat-K matmul (H*W, 9C) x (9C, C) -> much better MXU/lane utilization.
            patches = jnp.concatenate(
                [pad_sc[dh:dh + H, dw:dw + W, :]
                 for dh in range(3) for dw in range(3)],
                axis=-1)                                  # (H, W, 9C) bf16
            return jnp.dot(patches.reshape(H * W, 9 * C), w_ref[...],
                           preferred_element_type=jnp.float32)
        # Large C (lane-dense): 9 shifted (H*W, C) x (C, C) matmuls, f32 accumulation.
        acc = jnp.zeros((H * W, C), jnp.float32)
        for dh in range(3):
            for dw in range(3):
                patch = pad_sc[dh:dh + H, dw:dw + W, :].reshape(H * W, C)
                acc = acc + jnp.dot(patch, w_ref[dh, dw],
                                    preferred_element_type=jnp.float32)
        return acc

    def instance_norm(y):
        # y: (H*W, C). One-pass per-channel mean / biased variance over spatial dims.
        mean = jnp.mean(y, axis=0, keepdims=True)
        mean_sq = jnp.mean(y * y, axis=0, keepdims=True)
        var = jnp.maximum(mean_sq - mean * mean, 0.0)
        return (y - mean) * lax.rsqrt(var + EPS)

    x = x_ref[0]                                          # (H, W, C), f32 residual

    # Conv2dBlock #1: conv -> InstanceNorm -> ReLU
    write_interior(x)
    y1 = jnp.maximum(instance_norm(conv3x3(w1_ref)), 0.0)

    # Conv2dBlock #2: conv -> InstanceNorm (no activation); scratch reused.
    write_interior(y1.reshape(H, W, C))
    y2 = instance_norm(conv3x3(w2_ref))

    # Residual add (residual path stays f32).
    o_ref[0] = (y2.reshape(H, W, C) + x.astype(jnp.float32)).astype(o_ref.dtype)


@jax.jit
def resblock_forward(x_nchw, w1, b1, w2, b2):
    """ResBlock forward.

    x_nchw: (N, C, H, W) float32 (PyTorch layout).
    w1, w2: (3, 3, C, C) conv weights as [kh, kw, Cin, Cout]; b1, b2: (C,).
    b1/b2 are accepted for interface parity but unused: with norm='in'
    (InstanceNorm2d, affine=False) the per-channel conv bias is exactly cancelled.
    """
    del b1, b2
    N, C, H, W = x_nchw.shape
    Hp, Wp = H + 2, W + 2
    x_nhwc = jnp.transpose(x_nchw, (0, 2, 3, 1))          # channels on the lane axis

    use_im2col = C < 128                                  # static (shape-derived)
    w1b = w1.astype(jnp.bfloat16)
    w2b = w2.astype(jnp.bfloat16)
    if use_im2col:
        # (3,3,Cin,Cout) row-major flatten -> (9*Cin, Cout); matches the tap order
        # (kh outer, kw inner, cin minor) used by the in-kernel concatenation.
        w1b = w1b.reshape(9 * C, C)
        w2b = w2b.reshape(9 * C, C)
        w_spec = pl.BlockSpec((9 * C, C), lambda n: (0, 0))
    else:
        w_spec = pl.BlockSpec((3, 3, C, C), lambda n: (0, 0, 0, 0))

    # Explicit VMEM budget: double-buffered in/out image blocks + double-buffered
    # bf16 weights + bf16 padded scratch + live f32 intermediates.  Capped at 64 MiB
    # so the same whole-image blocking also fits v7x's smaller VMEM; v5e/v6e
    # (128 MiB) could go higher for very large images.
    itemsize = jnp.dtype(x_nchw.dtype).itemsize
    need = (
        4 * H * W * C * itemsize          # in + out blocks, double-buffered
        + 2 * 2 * (9 * C * C) * 2         # two bf16 weights, double-buffered
        + Hp * Wp * C * 2                 # bf16 padded scratch
        + 6 * H * W * C * 4               # live f32 intermediates (acc / y1 / y2 / norm)
    )
    if use_im2col:
        need += H * W * (9 * C) * 2       # bf16 im2col patch matrix
    vmem_limit = int(min(max(need * 5 // 4, 32 * 1024 * 1024), 64 * 1024 * 1024))

    out_nhwc = pl.pallas_call(
        functools.partial(_resblock_kernel, use_im2col=use_im2col),
        out_shape=jax.ShapeDtypeStruct((N, H, W, C), x_nchw.dtype),
        grid_spec=pltpu.PrefetchScalarGridSpec(
            num_scalar_prefetch=0,
            grid=(N,),                    # keep N >= 2 so both v7x TensorCores are used
            in_specs=[
                pl.BlockSpec((1, H, W, C), lambda n: (n, 0, 0, 0)),
                w_spec,
                w_spec,
            ],
            out_specs=pl.BlockSpec((1, H, W, C), lambda n: (n, 0, 0, 0)),
            scratch_shapes=[pltpu.VMEM((Hp, Wp, C), jnp.bfloat16)],
        ),
        compiler_params=pltpu.CompilerParams(
            dimension_semantics=("parallel",),
            vmem_limit_bytes=vmem_limit,
        ),
    )(x_nhwc, w1b, w2b)

    return jnp.transpose(out_nhwc, (0, 3, 1, 2))          # NHWC -> NCHW


# ---------------- pure-JAX reference (for sanity checks) ----------------
def _ref_forward(x_nchw, w1, b1, w2, b2, conv_dtype=jnp.float32):
    """Reference ResBlock. conv_dtype=bfloat16 mirrors the kernel's MXU input precision."""
    x = jnp.transpose(x_nchw, (0, 2, 3, 1))  # NHWC

    def conv(v, w, b):
        y = lax.conv_general_dilated(
            v.astype(conv_dtype), w.astype(conv_dtype),
            window_strides=(1, 1), padding=((1, 1), (1, 1)),
            dimension_numbers=("NHWC", "HWIO", "NHWC"),
            preferred_element_type=jnp.float32)
        return y + b.reshape(1, 1, 1, -1)

    def inorm(y):
        mean = jnp.mean(y, axis=(1, 2), keepdims=True)
        var = jnp.mean((y - mean) ** 2, axis=(1, 2), keepdims=True)
        return (y - mean) / jnp.sqrt(var + EPS)

    y = jnp.maximum(inorm(conv(x, w1, b1)), 0.0)
    y = inorm(conv(y, w2, b2))
    return jnp.transpose(y + x, (0, 3, 1, 2))


if __name__ == "__main__":
    def _make_case(key, N, C, H, W):
        kx, kw1, kb1, kw2, kb2 = jax.random.split(key, 5)
        x = jax.random.normal(kx, (N, C, H, W), dtype=jnp.float32)
        bound = 1.0 / np.sqrt(C * 3 * 3)
        w1 = jax.random.uniform(kw1, (3, 3, C, C), jnp.float32, -bound, bound)
        b1 = jax.random.uniform(kb1, (C,), jnp.float32, -bound, bound)
        w2 = jax.random.uniform(kw2, (3, 3, C, C), jnp.float32, -bound, bound)
        b2 = jax.random.uniform(kb2, (C,), jnp.float32, -bound, bound)
        return x, w1, b1, w2, b2

    key = jax.random.PRNGKey(0)
    k1, k2 = jax.random.split(key)

    # Case 1: small channel count -> im2col path (ResBlock test shape).
    # Case 2: C = 128 -> lane-dense 9-tap path.
    for case_key, shape in ((k1, (2, 8, 16, 16)), (k2, (2, 128, 8, 8))):
        x, w1, b1, w2, b2 = _make_case(case_key, *shape)
        out = jax.block_until_ready(resblock_forward(x, w1, b1, w2, b2))

        # Tight check vs. a reference using the same bf16 matmul-input precision
        # (verifies the kernel math, incl. the exact bias cancellation).
        ref_bf16 = jax.block_until_ready(
            _ref_forward(x, w1, b1, w2, b2, conv_dtype=jnp.bfloat16))
        np.testing.assert_allclose(np.asarray(out), np.asarray(ref_bf16),
                                   rtol=2e-3, atol=2e-3)

        # Loose check vs. the exact f32 module math (bf16 MXU inputs are the only
        # intended numerical deviation).
        ref_f32 = jax.block_until_ready(_ref_forward(x, w1, b1, w2, b2))
        np.testing.assert_allclose(np.asarray(out), np.asarray(ref_f32),
                                   rtol=5e-2, atol=5e-2)

    print("KERNEL_OK")
</pallas_src>

<mosaic_0001>
module attributes {stable_mosaic.version = 11 : i64} {
  func.func @_resblock_kernel(%arg0: i32, %arg1: memref<1x16x16x8xf32, #tpu.memory_space<vmem>>, %arg2: memref<72x8xbf16, #tpu.memory_space<vmem>>, %arg3: memref<72x8xbf16, #tpu.memory_space<vmem>>, %arg4: memref<1x16x16x8xf32, #tpu.memory_space<vmem>>, %arg5: memref<18x18x8xbf16, #tpu.memory_space<vmem>>) attributes {dimension_semantics = [#tpu.dimension_semantics<parallel>], iteration_bounds = array<i64: 2>, scalar_prefetch = 0 : i64, scratch_operands = 1 : i64, tpu.core_type = #tpu.core_type<tc>, window_params = [{transform_indices = @transform_0, window_bounds = array<i64: 1, 16, 16, 8>}, {pipeline_mode = #tpu.pipeline_mode<synchronous>, transform_indices = @transform_1, window_bounds = array<i64: 72, 8>}, {pipeline_mode = #tpu.pipeline_mode<synchronous>, transform_indices = @transform_2, window_bounds = array<i64: 72, 8>}, {transform_indices = @transform_3, window_bounds = array<i64: 1, 16, 16, 8>}]} {
    %cst = arith.constant 0.000000e+00 : bf16
    %0 = vector.broadcast %cst : bf16 to vector<1x18x8xbf16>
    %cst_0 = arith.constant 0.000000e+00 : bf16
    %1 = vector.broadcast %cst_0 : bf16 to vector<18x1x8xbf16>
    %c0 = arith.constant 0 : index
    %c0_1 = arith.constant 0 : index
    %c0_2 = arith.constant 0 : index
    %2 = vector.load %arg5[%c0, %c0_1, %c0_2] : memref<18x18x8xbf16, #tpu.memory_space<vmem>>, vector<1x18x8xbf16>
    tpu.vector_store %arg5[%c0, %c0_1, %c0_2], %0 {strides = array<i32>} : memref<18x18x8xbf16, #tpu.memory_space<vmem>>, vector<1x18x8xbf16>,
    %c17 = arith.constant 17 : index
    %c0_3 = arith.constant 0 : index
    %c0_4 = arith.constant 0 : index
    %3 = vector.load %arg5[%c17, %c0_3, %c0_4] : memref<18x18x8xbf16, #tpu.memory_space<vmem>>, vector<1x18x8xbf16>
    tpu.vector_store %arg5[%c17, %c0_3, %c0_4], %0 {strides = array<i32>} : memref<18x18x8xbf16, #tpu.memory_space<vmem>>, vector<1x18x8xbf16>,
    %c0_5 = arith.constant 0 : index
    %c0_6 = arith.constant 0 : index
    %c0_7 = arith.constant 0 : index
    %4 = vector.load %arg5[%c0_5, %c0_6, %c0_7] : memref<18x18x8xbf16, #tpu.memory_space<vmem>>, vector<18x1x8xbf16>
    tpu.vector_store %arg5[%c0_5, %c0_6, %c0_7], %1 {strides = array<i32>} : memref<18x18x8xbf16, #tpu.memory_space<vmem>>, vector<18x1x8xbf16>,
    %c0_8 = arith.constant 0 : index
    %c17_9 = arith.constant 17 : index
    %c0_10 = arith.constant 0 : index
    %5 = vector.load %arg5[%c0_8, %c17_9, %c0_10] : memref<18x18x8xbf16, #tpu.memory_space<vmem>>, vector<18x1x8xbf16>
    tpu.vector_store %arg5[%c0_8, %c17_9, %c0_10], %1 {strides = array<i32>} : memref<18x18x8xbf16, #tpu.memory_space<vmem>>, vector<18x1x8xbf16>,
    %c0_11 = arith.constant 0 : index
    %c0_12 = arith.constant 0 : index
    %c0_13 = arith.constant 0 : index
    %c0_14 = arith.constant 0 : index
    %6 = vector.load %arg1[%c0_11, %c0_12, %c0_13, %c0_14] : memref<1x16x16x8xf32, #tpu.memory_space<vmem>>, vector<1x16x16x8xf32>
    %7 = vector.shape_cast %6 : vector<1x16x16x8xf32> to vector<16x16x8xf32>
    %8 = arith.truncf %7 : vector<16x16x8xf32> to vector<16x16x8xbf16>
    %c1 = arith.constant 1 : index
    %c1_15 = arith.constant 1 : index
    %c0_16 = arith.constant 0 : index
    %9 = vector.load %arg5[%c1, %c1_15, %c0_16] : memref<18x18x8xbf16, #tpu.memory_space<vmem>>, vector<16x16x8xbf16>
    tpu.vector_store %arg5[%c1, %c1_15, %c0_16], %8 {strides = array<i32>} : memref<18x18x8xbf16, #tpu.memory_space<vmem>>, vector<16x16x8xbf16>,
    %c0_17 = arith.constant 0 : index
    %c0_18 = arith.constant 0 : index
    %c0_19 = arith.constant 0 : index
    %10 = vector.load %arg5[%c0_17, %c0_18, %c0_19] : memref<18x18x8xbf16, #tpu.memory_space<vmem>>, vector<16x16x8xbf16>
    %c0_20 = arith.constant 0 : index
    %c1_21 = arith.constant 1 : index
    %c0_22 = arith.constant 0 : index
    %11 = vector.load %arg5[%c0_20, %c1_21, %c0_22] : memref<18x18x8xbf16, #tpu.memory_space<vmem>>, vector<16x16x8xbf16>
    %c0_23 = arith.constant 0 : index
    %c2 = arith.constant 2 : index
    %c0_24 = arith.constant 0 : index
    %12 = vector.load %arg5[%c0_23, %c2, %c0_24] : memref<18x18x8xbf16, #tpu.memory_space<vmem>>, vector<16x16x8xbf16>
    %c1_25 = arith.constant 1 : index
    %c0_26 = arith.constant 0 : index
    %c0_27 = arith.constant 0 : index
    %13 = vector.load %arg5[%c1_25, %c0_26, %c0_27] : memref<18x18x8xbf16, #tpu.memory_space<vmem>>, vector<16x16x8xbf16>
    %c1_28 = arith.constant 1 : index
    %c1_29 = arith.constant 1 : index
    %c0_30 = arith.constant 0 : index
    %14 = vector.load %arg5[%c1_28, %c1_29, %c0_30] : memref<18x18x8xbf16, #tpu.memory_space<vmem>>, vector<16x16x8xbf16>
    %c1_31 = arith.constant 1 : index
    %c2_32 = arith.constant 2 : index
    %c0_33 = arith.constant 0 : index
    %15 = vector.load %arg5[%c1_31, %c2_32, %c0_33] : memref<18x18x8xbf16, #tpu.memory_space<vmem>>, vector<16x16x8xbf16>
    %c2_34 = arith.constant 2 : index
    %c0_35 = arith.constant 0 : index
    %c0_36 = arith.constant 0 : index
    %16 = vector.load %arg5[%c2_34, %c0_35, %c0_36] : memref<18x18x8xbf16, #tpu.memory_space<vmem>>, vector<16x16x8xbf16>
    %c2_37 = arith.constant 2 : index
    %c1_38 = arith.constant 1 : index
    %c0_39 = arith.constant 0 : index
    %17 = vector.load %arg5[%c2_37, %c1_38, %c0_39] : memref<18x18x8xbf16, #tpu.memory_space<vmem>>, vector<16x16x8xbf16>
    %c2_40 = arith.constant 2 : index
    %c2_41 = arith.constant 2 : index
    %c0_42 = arith.constant 0 : index
    %18 = vector.load %arg5[%c2_40, %c2_41, %c0_42] : memref<18x18x8xbf16, #tpu.memory_space<vmem>>, vector<16x16x8xbf16>
    %19 = tpu.concatenate %10, %11, %12, %13, %14, %15, %16, %17, %18 in 2 : vector<16x16x8xbf16>, vector<16x16x8xbf16>, vector<16x16x8xbf16>, vector<16x16x8xbf16>, vector<16x16x8xbf16>, vector<16x16x8xbf16>, vector<16x16x8xbf16>, vector<16x16x8xbf16>, vector<16x16x8xbf16> -> vector<16x16x72xbf16>
    %20 = vector.shape_cast %19 : vector<16x16x72xbf16> to vector<256x72xbf16>
    %c0_43 = arith.constant 0 : index
    %c0_44 = arith.constant 0 : index
    %21 = vector.load %arg2[%c0_43, %c0_44] : memref<72x8xbf16, #tpu.memory_space<vmem>>, vector<72x8xbf16>
    %cst_45 = arith.constant dense<0.000000e+00> : vector<256x8xf32>
    %22 = tpu.matmul %20, %21, %cst_45 {dimension_numbers = #tpu.dot_dimension_numbers<[1], [0], [0], [1], [0, 0, 1, 1], [], []>} : vector<256x72xbf16>, vector<72x8xbf16>, vector<256x8xf32> -> vector<256x8xf32>
    %cst_46 = arith.constant dense<0.000000e+00> : vector<8xf32>
    %23 = vector.multi_reduction <add>, %22, %cst_46 [0] : vector<256x8xf32> to vector<8xf32>
    %24 = vector.shape_cast %23 : vector<8xf32> to vector<1x8xf32>
    %cst_47 = arith.constant 2.560000e+02 : f32
    %25 = vector.broadcast %cst_47 : f32 to vector<1x8xf32>
    %26 = arith.divf %24, %25 : vector<1x8xf32>
    %27 = arith.mulf %22, %22 : vector<256x8xf32>
    %cst_48 = arith.constant dense<0.000000e+00> : vector<8xf32>
    %28 = vector.multi_reduction <add>, %27, %cst_48 [0] : vector<256x8xf32> to vector<8xf32>
    %29 = vector.shape_cast %28 : vector<8xf32> to vector<1x8xf32>
    %cst_49 = arith.constant 2.560000e+02 : f32
    %30 = vector.broadcast %cst_49 : f32 to vector<1x8xf32>
    %31 = arith.divf %29, %30 : vector<1x8xf32>
    %32 = arith.mulf %26, %26 : vector<1x8xf32>
    %33 = arith.subf %31, %32 : vector<1x8xf32>
    %cst_50 = arith.constant 0.000000e+00 : f32
    %34 = vector.broadcast %cst_50 : f32 to vector<1x8xf32>
    %35 = arith.maximumf %33, %34 : vector<1x8xf32>
    %36 = vector.broadcast %26 : vector<1x8xf32> to vector<256x8xf32>
    %37 = arith.subf %22, %36 : vector<256x8xf32>
    %cst_51 = arith.constant 9.99999974E-6 : f32
    %38 = vector.broadcast %cst_51 : f32 to vector<1x8xf32>
    %39 = arith.addf %35, %38 : vector<1x8xf32>
    %40 = math.rsqrt %39 : vector<1x8xf32>
    %41 = vector.broadcast %40 : vector<1x8xf32> to vector<256x8xf32>
    %42 = arith.mulf %37, %41 : vector<256x8xf32>
    %cst_52 = arith.constant 0.000000e+00 : f32
    %43 = vector.broadcast %cst_52 : f32 to vector<256x8xf32>
    %44 = arith.maximumf %42, %43 : vector<256x8xf32>
    %45 = vector.shape_cast %44 : vector<256x8xf32> to vector<16x16x8xf32>
    %46 = arith.truncf %45 : vector<16x16x8xf32> to vector<16x16x8xbf16>
    %c1_53 = arith.constant 1 : index
    %c1_54 = arith.constant 1 : index
    %c0_55 = arith.constant 0 : index
    %47 = vector.load %arg5[%c1_53, %c1_54, %c0_55] : memref<18x18x8xbf16, #tpu.memory_space<vmem>>, vector<16x16x8xbf16>
    tpu.vector_store %arg5[%c1_53, %c1_54, %c0_55], %46 {strides = array<i32>} : memref<18x18x8xbf16, #tpu.memory_space<vmem>>, vector<16x16x8xbf16>,
    %c0_56 = arith.constant 0 : index
    %c0_57 = arith.constant 0 : index
    %c0_58 = arith.constant 0 : index
    %48 = vector.load %arg5[%c0_56, %c0_57, %c0_58] : memref<18x18x8xbf16, #tpu.memory_space<vmem>>, vector<16x16x8xbf16>
    %c0_59 = arith.constant 0 : index
    %c1_60 = arith.constant 1 : index
    %c0_61 = arith.constant 0 : index
    %49 = vector.load %arg5[%c0_59, %c1_60, %c0_61] : memref<18x18x8xbf16, #tpu.memory_space<vmem>>, vector<16x16x8xbf16>
    %c0_62 = arith.constant 0 : index
    %c2_63 = arith.constant 2 : index
    %c0_64 = arith.constant 0 : index
    %50 = vector.load %arg5[%c0_62, %c2_63, %c0_64] : memref<18x18x8xbf16, #tpu.memory_space<vmem>>, vector<16x16x8xbf16>
    %c1_65 = arith.constant 1 : index
    %c0_66 = arith.constant 0 : index
    %c0_67 = arith.constant 0 : index
    %51 = vector.load %arg5[%c1_65, %c0_66, %c0_67] : memref<18x18x8xbf16, #tpu.memory_space<vmem>>, vector<16x16x8xbf16>
    %c1_68 = arith.constant 1 : index
    %c1_69 = arith.constant 1 : index
    %c0_70 = arith.constant 0 : index
    %52 = vector.load %arg5[%c1_68, %c1_69, %c0_70] : memref<18x18x8xbf16, #tpu.memory_space<vmem>>, vector<16x16x8xbf16>
    %c1_71 = arith.constant 1 : index
    %c2_72 = arith.constant 2 : index
    %c0_73 = arith.constant 0 : index
    %53 = vector.load %arg5[%c1_71, %c2_72, %c0_73] : memref<18x18x8xbf16, #tpu.memory_space<vmem>>, vector<16x16x8xbf16>
    %c2_74 = arith.constant 2 : index
    %c0_75 = arith.constant 0 : index
    %c0_76 = arith.constant 0 : index
    %54 = vector.load %arg5[%c2_74, %c0_75, %c0_76] : memref<18x18x8xbf16, #tpu.memory_space<vmem>>, vector<16x16x8xbf16>
    %c2_77 = arith.constant 2 : index
    %c1_78 = arith.constant 1 : index
    %c0_79 = arith.constant 0 : index
    %55 = vector.load %arg5[%c2_77, %c1_78, %c0_79] : memref<18x18x8xbf16, #tpu.memory_space<vmem>>, vector<16x16x8xbf16>
    %c2_80 = arith.constant 2 : index
    %c2_81 = arith.constant 2 : index
    %c0_82 = arith.constant 0 : index
    %56 = vector.load %arg5[%c2_80, %c2_81, %c0_82] : memref<18x18x8xbf16, #tpu.memory_space<vmem>>, vector<16x16x8xbf16>
    %57 = tpu.concatenate %48, %49, %50, %51, %52, %53, %54, %55, %56 in 2 : vector<16x16x8xbf16>, vector<16x16x8xbf16>, vector<16x16x8xbf16>, vector<16x16x8xbf16>, vector<16x16x8xbf16>, vector<16x16x8xbf16>, vector<16x16x8xbf16>, vector<16x16x8xbf16>, vector<16x16x8xbf16> -> vector<16x16x72xbf16>
    %58 = vector.shape_cast %57 : vector<16x16x72xbf16> to vector<256x72xbf16>
    %c0_83 = arith.constant 0 : index
    %c0_84 = arith.constant 0 : index
    %59 = vector.load %arg3[%c0_83, %c0_84] : memref<72x8xbf16, #tpu.memory_space<vmem>>, vector<72x8xbf16>
    %cst_85 = arith.constant dense<0.000000e+00> : vector<256x8xf32>
    %60 = tpu.matmul %58, %59, %cst_85 {dimension_numbers = #tpu.dot_dimension_numbers<[1], [0], [0], [1], [0, 0, 1, 1], [], []>} : vector<256x72xbf16>, vector<72x8xbf16>, vector<256x8xf32> -> vector<256x8xf32>
    %cst_86 = arith.constant dense<0.000000e+00> : vector<8xf32>
    %61 = vector.multi_reduction <add>, %60, %cst_86 [0] : vector<256x8xf32> to vector<8xf32>
    %62 = vector.shape_cast %61 : vector<8xf32> to vector<1x8xf32>
    %cst_87 = arith.constant 2.560000e+02 : f32
    %63 = vector.broadcast %cst_87 : f32 to vector<1x8xf32>
    %64 = arith.divf %62, %63 : vector<1x8xf32>
    %65 = arith.mulf %60, %60 : vector<256x8xf32>
    %cst_88 = arith.constant dense<0.000000e+00> : vector<8xf32>
    %66 = vector.multi_reduction <add>, %65, %cst_88 [0] : vector<256x8xf32> to vector<8xf32>
    %67 = vector.shape_cast %66 : vector<8xf32> to vector<1x8xf32>
    %cst_89 = arith.constant 2.560000e+02 : f32
    %68 = vector.broadcast %cst_89 : f32 to vector<1x8xf32>
    %69 = arith.divf %67, %68 : vector<1x8xf32>
    %70 = arith.mulf %64, %64 : vector<1x8xf32>
    %71 = arith.subf %69, %70 : vector<1x8xf32>
    %cst_90 = arith.constant 0.000000e+00 : f32
    %72 = vector.broadcast %cst_90 : f32 to vector<1x8xf32>
    %73 = arith.maximumf %71, %72 : vector<1x8xf32>
    %74 = vector.broadcast %64 : vector<1x8xf32> to vector<256x8xf32>
    %75 = arith.subf %60, %74 : vector<256x8xf32>
    %cst_91 = arith.constant 9.99999974E-6 : f32
    %76 = vector.broadcast %cst_91 : f32 to vector<1x8xf32>
    %77 = arith.addf %73, %76 : vector<1x8xf32>
    %78 = math.rsqrt %77 : vector<1x8xf32>
    %79 = vector.broadcast %78 : vector<1x8xf32> to vector<256x8xf32>
    %80 = arith.mulf %75, %79 : vector<256x8xf32>
    %81 = vector.shape_cast %80 : vector<256x8xf32> to vector<16x16x8xf32>
    %82 = arith.addf %81, %7 : vector<16x16x8xf32>
    %c0_92 = arith.constant 0 : index
    %c0_93 = arith.constant 0 : index
    %c0_94 = arith.constant 0 : index
    %c0_95 = arith.constant 0 : index
    %83 = vector.load %arg4[%c0_92, %c0_93, %c0_94, %c0_95] : memref<1x16x16x8xf32, #tpu.memory_space<vmem>>, vector<1x16x16x8xf32>
    %84 = vector.shape_cast %83 : vector<1x16x16x8xf32> to vector<16x16x8xf32>
    %85 = vector.shape_cast %82 : vector<16x16x8xf32> to vector<1x16x16x8xf32>
    tpu.vector_store %arg4[%c0_92, %c0_93, %c0_94, %c0_95], %85 {strides = array<i32>} : memref<1x16x16x8xf32, #tpu.memory_space<vmem>>, vector<1x16x16x8xf32>,
    return
  }
  func.func @transform_0(%arg0: i32) -> (i32, i32, i32, i32) {
    %c0_i32 = arith.constant 0 : i32
    %c0_i32_0 = arith.constant 0 : i32
    %c0_i32_1 = arith.constant 0 : i32
    %c0_i32_2 = arith.constant 0 : i32
    return %arg0, %c0_i32, %c0_i32_0, %c0_i32_1 : i32, i32, i32, i32
  }
  func.func @transform_1(%arg0: i32) -> (i32, i32) {
    %c0_i32 = arith.constant 0 : i32
    %c0_i32_0 = arith.constant 0 : i32
    %c0_i32_1 = arith.constant 0 : i32
    return %c0_i32, %c0_i32_0 : i32, i32
  }
  func.func @transform_2(%arg0: i32) -> (i32, i32) {
    %c0_i32 = arith.constant 0 : i32
    %c0_i32_0 = arith.constant 0 : i32
    %c0_i32_1 = arith.constant 0 : i32
    return %c0_i32, %c0_i32_0 : i32, i32
  }
  func.func @transform_3(%arg0: i32) -> (i32, i32, i32, i32) {
    %c0_i32 = arith.constant 0 : i32
    %c0_i32_0 = arith.constant 0 : i32
    %c0_i32_1 = arith.constant 0 : i32
    %c0_i32_2 = arith.constant 0 : i32
    return %arg0, %c0_i32, %c0_i32_0, %c0_i32_1 : i32, i32, i32, i32
  }
}

</mosaic_0001>

<bundles_post_ra>
// kernel: resblock_forward.1
= control target key start
LH: loop header
LB: loop body
LE: loop exit
PB: predicated region body
PF: predicated region fallthrough
CT: control target
= control target key end

     0   :  { %s6877_s12 = smov 0   ;;  %s10148_s0 = inlined_call_operand.vmem [shape: f32[2,16,16,8], index: 0, kind: input, shape index: {}]   ;;  %s10149_s1 = inlined_call_operand.vmem [shape: bf16[72,8], index: 1, kind: input, shape index: {}]   ;;  %s10150_s2 = inlined_call_operand.vmem [shape: bf16[72,8], index: 2, kind: input, shape index: {}]   ;;  %s10151_s3 = inlined_call_operand.vmem [shape: f32[2,16,16,8], index: 3, kind: output, shape index: {}]  }
   0x1 LB: > { %s6153_s13 = sadd.s32 4294967295, %s6845_s12   ;;  %p6157_p0 = scmp.ge.s32.totalorder %s6845_s12, 1  ;;  %s6845_s12 = sphi %s6877_s12, %s13_s12  }
   0x2   : > { %p137_p1 = scmp.lt.s32.totalorder %s6845_s12, 3 }
   0x4   : > { %p138_p2 = pnand %p6157_p0, %p137_p1 }
   0x6   : > { %141 = sbr.rel (%p138_p2) target bundleno = 1414 (0x586), region = 32 }
   0xb   : > { %p161_p3 = scmp.lt.s32.totalorder %s6153_s13, 1  ;;  %vm175_vm0 = vcmask 57344   ;;  %vm182_vm1 = vsmask.f32 256  ;;  %vm172_vm2 = vcmask 60416   ;;  %v6847_v4 = vmov 0  }
   0xc   : > { %vm6887_vm3 = vmand %vm175_vm0, %vm182_vm1  ;;  %v190_v1 = vld [vmem:[#allocation2 + $0x18] sm:$0x1]  ;;  %v187_v3 = vld [vmem:[#allocation2 + $0xc] sm:$0x1]  ;;  %173 = vst.msk [vmem:[#allocation2] sm:$0xf] %vm172_vm2, %v6847_v4 }
   0xd   : > { %s10292_s13 = smov (!%p161_p3, %s6153_s13), 1  ;;  %v191_v2 = vsel %vm6887_vm3, 0, %v190_v1  ;;  %vm238_vm4 = vsmask.f32 7938  ;;  %vm358_vm5 = vsmask.f32 4368 }
   0xe   : > { %192 = vst [vmem:[#allocation2 + $0x18] sm:$0x1] %v191_v2  ;;  %s6228_s14 = sshll.u32 %s10292_s13, 8  ;;  %v188_v7 = vsel %vm6887_vm3, 0, %v187_v3  ;;  %v193_v13 = vld [vmem:[#allocation2 + $0x24] sm:$0x1]  ;;  %vm6919_vm6 = vmand %vm175_vm0, %vm238_vm4 }
   0xf   : > { %s6902_s17 = scalar_lea.vmem %s10148_s0, %s6228_s14  ;;  %174 = vst.msk [vmem:[#allocation2 + $0x4] sm:$0xf] %vm172_vm2, %v6847_v4  ;;  %v243_v18 = vld [vmem:[#allocation2 + $0x14] sm:$0x1]  ;;  %v194_v26 = vsel %vm6887_vm3, 0, %v193_v13  ;;  %vm6927_vm7 = vmor %vm182_vm1, %vm358_vm5  ;;  %vm1389_vm9 = vcmask 1046528  }
  0x10   : > { %v296_v5 = vld [vmem:[%s6902_s17 + $0x10] sm:$0xff]  ;;  %v297_v6 = vld [vmem:[%s6902_s17 + $0x18] sm:$0xff]  ;;  %176 = vst.msk [vmem:[#allocation2 + $0x8] sm:$0x1] %vm175_vm0, %v6847_v4  ;;  %v294_v8 = vld [vmem:[%s6902_s17] sm:$0xff]  ;;  %v244_v31 = vsel %vm6919_vm6, 0, %v243_v18 }
  0x11   : > { %v328_v9 = vpack.c.bf16 %v296_v5, %v296_v5  ;;  %v329_v10 = vpack.c.bf16 %v297_v6, %v297_v6  ;;  %178 = vst.msk [vmem:[#allocation2 + $0xcc] sm:$0xf] %vm172_vm2, %v6847_v4  ;;  %v295_v11 = vld [vmem:[%s6902_s17 + $0x8] sm:$0xff]  ;;  %v326_v12 = vpack.c.bf16 %v294_v8, %v294_v8  ;;  %v298_v14 = vld [vmem:[%s6902_s17 + $0x20] sm:$0xff]  ;;  %vm6937_vm8 = vmand %vm172_vm2, %vm238_vm4  ;;  %vm1116_vm10 = vsmask.f32 7424 }
  0x12   : > { %179 = vst.msk [vmem:[#allocation2 + $0xd0] sm:$0xf] %vm172_vm2, %v6847_v4  ;;  %v327_v15 = vpack.c.bf16 %v295_v11, %v295_v11  ;;  %v299_v16 = vld [vmem:[%s6902_s17 + $0x28] sm:$0xff]  ;;  %v330_v17 = vpack.c.bf16 %v298_v14, %v298_v14  ;;  %v246_v46 = vld [vmem:[#allocation2 + $0x20] sm:$0x1]  ;;  %v308_v47 = vld [vmem:[%s6902_s17 + $0x70] sm:$0xff] }
  0x13   : > { %v378_v19 = vshrl.u32 %v328_v9, 16  ;;  %v381_v20 = vshll.u32 %v328_v9, 16  ;;  %v386_v21 = vshrl.u32 %v329_v10, 16  ;;  %v389_v22 = vshll.u32 %v329_v10, 16  ;;  %180 = vst.msk [vmem:[#allocation2 + $0xd4] sm:$0x1] %vm175_vm0, %v6847_v4 }
  0x14   : > { %189 = vst [vmem:[#allocation2 + $0xc] sm:$0x1] %v188_v7  ;;  %v361_v24 = vshrl.u32 %v326_v12, 16  ;;  %v364_v25 = vshll.u32 %v326_v12, 16  ;;  %v369_v30 = vshrl.u32 %v327_v15, 16  ;;  %v331_v36 = vpack.c.bf16 %v299_v16, %v299_v16  ;;  %v309_v10 = vld [vmem:[%s6902_s17 + $0x78] sm:$0xff] }
  0x15   : > { %v380_v28 = vrot.slane %v378_v19, 7  ;;  %v6931_v29 = vrot.slane %v386_v21, 7  ;;  %v690_v33 = vld [vmem:[#allocation2 + $0x18] sm:$0xf]  ;;  %v184_v35 = vld [vmem:[#allocation2] sm:$0x1]  ;;  %v6952_v61 = vpack.c.bf16 %v308_v47, %v308_v47  ;;  %v6976_v19 = vpack.c.bf16 %v309_v10, %v309_v10 }
  0x16   : > { %v363_v34 = vrot.slane %v361_v24, 7  ;;  %v395_v37 = vshrl.u32 %v330_v17, 16  ;;  %v372_v42 = vshll.u32 %v327_v15, 16  ;;  %195 = vst [vmem:[#allocation2 + $0x24] sm:$0x1] %v194_v26  ;;  %v371_v52 = vrot.slane %v369_v30, 7 }
  0x17   : > { %v383_v38 = vor.u32 %v381_v20, %v380_v28  ;;  %v384_v39 = vrot.slane %v380_v28, 4  ;;  %v391_v40 = vor.u32 %v389_v22, %v6931_v29  ;;  %v240_v41 = vld [vmem:[#allocation2 + $0x8] sm:$0x1]  ;;  %245 = vst [vmem:[#allocation2 + $0x14] sm:$0x1] %v244_v31  ;;  %v185_v53 = vsel %vm6887_vm3, 0, %v184_v35 }
  0x18   : > { %v241_v43 = vsel %vm6919_vm6, 0, %v240_v41  ;;  %v366_v44 = vor.u32 %v364_v25, %v363_v34  ;;  %v367_v45 = vrot.slane %v363_v34, 4  ;;  %v6452_v50 = vld [vmem:[#allocation2] sm:$0xf0]  ;;  %v6453_v51 = vld [vmem:[#allocation2] sm:$0xe]  ;;  %v374_v57 = vor.u32 %v372_v42, %v371_v52 }
  0x19   : > { %v392_v48 = vsel %vm6927_vm7, %v384_v39, %v391_v40  ;;  %v691_v49 = vsel %vm6937_vm8, %v383_v38, %v690_v33  ;;  %242 = vst [vmem:[#allocation2 + $0x8] sm:$0x1] %v241_v43  ;;  %v397_v54 = vrot.slane %v395_v37, 7  ;;  %v398_v55 = vshll.u32 %v330_v17, 16  ;;  %v208_v5 = vld [vmem:[#allocation2 + $0x60] sm:$0x1] }
  0x1a   : > { %692 = vst [vmem:[#allocation2 + $0x18] sm:$0xf] %v691_v49  ;;  %v403_v56 = vshrl.u32 %v331_v36, 16  ;;  %v376_v58 = vrot.slane %v371_v52, 4  ;;  %v406_v60 = vshll.u32 %v331_v36, 16  ;;  %v375_v3 = vsel %vm6927_vm7, %v367_v45, %v374_v57  ;;  %s6848_s18 = smov 24  }
  0x1b   : > { %693 = vst.msk [vmem:[#allocation2 + $0x1c] sm:$0xf] %vm172_vm2, %v392_v48  ;;  %v683_v59 = vld [vmem:[#allocation2 + $0xc] sm:$0xf]  ;;  %v400_v63 = vor.u32 %v398_v55, %v397_v54  ;;  %v401_v1 = vrot.slane %v397_v54, 4  ;;  %v247_v4 = vsel %vm6919_vm6, 0, %v246_v46  ;;  %v6454_v7 = vor.u32 %v6453_v51, %v6452_v50 }
  0x1c   : > { %v684_v62 = vsel %vm6937_vm8, %v366_v44, %v683_v59  ;;  %186 = vst [vmem:[#allocation2] sm:$0x1] %v185_v53  ;;  %v6956_v2 = vrot.slane %v403_v56, 7  ;;  %v6962_v6 = vld [vmem:[#allocation2 + $0x68] sm:$0x1]  ;;  %v480_v13 = vshrl.u32 %v6952_v61, 16 }
  0x1d   : > { %685 = vst [vmem:[#allocation2 + $0xc] sm:$0xf] %v684_v62  ;;  %v697_v9 = vld [vmem:[#allocation2 + $0x24] sm:$0xf]  ;;  %v393_v17 = vrot.slane %v6931_v29, 4  ;;  %v1390_v21 = vrot.slane %v6454_v7, 1 }
  0x1e   : > { %686 = vst.msk [vmem:[#allocation2 + $0x10] sm:$0xf] %vm172_vm2, %v375_v3  ;;  %v408_v8 = vor.u32 %v406_v60, %v6956_v2  ;;  %v698_v11 = vsel %vm6937_vm8, %v400_v63, %v697_v9  ;;  %v687_v12 = vld [vmem:[#allocation2 + $0x14] sm:$0x1]  ;;  %v209_v22 = vsel %vm6887_vm3, 0, %v208_v5  ;;  %v265_v24 = vsel %vm6919_vm6, 0, %v6962_v6 }
  0x1f   : > { %248 = vst [vmem:[#allocation2 + $0x20] sm:$0x1] %v247_v4  ;;  %v688_v16 = vsel %vm6887_vm3, %v376_v58, %v687_v12  ;;  %s6849_s19 = smov 48   ;;  %v410_v28 = vrot.slane %v6956_v2, 4  ;;  %v6990_v29 = vrot.slane %v480_v13, 7  ;;  %v483_v30 = vshll.u32 %v6952_v61, 16 }
  0x20   : > { %v827_v14 = vld [vmem:[#allocation2 + $0x8] sm:$0x1]  ;;  %v409_v15 = vsel %vm6927_vm7, %v401_v1, %v408_v8  ;;  %699 = vst [vmem:[#allocation2 + $0x24] sm:$0xf] %v698_v11  ;;  %v488_v42 = vshrl.u32 %v6976_v19, 16  ;;  %v310_v49 = vld [vmem:[%s6902_s17 + $0x80] sm:$0xff] }
  0x21   : > { %v1084_v18 = vunpack.c.l.b16 %v827_v14  ;;  %700 = vst.msk [vmem:[#allocation2 + $0x28] sm:$0xf] %vm172_vm2, %v409_v15  ;;  %v6993_v41 = vld [vmem:[#allocation2 + $0x18] sm:$0xe]  ;;  %s6850_s20 = smov 16   ;;  %v486_v61 = vrot.slane %v6990_v29, 4  ;;  %v485_v3 = vor.u32 %v483_v30, %v6990_v29  ;;  %v7013_v4 = vpack.c.bf16 %v310_v49, %v310_v49 }
  0x22   : > { %v6978_v20 = vld [vmem:[#allocation2 + $0x18] sm:$0xff]   ;;  %689 = vst [vmem:[#allocation2 + $0x14] sm:$0x1] %v688_v16  ;;  %v311_v11 = vld [vmem:[%s6902_s17 + $0x88] sm:$0xff]  ;;  %s6851_s21 = smov 8   ;;  %s6852_s22 = smov 40  }
  0x23   : > { %1552 = vrot.lane.b32.xlu1 %v6978_v20, %s6848_s18  ;;  %v1100_v25 = vpack.c.b16 %v1084_v18, %v1084_v18  ;;  %v6239_v26 = vld [vmem:[#allocation2] sm:$0xff]   ;;  %2062 = vrot.lane.b32.xlu2 %v6978_v20, %s6849_s19  ;;  %v7000_v53 = vld [vmem:[#allocation2 + $0x18] sm:$0xf0]  ;;  %v7002_v54 = vld [vmem:[#allocation2 + $0x18] sm:$0xe]  ;;  %v1645_v10 = vshll.u32 %v6978_v20, 16  ;;  %v7030_v30 = vpack.c.bf16 %v311_v11, %v311_v11 }
  0x24   : > { %v859_v31 = vld [vmem:[#allocation2 + $0xc] sm:$0xf]  ;;  %v1118_v33 = vshrl.u32 %v6239_v26, 16  ;;  %v1120_v34 = vshll.u32 %v6239_v26, 16  ;;  %210 = vst [vmem:[#allocation2 + $0x60] sm:$0x1] %v209_v22  ;;  %v6502_v8 = vor.u32 %v6993_v41, %v7000_v53 }
  0x25   : > { %v844_v35 = vld [vmem:[#allocation2 + $0xc] sm:$0xe]  ;;  %v1391_v36 = vrot.slane %v1100_v25, 1  ;;  %v1502_v38 = vunpack.c.l.b16 %v859_v31  ;;  %v1125_v39 = vshll.u32 %v1100_v25, 16  ;;  %v798_v40 = vld [vmem:[#allocation2 + $0x10] sm:$0xf] }
  0x26   : > { %v860_v37 = vld [vmem:[#allocation2 + $0xc] sm:$0xff]   ;;  %v1122_v44 = vrot.slane %v1120_v34, 1  ;;  %v1023_v45 = vunpack.c.l.b16 %v798_v40  ;;  %v1358_v46 = vunpack.c.l.b16 %v844_v35  ;;  %v694_v48 = vld [vmem:[#allocation2 + $0x20] sm:$0x1]  ;;  %v6476_v60 = vld [vmem:[#allocation2 + $0x18] sm:$0xf0] }
  0x27   : > { %v1503_v43 = vunpack.c.h.b16 %v860_v37  ;;  %v907_v47 = vld [vmem:[#allocation2 + $0xc] sm:$0xe]  ;;  %v1392_v50 = vsel %vm1389_vm9, %v1390_v21, %v1391_v36  ;;  %v695_v52 = vsel %vm6887_vm3, %v393_v17, %v694_v48  ;;  %v1127_v57 = vrot.slane %v1125_v39, 1  ;;  %266 = vst [vmem:[#allocation2 + $0x68] sm:$0x1] %v265_v24  ;;  %s6853_s23 = smov 32  }
  0x28   : > { %v1870_v51 = vunpack.c.l.b16 %v907_v47  ;;  %1438 = vrot.lane.b32.xlu0 %v1392_v50, %s6850_s20  ;;  %v1123_v56 = vor.u32 %v1122_v44, %v1118_v33  ;;  %v7007_v58 = vld [vmem:[#allocation2 + $0x24] sm:$0xff]   ;;  %696 = vst [vmem:[#allocation2 + $0x20] sm:$0x1] %v695_v52  ;;  %v1374_v6 = vpack.c.b16 %v1023_v45, %v1358_v46  ;;  %v1022_v7 = vunpack.c.l.b16 %v860_v37  ;;  %v249_v29 = vld [vmem:[#allocation2 + $0x2c] sm:$0x1]  ;;  %s6854_s24 = smov 64  }
  0x29   : > { %v7005_v55 = vpack.c.b16 %v1503_v43, %v1502_v38  ;;  %v7009_v59 = vld [vmem:[#allocation2 + $0x24] sm:$0xf0]  ;;  %v828_v62 = vld [vmem:[#allocation2 + $0x14] sm:$0x1]  ;;  %v6478_v14 = vor.u32 %v7002_v54, %v6476_v60  ;;  %v1643_v15 = vshrl.u32 %v6978_v20, 16  ;;  %v490_v21 = vrot.slane %v488_v42, 7 }
  0x2a   : > { %v891_v63 = vld [vmem:[#allocation2 + $0x14] sm:$0x1]  ;;  %v1886_v1 = vpack.c.b16 %v1503_v43, %v1870_v51  ;;  %v1085_v5 = vunpack.c.l.b16 %v828_v62  ;;  %v1128_v13 = vsel %vm1116_vm10, %v1123_v56, %v1127_v57  ;;  %v1393_v22 = vrot.slane %v1374_v6, 1  ;;  %v211_v35 = vld [vmem:[#allocation2 + $0x6c] sm:$0x1]  ;;  %s6855_s25 = smov 56  }
  0x2b   : > { %1550 = vrot.lane.b32.xlu1 %v7005_v55, %s6848_s18  ;;  %v1598_v9 = vunpack.c.l.b16 %v891_v63  ;;  %v1633_v12 = vshll.u32 %v7005_v55, 16  ;;  %v7027_v24 = vpack.c.b16 %v1023_v45, %v1022_v7  ;;  %v491_v25 = vshll.u32 %v6976_v19, 16  ;;  %v732_v26 = vld [vmem:[#allocation2 + $0x60] sm:$0xf]  ;;  %v267_v53 = vld [vmem:[#allocation2 + $0x74] sm:$0x1] }
  0x2c   : > { %v7025_v16 = vpack.c.b16 %v1085_v5, %v1085_v5  ;;  %v1902_v18 = vrot.slane %v1886_v1, 1  ;;  %v1647_v33 = vrot.slane %v1645_v10, 1  ;;  %v495_v34 = vrot.slane %v490_v21, 4  ;;  %v7055_v1 = vld [vmem:[#allocation2 + $0x24] sm:$0xe] }
  0x2d   : > { %v1614_v17 = vpack.c.b16 %v1598_v9, %v1598_v9  ;;  %v1631_v37 = vshrl.u32 %v7005_v55, 16  ;;  %v1635_v38 = vrot.slane %v1633_v12, 1  ;;  %v493_v39 = vor.u32 %v491_v25, %v490_v21 }
  0x2e   : > { %v733_v19 = vsel %vm6937_vm8, %v485_v3, %v732_v26  ;;  %v1394_v40 = vrot.slane %v7025_v16, 1  ;;  %v736_v44 = vld [vmem:[#allocation2 + $0x68] sm:$0x1]  ;;  %v1132_v48 = vshll.u32 %v7027_v24, 16  ;;  %v2414_v50 = vrot.slane %v6502_v8, 1 }
  0x2f   : > { %v1903_v31 = vrot.slane %v1614_v17, 1  ;;  %v956_v20 = vld [vmem:[#allocation2 + $0x20] sm:$0x1]  ;;  %734 = vst [vmem:[#allocation2 + $0x60] sm:$0xf] %v733_v19  ;;  %v1638_v45 = vshll.u32 %v1614_v17, 16  ;;  %v494_v46 = vsel %vm6927_vm7, %v486_v61, %v493_v39  ;;  %v737_v47 = vsel %vm6887_vm3, %v495_v34, %v736_v44 }
  0x30   : > { %1309 = vrot.lane.b32.xlu0 %v1128_v13, %s6851_s21  ;;  %v892_v36 = vld [vmem:[#allocation2 + $0x20] sm:$0x1]  ;;  %v2110_v42 = vunpack.c.l.b16 %v956_v20  ;;  %735 = vst.msk [vmem:[#allocation2 + $0x64] sm:$0xf] %vm172_vm2, %v494_v46  ;;  %v250_v52 = vsel %vm6919_vm6, 0, %v249_v29  ;;  %v1905_v54 = vrot.slane %v6478_v14, 1  ;;  %v7049_v55 = vor.u32 %v1647_v33, %v1643_v15 }
  0x31   : > { %v1904_v41 = vsel %vm1389_vm9, %v1902_v18, %v1903_v31  ;;  %v1599_v43 = vunpack.c.l.b16 %v892_v36  ;;  %738 = vst [vmem:[#allocation2 + $0x68] sm:$0x1] %v737_v47  ;;  %v1130_v56 = vshrl.u32 %v7027_v24, 16  ;;  %v212_v57 = vsel %vm6887_vm3, 0, %v211_v35  ;;  %v214_v17 = vld [vmem:[#allocation2 + $0x78] sm:$0x1] }
  0x32   : > { %1950 = vrot.lane.b32.xlu2 %v1904_v41, %s6852_s22  ;;  %v2126_v49 = vpack.c.b16 %v2110_v42, %v2110_v42  ;;  %v1395_v60 = vsel %vm1389_vm9, %v1393_v22, %v1394_v40  ;;  %v1636_v63 = vor.u32 %v1635_v38, %v1631_v37  ;;  %251 = vst [vmem:[#allocation2 + $0x2c] sm:$0x1] %v250_v52  ;;  %v1640_v3 = vrot.slane %v1638_v45, 1  ;;  %v312_v31 = vld [vmem:[%s6902_s17 + $0x90] sm:$0xff]  ;;  %v313_v33 = vld [vmem:[%s6902_s17 + $0x98] sm:$0xff] }
  0x33   : > { %2064 = vrot.lane.b32.xlu1 %v7007_v58, %s6849_s19  ;;  %v1615_v51 = vpack.c.b16 %v1599_v43, %v1599_v43  ;;  %v1134_v5 = vrot.slane %v1132_v48, 1  ;;  %213 = vst [vmem:[#allocation2 + $0x6c] sm:$0x1] %v212_v57  ;;  %v268_v6 = vsel %vm6919_vm6, 0, %v267_v53  ;;  %v497_v7 = vshrl.u32 %v7013_v4, 16 }
  0x34   : > { %v2415_v61 = vrot.slane %v2126_v49, 1  ;;  %v1137_v11 = vshll.u32 %v7025_v16, 16  ;;  %269 = vst [vmem:[#allocation2 + $0x74] sm:$0x1] %v268_v6  ;;  %v500_v13 = vshll.u32 %v7013_v4, 16  ;;  %v505_v14 = vshrl.u32 %v7030_v30, 16 }
  0x35   : > { %v1650_v62 = vshll.u32 %v1615_v51, 16  ;;  %v1906_v9 = vrot.slane %v1615_v51, 1  ;;  %v499_v12 = vrot.slane %v497_v7, 7  ;;  %v508_v15 = vshll.u32 %v7030_v30, 16  ;;  %v270_v46 = vld [vmem:[#allocation2 + $0x80] sm:$0x1] }
  0x36   : > { %v2416_v8 = vsel %vm1389_vm9, %v2414_v50, %v2415_v61  ;;  %v2157_v18 = vshll.u32 %v7007_v58, 16  ;;  %v2150_v22 = vshll.u32 %v2126_v49, 16  ;;  %v1641_v16 = vsel %vm1116_vm10, %v1636_v63, %v1640_v3  ;;  %v252_v7 = vld [vmem:[#allocation2 + $0x38] sm:$0x1] }
  0x37   : > { %v1652_v10 = vrot.slane %v1650_v62, 1  ;;  %v6433_v25 = vld [vmem:[#allocation2 + $0x60] sm:$0xff]   ;;  %v502_v26 = vor.u32 %v500_v13, %v499_v12  ;;  %v503_v29 = vrot.slane %v499_v12, 4  ;;  %v507_v4 = vrot.slane %v505_v14, 7 }
  0x38   : > { %1440 = vrot.lane.b32.xlu0 %v1395_v60, %s6850_s20  ;;  %v1907_v30 = vsel %vm1389_vm9, %v1905_v54, %v1906_v9  ;;  %v835_v34 = vld [vmem:[#allocation2 + $0x68] sm:$0x1]  ;;  %v1135_v35 = vor.u32 %v1134_v5, %v1130_v56  ;;  %v1139_v20 = vrot.slane %v1137_v11, 1  ;;  %v215_v36 = vsel %vm6887_vm3, 0, %v214_v17  ;;  %v196_v54 = vld [vmem:[#allocation2 + $0x30] sm:$0x1] }
  0x39   : > { %v1653_v21 = vsel %vm1116_vm10, %v7049_v55, %v1652_v10  ;;  %v1092_v37 = vunpack.c.l.b16 %v835_v34  ;;  %v1216_v38 = vshll.u32 %v6433_v25, 16  ;;  %v701_v39 = vld [vmem:[#allocation2 + $0x2c] sm:$0x1]  ;;  %v510_v19 = vor.u32 %v508_v15, %v507_v4  ;;  %216 = vst [vmem:[#allocation2 + $0x78] sm:$0x1] %v215_v36 }
  0x3a   : > { %1824 = vrot.lane.b32.xlu2 %v1653_v21, %s6853_s23  ;;  %v512_v40 = vrot.slane %v507_v4, 4  ;;  %v2152_v41 = vrot.slane %v2150_v22, 1  ;;  %v702_v42 = vsel %vm6887_vm3, %v410_v28, %v701_v39  ;;  %v739_v43 = vld [vmem:[#allocation2 + $0x6c] sm:$0xf]  ;;  %v344_v44 = vpack.c.bf16 %v312_v31, %v312_v31  ;;  %v829_v62 = vld [vmem:[#allocation2 + $0x20] sm:$0x1] }
  0x3b   : > { %2462 = vrot.lane.b32.xlu1 %v2416_v8, %s6854_s24  ;;  %v345_v45 = vpack.c.bf16 %v313_v33, %v313_v33  ;;  %v7081_v47 = vpack.c.b16 %v1092_v37, %v1092_v37  ;;  %v1214_v48 = vshrl.u32 %v6433_v25, 16  ;;  %703 = vst [vmem:[#allocation2 + $0x2c] sm:$0x1] %v702_v42  ;;  %v511_v49 = vsel %vm6927_vm7, %v503_v29, %v510_v19  ;;  %v743_v51 = vld [vmem:[#allocation2 + $0x74] sm:$0x1] }
  0x3c   : > { %v740_v50 = vsel %vm6937_vm8, %v502_v26, %v739_v43  ;;  %v1140_v2 = vsel %vm1116_vm10, %v1135_v35, %v1139_v20  ;;  %v744_v28 = vsel %vm6887_vm3, %v512_v40, %v743_v51  ;;  %v514_v52 = vshrl.u32 %v344_v44, 16  ;;  %742 = vst.msk [vmem:[#allocation2 + $0x70] sm:$0xf] %vm172_vm2, %v511_v49  ;;  %v6465_v34 = vld [vmem:[#allocation2 + $0x60] sm:$0xe]  ;;  %v300_v39 = vld [vmem:[%s6902_s17 + $0x30] sm:$0xff] }
  0x3d   : > { %741 = vst [vmem:[#allocation2 + $0x6c] sm:$0xf] %v740_v50  ;;  %v517_v53 = vshll.u32 %v344_v44, 16  ;;  %v1218_v56 = vrot.slane %v1216_v38, 1  ;;  %v1221_v57 = vshll.u32 %v7081_v47, 16  ;;  %v522_v60 = vshrl.u32 %v345_v45, 16 }
  0x3e   : > { %v525_v61 = vshll.u32 %v345_v45, 16  ;;  %745 = vst [vmem:[#allocation2 + $0x74] sm:$0x1] %v744_v28  ;;  %v516_v63 = vrot.slane %v514_v52, 7  ;;  %v271_v3 = vsel %vm6919_vm6, 0, %v270_v46  ;;  %v197_v6 = vsel %vm6887_vm3, 0, %v196_v54 }
  0x3f   : > { %v524_v5 = vrot.slane %v522_v60, 7  ;;  %272 = vst [vmem:[#allocation2 + $0x80] sm:$0x1] %v271_v3  ;;  %v2153_v8 = vsel %vm1116_vm10, %v7049_v55, %v2152_v41  ;;  %v6703_v9 = vor.u32 %v7055_v1, %v7009_v59  ;;  %v1219_v13 = vor.u32 %v1218_v56, %v1214_v48  ;;  %v301_v44 = vld [vmem:[%s6902_s17 + $0x38] sm:$0xff] }
  0x40   : > { %1952 = vrot.lane.b32.xlu0 %v1907_v30, %s6852_s22  ;;  %v519_v10 = vor.u32 %v517_v53, %v516_v63  ;;  %v520_v11 = vrot.slane %v516_v63, 4  ;;  %v746_v12 = vld [vmem:[#allocation2 + $0x78] sm:$0xf]  ;;  %v1223_v14 = vrot.slane %v1221_v57, 1  ;;  %v2155_v15 = vshrl.u32 %v7007_v58, 16 }
  0x41   : > { %v527_v17 = vor.u32 %v525_v61, %v524_v5  ;;  %v2159_v22 = vrot.slane %v2157_v18, 1  ;;  %v1086_v25 = vunpack.c.l.b16 %v829_v62  ;;  %198 = vst [vmem:[#allocation2 + $0x30] sm:$0x1] %v197_v6  ;;  %v253_v59 = vsel %vm6919_vm6, 0, %v252_v7  ;;  %v6464_v58 = vld [vmem:[#allocation2 + $0x60] sm:$0xf0] }
  0x42   : > { %1311 = vrot.lane.b32.xlu2 %v1140_v2, %s6851_s21  ;;  %v957_v21 = vld [vmem:[#allocation2 + $0x2c] sm:$0x1]  ;;  %v529_v29 = vrot.slane %v524_v5, 4  ;;  %v1224_v18 = vsel %vm1116_vm10, %v1219_v13, %v1223_v14  ;;  %254 = vst [vmem:[#allocation2 + $0x38] sm:$0x1] %v253_v59  ;;  %v2417_v35 = vrot.slane %v6703_v9, 1  ;;  %v6466_v43 = vor.u32 %v6465_v34, %v6464_v58 }
  0x43   : > { %1822 = vrot.lane.b32.xlu1 %v1641_v16, %s6853_s23  ;;  %v747_v16 = vsel %vm6937_vm8, %v519_v10, %v746_v12  ;;  %v2111_v1 = vunpack.c.l.b16 %v957_v21  ;;  %v528_v26 = vsel %vm6927_vm7, %v520_v11, %v527_v17  ;;  %v7114_v31 = vld [vmem:[#allocation2 + $0x6c] sm:$0xf0]  ;;  %v2160_v36 = vor.u32 %v2159_v22, %v2155_v15  ;;  %v217_v7 = vld [vmem:[#allocation2 + $0x84] sm:$0x1] }
  0x44   : > { %748 = vst [vmem:[#allocation2 + $0x78] sm:$0xf] %v747_v16  ;;  %v7112_v4 = vld [vmem:[#allocation2 + $0x6c] sm:$0xff]   ;;  %v7119_v37 = vpack.c.b16 %v1086_v25, %v1086_v25  ;;  %v332_v50 = vpack.c.bf16 %v300_v39, %v300_v39  ;;  %v333_v54 = vpack.c.bf16 %v301_v44, %v301_v44  ;;  %v1414_v61 = vrot.slane %v6466_v43, 1  ;;  %v314_v12 = vld [vmem:[%s6902_s17 + $0xa0] sm:$0xff] }
  0x45   : > { %749 = vst.msk [vmem:[#allocation2 + $0x7c] sm:$0xf] %vm172_vm2, %v528_v26  ;;  %v2127_v33 = vpack.c.b16 %v2111_v1, %v2111_v1  ;;  %v899_v30 = vld [vmem:[#allocation2 + $0x74] sm:$0x1]  ;;  %v1727_v45 = vshrl.u32 %v7112_v4, 16  ;;  %v1729_v46 = vshll.u32 %v7112_v4, 16 }
  0x46   : > { %v1606_v20 = vunpack.c.l.b16 %v899_v30  ;;  %v750_v38 = vld [vmem:[#allocation2 + $0x80] sm:$0x1]  ;;  %v6705_v49 = vld [vmem:[#allocation2 + $0x6c] sm:$0xe]  ;;  %v1149_v28 = vshll.u32 %v7119_v37, 16  ;;  %v1415_v62 = vrot.slane %v7081_v47, 1 }
  0x47   : > { %v2418_v19 = vrot.slane %v2127_v33, 1  ;;  %v2162_v40 = vshll.u32 %v2127_v33, 16  ;;  %v751_v41 = vsel %vm6887_vm3, %v529_v29, %v750_v38  ;;  %v1731_v52 = vrot.slane %v1729_v46, 1  ;;  %v315_v47 = vld [vmem:[%s6902_s17 + $0xa8] sm:$0xff]  ;;  %v6708_v30 = vld [vmem:[#allocation2 + $0x24] sm:$0xe] }
  0x48   : > { %2334 = vrot.lane.b32.xlu0 %v2153_v8, %s6855_s25  ;;  %v7125_v42 = vpack.c.b16 %v1606_v20, %v1606_v20  ;;  %752 = vst [vmem:[#allocation2 + $0x80] sm:$0x1] %v751_v41  ;;  %v412_v63 = vshrl.u32 %v332_v50, 16  ;;  %v1151_v3 = vrot.slane %v1149_v28, 1  ;;  %v415_v6 = vshll.u32 %v332_v50, 16  ;;  %v7147_v33 = vld [vmem:[#allocation2 + $0x24] sm:$0xff]  }
  0x49   : > { %v2164_v48 = vrot.slane %v2162_v40, 1  ;;  %v2419_v51 = vsel %vm1389_vm9, %v2417_v35, %v2418_v19  ;;  %v1732_v57 = vor.u32 %v1731_v52, %v1727_v45  ;;  %v420_v11 = vshrl.u32 %v333_v54, 16  ;;  %v704_v17 = vld [vmem:[#allocation2 + $0x30] sm:$0xf]  ;;  %v893_v26 = vld [vmem:[#allocation2 + $0x2c] sm:$0x1] }
  0x4a   : > { %v1734_v2 = vshll.u32 %v7125_v42, 16  ;;  %v414_v10 = vrot.slane %v412_v63, 7  ;;  %v6706_v14 = vor.u32 %v6705_v49, %v7114_v31  ;;  %v423_v15 = vshll.u32 %v333_v54, 16  ;;  %v708_v29 = vld [vmem:[#allocation2 + $0x38] sm:$0x1] }
  0x4b   : > { %1325 = vrot.lane.b32.xlu1 %v1224_v18, %s6851_s21  ;;  %v2165_v53 = vsel %vm1116_vm10, %v2160_v36, %v2164_v48  ;;  %v6513_v60 = vld [vmem:[#allocation2 + $0x78] sm:$0xe]  ;;  %v1416_v21 = vsel %vm1389_vm9, %v1414_v61, %v1415_v62  ;;  %v422_v16 = vrot.slane %v420_v11, 7  ;;  %v1152_v59 = vsel %vm1116_vm10, %v7049_v55, %v1151_v3  ;;  %v7149_v31 = vld [vmem:[#allocation2 + $0x24] sm:$0xf0] }
  0x4c   : > { %v1736_v56 = vrot.slane %v1734_v2, 1  ;;  %2336 = vrot.lane.b32.xlu2 %v2165_v53, %s6855_s25  ;;  %v6512_v5 = vld [vmem:[#allocation2 + $0x78] sm:$0xf0]  ;;  %v417_v22 = vor.u32 %v415_v6, %v414_v10  ;;  %v418_v25 = vrot.slane %v414_v10, 4  ;;  %v218_v58 = vsel %vm6887_vm3, 0, %v217_v7 }
  0x4d   : > { %v6514_v1 = vor.u32 %v6513_v60, %v6512_v5  ;;  %v346_v18 = vpack.c.bf16 %v314_v12, %v314_v12  ;;  %v425_v34 = vor.u32 %v423_v15, %v422_v16  ;;  %v427_v35 = vrot.slane %v422_v16, 4  ;;  %219 = vst [vmem:[#allocation2 + $0x84] sm:$0x1] %v218_v58  ;;  %v7153_v55 = vld [vmem:[#allocation2 + $0x78] sm:$0xff]   ;;  %v273_v46 = vld [vmem:[#allocation2 + $0x8c] sm:$0x1] }
  0x4e   : > { %v1737_v8 = vsel %vm1116_vm10, %v1732_v57, %v1736_v56  ;;  %v705_v20 = vsel %vm6937_vm8, %v417_v22, %v704_v17  ;;  %v347_v36 = vpack.c.bf16 %v315_v47, %v315_v47  ;;  %v1926_v39 = vrot.slane %v6706_v14, 1  ;;  %v6455_v48 = vld [vmem:[#allocation2 + $0x18] sm:$0xf0]  ;;  %v6456_v49 = vld [vmem:[#allocation2 + $0x18] sm:$0xe] }
  0x4f   : > { %v964_v9 = vld [vmem:[#allocation2 + $0x80] sm:$0x1]  ;;  %v1927_v19 = vrot.slane %v7125_v42, 1  ;;  %706 = vst [vmem:[#allocation2 + $0x30] sm:$0xf] %v705_v20  ;;  %v531_v40 = vshrl.u32 %v346_v18, 16  ;;  %v426_v41 = vsel %vm6927_vm7, %v418_v25, %v425_v34  ;;  %v709_v43 = vsel %vm6887_vm3, %v427_v35, %v708_v29 }
  0x50   : > { %2464 = vrot.lane.b32.xlu0 %v2419_v51, %s6854_s24  ;;  %v2118_v13 = vunpack.c.l.b16 %v964_v9  ;;  %v2241_v44 = vshll.u32 %v7153_v55, 16  ;;  %v534_v45 = vshll.u32 %v346_v18, 16  ;;  %v1600_v50 = vunpack.c.l.b16 %v893_v26  ;;  %707 = vst.msk [vmem:[#allocation2 + $0x34] sm:$0xf] %vm172_vm2, %v426_v41  ;;  %v199_v47 = vld [vmem:[#allocation2 + $0x3c] sm:$0x1] }
  0x51   : > { %v2438_v42 = vrot.slane %v6514_v1, 1  ;;  %710 = vst [vmem:[#allocation2 + $0x38] sm:$0x1] %v709_v43  ;;  %v533_v51 = vrot.slane %v531_v40, 7  ;;  %v539_v2 = vshrl.u32 %v347_v36, 16  ;;  %v2239_v28 = vshrl.u32 %v7153_v55, 16 }
  0x52   : > { %v2134_v38 = vpack.c.b16 %v2118_v13, %v2118_v13  ;;  %v542_v52 = vshll.u32 %v347_v36, 16  ;;  %v274_v53 = vsel %vm6919_vm6, 0, %v273_v46  ;;  %v2243_v56 = vrot.slane %v2241_v44, 1  ;;  %v302_v26 = vld [vmem:[%s6902_s17 + $0x40] sm:$0xff]  ;;  %v7200_v41 = vld [vmem:[#allocation2 + $0x6c] sm:$0xff]  }
  0x53   : > { %1838 = vrot.lane.b32.xlu1 %v1737_v8, %s6853_s23  ;;  %v536_v60 = vor.u32 %v534_v45, %v533_v51  ;;  %275 = vst [vmem:[#allocation2 + $0x8c] sm:$0x1] %v274_v53  ;;  %v6457_v61 = vor.u32 %v6456_v49, %v6455_v48  ;;  %v537_v62 = vrot.slane %v533_v51, 4  ;;  %v541_v63 = vrot.slane %v539_v2, 7  ;;  %v6710_v43 = vld [vmem:[#allocation2 + $0x6c] sm:$0xf0] }
  0x54   : > { %1454 = vrot.lane.b32.xlu2 %v1416_v21, %s6850_s20  ;;  %v2439_v54 = vrot.slane %v2134_v38, 1  ;;  %v2246_v57 = vshll.u32 %v2134_v38, 16  ;;  %v753_v3 = vld [vmem:[#allocation2 + $0x84] sm:$0xf]  ;;  %v1616_v5 = vpack.c.b16 %v1600_v50, %v1600_v50  ;;  %v1397_v7 = vrot.slane %v7119_v37, 1  ;;  %v303_v46 = vld [vmem:[%s6902_s17 + $0x48] sm:$0xff] }
  0x55   : > { %v754_v6 = vsel %vm6937_vm8, %v536_v60, %v753_v3  ;;  %v6709_v8 = vor.u32 %v6708_v30, %v7149_v31  ;;  %v544_v9 = vor.u32 %v542_v52, %v541_v63  ;;  %v7178_v11 = vor.u32 %v2243_v56, %v2239_v28  ;;  %v255_v30 = vld [vmem:[#allocation2 + $0x44] sm:$0x1]  ;;  %v836_v2 = vld [vmem:[#allocation2 + $0x74] sm:$0x1]  ;;  %v6711_v53 = vld [vmem:[#allocation2 + $0x6c] sm:$0xe] }
  0x56   : > { %755 = vst [vmem:[#allocation2 + $0x84] sm:$0xf] %v754_v6  ;;  %v2440_v10 = vsel %vm1389_vm9, %v2438_v42, %v2439_v54  ;;  %v2248_v12 = vrot.slane %v2246_v57, 1  ;;  %v546_v13 = vrot.slane %v541_v63, 4  ;;  %v1396_v14 = vrot.slane %v6457_v61, 1 }
  0x57   : > { %v1657_v15 = vshll.u32 %v7147_v33, 16  ;;  %v545_v17 = vsel %vm6927_vm7, %v537_v62, %v544_v9  ;;  %v1909_v21 = vrot.slane %v1616_v5, 1  ;;  %v1655_v22 = vshrl.u32 %v7147_v33, 16  ;;  %v6504_v29 = vld [vmem:[#allocation2 + $0x30] sm:$0xe] }
  0x58   : > { %1566 = vrot.lane.b32.xlu0 %v7112_v4, %s6848_s18  ;;  %v1928_v4 = vsel %vm1389_vm9, %v1926_v39, %v1927_v19  ;;  %v958_v37 = vld [vmem:[#allocation2 + $0x38] sm:$0x1]  ;;  %756 = vst.msk [vmem:[#allocation2 + $0x88] sm:$0xf] %vm172_vm2, %v545_v17  ;;  %v1908_v25 = vrot.slane %v6709_v8, 1  ;;  %v1662_v16 = vshll.u32 %v1616_v5, 16  ;;  %v2249_v18 = vsel %vm1116_vm10, %v7178_v11, %v2248_v12 }
  0x59   : > { %v200_v1 = vsel %vm6887_vm3, 0, %v199_v47  ;;  %v2112_v58 = vunpack.c.l.b16 %v958_v37  ;;  %v334_v34 = vpack.c.bf16 %v302_v26, %v302_v26  ;;  %v1398_v35 = vsel %vm1389_vm9, %v1396_v14, %v1397_v7  ;;  %v6503_v36 = vld [vmem:[#allocation2 + $0x30] sm:$0xf0]  ;;  %v7223_v26 = vld [vmem:[#allocation2 + $0x24] sm:$0xff]  }
  0x5a   : > { %201 = vst [vmem:[#allocation2 + $0x3c] sm:$0x1] %v200_v1  ;;  %v1659_v20 = vrot.slane %v1657_v15, 1  ;;  %v256_v38 = vsel %vm6919_vm6, 0, %v255_v30  ;;  %v7196_v39 = vld [vmem:[#allocation2 + $0x30] sm:$0xff]   ;;  %v1910_v40 = vsel %vm1389_vm9, %v1908_v25, %v1909_v21  ;;  %v6505_v45 = vor.u32 %v6504_v29, %v6503_v36 }
  0x5b   : > { %1313 = vrot.lane.b32.xlu1 %v1152_v59, %s6851_s21  ;;  %v757_v59 = vld [vmem:[#allocation2 + $0x8c] sm:$0x1]  ;;  %257 = vst [vmem:[#allocation2 + $0x44] sm:$0x1] %v256_v38  ;;  %v429_v19 = vshrl.u32 %v334_v34, 16  ;;  %v2128_v44 = vpack.c.b16 %v2112_v58, %v2112_v58  ;;  %v432_v48 = vshll.u32 %v334_v34, 16  ;;  %v1093_v63 = vunpack.c.l.b16 %v836_v2 }
  0x5c   : > { %1966 = vrot.lane.b32.xlu2 %v1928_v4, %s6852_s22  ;;  %v758_v31 = vsel %vm6887_vm3, %v546_v13, %v757_v59  ;;  %v1660_v49 = vor.u32 %v1659_v20, %v1655_v22  ;;  %v1664_v50 = vrot.slane %v1662_v16, 1  ;;  %v2169_v42 = vshll.u32 %v7196_v39, 16  ;;  %v6713_v29 = vld [vmem:[#allocation2 + $0x24] sm:$0xf0] }
  0x5d   : > { %759 = vst [vmem:[#allocation2 + $0x8c] sm:$0x1] %v758_v31  ;;  %v431_v51 = vrot.slane %v429_v19, 7  ;;  %v335_v4 = vpack.c.bf16 %v303_v46, %v303_v46  ;;  %v2420_v28 = vrot.slane %v6505_v45, 1  ;;  %v2421_v52 = vrot.slane %v2128_v44, 1 }
  0x5e   : > { %v1665_v56 = vsel %vm1116_vm10, %v1660_v49, %v1664_v50  ;;  %v2167_v57 = vshrl.u32 %v7196_v39, 16  ;;  %v2171_v60 = vrot.slane %v2169_v42, 1  ;;  %v2174_v61 = vshll.u32 %v2128_v44, 16  ;;  %v6714_v31 = vld [vmem:[#allocation2 + $0x24] sm:$0xe] }
  0x5f   : > { %v434_v54 = vor.u32 %v432_v48, %v431_v51  ;;  %v437_v3 = vshrl.u32 %v335_v4, 16  ;;  %v2422_v5 = vsel %vm1389_vm9, %v2420_v28, %v2421_v52  ;;  %v1228_v6 = vshll.u32 %v7200_v41, 16  ;;  %v7231_v30 = vld [vmem:[#allocation2 + $0x84] sm:$0xff]   ;;  %v6488_v19 = vld [vmem:[#allocation2 + $0x78] sm:$0xf0] }
  0x60   : > { %2078 = vrot.lane.b32.xlu0 %v7153_v55, %s6849_s19  ;;  %v440_v7 = vshll.u32 %v335_v4, 16  ;;  %v7215_v9 = vor.u32 %v2171_v60, %v2167_v57  ;;  %v435_v12 = vrot.slane %v431_v51, 4  ;;  %v1109_v14 = vpack.c.b16 %v1093_v63, %v1093_v63  ;;  %v7233_v34 = vld [vmem:[#allocation2 + $0x84] sm:$0xf0]  ;;  %v276_v46 = vld [vmem:[#allocation2 + $0x98] sm:$0x1] }
  0x61   : > { %v711_v62 = vld [vmem:[#allocation2 + $0x3c] sm:$0xf]  ;;  %v439_v13 = vrot.slane %v437_v3, 7  ;;  %v1226_v17 = vshrl.u32 %v7200_v41, 16  ;;  %v1230_v47 = vrot.slane %v1228_v6, 1  ;;  %v6712_v16 = vor.u32 %v6711_v53, %v6710_v43 }
  0x62   : > { %v712_v8 = vsel %vm6937_vm8, %v434_v54, %v711_v62  ;;  %v715_v37 = vld [vmem:[#allocation2 + $0x44] sm:$0x1]  ;;  %v1233_v21 = vshll.u32 %v1109_v14, 16  ;;  %v1418_v38 = vrot.slane %v1109_v14, 1  ;;  %v894_v49 = vld [vmem:[#allocation2 + $0x38] sm:$0x1]  ;;  %v6715_v53 = vor.u32 %v6714_v31, %v6713_v29 }
  0x63   : > { %2478 = vrot.lane.b32.xlu1 %v2440_v10, %s6854_s24  ;;  %v2176_v10 = vrot.slane %v2174_v61, 1  ;;  %713 = vst [vmem:[#allocation2 + $0x3c] sm:$0xf] %v712_v8  ;;  %v442_v15 = vor.u32 %v440_v7, %v439_v13  ;;  %v444_v22 = vrot.slane %v439_v13, 4  ;;  %v1417_v36 = vrot.slane %v6712_v16, 1  ;;  %v316_v54 = vld [vmem:[%s6902_s17 + $0xb0] sm:$0xff] }
  0x64   : > { %2350 = vrot.lane.b32.xlu2 %v2249_v18, %s6855_s25  ;;  %v830_v18 = vld [vmem:[#allocation2 + $0x2c] sm:$0x1]  ;;  %v1235_v20 = vrot.slane %v1233_v21, 1  ;;  %v277_v42 = vsel %vm6919_vm6, 0, %v276_v46  ;;  %v220_v28 = vld [vmem:[#allocation2 + $0x90] sm:$0x1]  ;;  %v348_v61 = vpack.c.bf16 %v316_v54, %v316_v54 }
  0x65   : > { %v2177_v25 = vsel %vm1116_vm10, %v7215_v9, %v2176_v10  ;;  %v443_v59 = vsel %vm6927_vm7, %v435_v12, %v442_v15  ;;  %v716_v58 = vsel %vm6887_vm3, %v444_v22, %v715_v37  ;;  %v1087_v44 = vunpack.c.l.b16 %v830_v18  ;;  %v965_v45 = vld [vmem:[#allocation2 + $0x8c] sm:$0x1]  ;;  %278 = vst [vmem:[#allocation2 + $0x98] sm:$0x1] %v277_v42  ;;  %v317_v60 = vld [vmem:[%s6902_s17 + $0xb8] sm:$0xff] }
  0x66   : > { %714 = vst.msk [vmem:[#allocation2 + $0x40] sm:$0xf] %vm172_vm2, %v443_v59  ;;  %v1419_v51 = vsel %vm1389_vm9, %v1417_v36, %v1418_v38  ;;  %v2119_v4 = vunpack.c.l.b16 %v965_v45  ;;  %v1156_v57 = vshll.u32 %v7223_v26, 16  ;;  %v2253_v63 = vshll.u32 %v7231_v30, 16  ;;  %v6717_v29 = vld [vmem:[#allocation2 + $0x84] sm:$0xe] }
  0x67   : > { %717 = vst [vmem:[#allocation2 + $0x44] sm:$0x1] %v716_v58  ;;  %v1103_v52 = vpack.c.b16 %v1087_v44, %v1087_v44  ;;  %v1399_v10 = vrot.slane %v6715_v53, 1  ;;  %v349_v13 = vpack.c.bf16 %v317_v60, %v317_v60  ;;  %v548_v14 = vshrl.u32 %v348_v61, 16  ;;  %v2766_v18 = vld [vmem:[%s10149_s1 + $0x20] sm:$0xf] }
  0x68   : > { %1442 = vrot.lane.b32.xlu0 %v1398_v35, %s6850_s20  ;;  %v1231_v35 = vor.u32 %v1230_v47, %v1226_v17  ;;  %v7249_v6 = vpack.c.b16 %v2119_v4, %v2119_v4  ;;  %v1154_v37 = vshrl.u32 %v7223_v26, 16  ;;  %v1158_v17 = vrot.slane %v1156_v57, 1 }
  0x69   : > { %v1400_v12 = vrot.slane %v1103_v52, 1  ;;  %v1161_v22 = vshll.u32 %v1103_v52, 16  ;;  %v2251_v16 = vshrl.u32 %v7231_v30, 16  ;;  %v2255_v59 = vrot.slane %v2253_v63, 1 }
  0x6a   : > { %v1236_v48 = vsel %vm1116_vm10, %v1231_v35, %v1235_v20  ;;  %v550_v31 = vrot.slane %v548_v14, 7  ;;  %v556_v35 = vshrl.u32 %v349_v13, 16  ;;  %v1159_v38 = vor.u32 %v1158_v17, %v1154_v37 }
  0x6b   : > { %1954 = vrot.lane.b32.xlu1 %v1910_v40, %s6852_s22  ;;  %v6489_v40 = vld [vmem:[#allocation2 + $0x78] sm:$0xe]  ;;  %v1401_v58 = vsel %vm1389_vm9, %v1399_v10, %v1400_v12  ;;  %v559_v46 = vshll.u32 %v349_v13, 16  ;;  %vm10152_vm11 = vcmask 1043456   ;;  %v6718_v53 = vor.u32 %v6717_v29, %v7233_v34 }
  0x6c   : > { %1554 = vrot.lane.b32.xlu2 %v7147_v33, %s6848_s18  ;;  %v900_v33 = vld [vmem:[#allocation2 + $0x80] sm:$0x1]  ;;  %v6490_v2 = vor.u32 %v6489_v40, %v6488_v19  ;;  %v2784_v19 = vunpack.c.l.b16 %v2766_v18  ;;  %v551_v40 = vshll.u32 %v348_v61, 16  ;;  %v764_v60 = vld [vmem:[#allocation2 + $0x98] sm:$0x1]  ;;  %v2442_v14 = vrot.slane %v7249_v6, 1 }
  0x6d   : > { %v1607_v1 = vunpack.c.l.b16 %v900_v33  ;;  %v7251_v7 = vld [vmem:[#allocation2 + $0x3c] sm:$0xff]   ;;  %v2441_v13 = vrot.slane %v6718_v53, 1  ;;  %v202_v18 = vld [vmem:[#allocation2 + $0x48] sm:$0x1]  ;;  %vm2494_vm12 = vcmask 64512   ;;  %vm2527_vm13 = vcmask 130048  }
  0x6e   : > { %v1929_v3 = vrot.slane %v6490_v2, 1  ;;  %v7253_v8 = vld [vmem:[#allocation2 + $0x3c] sm:$0xf0]  ;;  %v959_v21 = vld [vmem:[#allocation2 + $0x44] sm:$0x1]  ;;  %v2789_v45 = vpack.c.b16 %v2784_v19, %v2784_v19  ;;  %v554_v2 = vrot.slane %v550_v31, 4 }
  0x6f   : > { %v1623_v43 = vpack.c.b16 %v1607_v1, %v1607_v1  ;;  %v2258_v1 = vshll.u32 %v7249_v6, 16  ;;  %v2113_v36 = vunpack.c.l.b16 %v959_v21  ;;  %v837_v61 = vld [vmem:[#allocation2 + $0x80] sm:$0x1]  ;;  %v6480_v21 = vld [vmem:[#allocation2 + $0x30] sm:$0xe]  ;;  %vm2560_vm14 = vcmask 195584  }
  0x70   : > { %1826 = vrot.lane.b32.xlu0 %v1665_v56, %s6853_s23  ;;  %v1601_v56 = vunpack.c.l.b16 %v894_v49  ;;  %v558_v49 = vrot.slane %v556_v35, 7  ;;  %v1094_v17 = vunpack.c.l.b16 %v837_v61  ;;  %v304_v19 = vld [vmem:[%s6902_s17 + $0x50] sm:$0xff]  ;;  %vm2593_vm15 = vcmask 261120  }
  0x71   : > { %v1746_v50 = vshll.u32 %v1623_v43, 16  ;;  %v2260_v44 = vrot.slane %v2258_v1, 1  ;;  %v7275_v42 = vpack.c.b16 %v2113_v36, %v2113_v36  ;;  %v2443_v1 = vsel %vm1389_vm9, %v2441_v13, %v2442_v14  ;;  %v6231_v36 = vld [vmem:[%s10149_s1 + $0x8] sm:$0xff] }
  0x72   : > { %v7259_v15 = vpack.c.b16 %v1601_v56, %v1601_v56  ;;  %v561_v57 = vor.u32 %v559_v46, %v558_v49  ;;  %v1110_v35 = vpack.c.b16 %v1094_v17, %v1094_v17  ;;  %vm2626_vm0 = vcmask 326656  }
  0x73   : > { %2466 = vrot.lane.b32.xlu1 %v2422_v5, %s6854_s24  ;;  %v1748_v62 = vrot.slane %v1746_v50, 1  ;;  %v1930_v5 = vrot.slane %v1623_v43, 1  ;;  %v2256_v43 = vor.u32 %v2255_v59, %v2251_v16  ;;  %v6232_v16 = vld [vmem:[%s10149_s1 + $0x10] sm:$0xff]  ;;  %vm2659_vm1 = vcmask 392192  }
  0x74   : > { %2066 = vrot.lane.b32.xlu2 %v7196_v39, %s6849_s19  ;;  %v1674_v20 = vshll.u32 %v7259_v15, 16  ;;  %v562_v10 = vsel %vm6927_vm7, %v554_v2, %v561_v57  ;;  %v6723_v2 = vld [vmem:[#allocation2 + $0x84] sm:$0xe]  ;;  %v1421_v57 = vrot.slane %v1110_v35, 1  ;;  %vm2692_vm4 = vcmask 457728  }
  0x75   : > { %v1749_v47 = vsel %vm1116_vm10, %v7178_v11, %v1748_v62  ;;  %v2261_v54 = vsel %vm1116_vm10, %v2256_v43, %v2260_v44  ;;  %v563_v62 = vrot.slane %v558_v49, 4  ;;  %763 = vst.msk [vmem:[#allocation2 + $0x94] sm:$0xf] %vm172_vm2, %v562_v10  ;;  %v305_v43 = vld [vmem:[%s6902_s17 + $0x58] sm:$0xff]  ;;  %v336_v44 = vpack.c.bf16 %v304_v19, %v304_v19 }
  0x76   : > { %v1676_v50 = vrot.slane %v1674_v20, 1  ;;  %v337_v49 = vpack.c.bf16 %v305_v43, %v305_v43  ;;  %vm10154_vm5 = vcmask 523264  }
  0x77   : > { %v765_v37 = vsel %vm6887_vm3, %v563_v62, %v764_v60 }
  0x78   : > { %2338 = vrot.lane.b32.xlu0 %v2177_v25, %s6855_s25  ;;  %v1931_v25 = vsel %vm1389_vm9, %v1929_v3, %v1930_v5  ;;  %v1677_v34 = vsel %vm1116_vm10, %v7215_v9, %v1676_v50  ;;  %v2179_v3 = vshrl.u32 %v7251_v7, 16  ;;  %v2186_v5 = vshll.u32 %v7275_v42, 16  ;;  %766 = vst [vmem:[#allocation2 + $0x98] sm:$0x1] %v765_v37 }
  0x79   : > { %v454_v62 = vshrl.u32 %v337_v49, 16 }
  0x7a   : > { %v2188_v59 = vrot.slane %v2186_v5, 1 }
  0x7b   : > { %1568 = vrot.lane.b32.xlu1 %v7153_v55, %s6848_s18  ;;  %v221_v55 = vsel %vm6887_vm3, 0, %v220_v28  ;;  %v2181_v28 = vshll.u32 %v7251_v7, 16  ;;  %v456_v17 = vrot.slane %v454_v62, 7  ;;  %v7374_v62 = vld [vmem:[#allocation2 + $0x3c] sm:$0xff]  }
  0x7c   : > { %1327 = vrot.lane.b32.xlu2 %v1236_v48, %s6851_s21  ;;  %222 = vst [vmem:[#allocation2 + $0x90] sm:$0x1] %v221_v55  ;;  %v553_v48 = vor.u32 %v551_v40, %v550_v31  ;;  %v6233_v55 = vld [vmem:[%s10149_s1 + $0x18] sm:$0xff]  ;;  %v6722_v40 = vld [vmem:[#allocation2 + $0x84] sm:$0xf0] }
  0x7d   : > { %v7257_v33 = vpop.permute.xlu2 %2062  ;;  %v2183_v12 = vrot.slane %v2181_v28, 1  ;;  %v1912_v28 = vrot.slane %v7259_v15, 1 }
  0x7f   : > { %v2184_v6 = vor.u32 %v2183_v12, %v2179_v3  ;;  %v966_v10 = vld [vmem:[#allocation2 + $0x98] sm:$0x1] }
  0x80   : > { %1456 = vrot.lane.b32.xlu0 %v1419_v51, %s6850_s20  ;;  %v2829_v51 = vsel %vm10152_vm11, %v2789_v45, 0  ;;  %v258_v45 = vld [vmem:[#allocation2 + $0x50] sm:$0x1]  ;;  %vm10153_vm11 = vcmask 588800  }
  0x81   : > { %2834 = vmatpush.bf16.msra.mxu0 %v2829_v51  ;;  %6618 = vmatpush.bf16.msra.mxu2 %v2829_v51  ;;  %v259_v50 = vsel %vm6919_vm6, 0, %v258_v45  ;;  %v2189_v51 = vsel %vm1116_vm10, %v2184_v6, %v2188_v59  ;;  %v2424_v6 = vrot.slane %v7275_v42, 1  ;;  %v461_v59 = vrot.slane %v456_v17, 4 }
  0x82   : > { %260 = vst [vmem:[#allocation2 + $0x50] sm:$0x1] %v259_v50 }
  0x83   : > { %2080 = vrot.lane.b32.xlu1 %v7231_v30, %s6849_s19  ;;  %v1163_v30 = vrot.slane %v1161_v22, 1  ;;  %v760_v4 = vld [vmem:[#allocation2 + $0x90] sm:$0xf]  ;;  %v6467_v22 = vld [vmem:[#allocation2 + $0x78] sm:$0xf0] }
  0x84   : > { %1840 = vrot.lane.b32.xlu2 %v1749_v47, %s6853_s23  ;;  %v761_v63 = vsel %vm6937_vm8, %v553_v48, %v760_v4  ;;  %v6479_v47 = vld [vmem:[#allocation2 + $0x30] sm:$0xf0]  ;;  %v901_v48 = vld [vmem:[#allocation2 + $0x8c] sm:$0x1] }
  0x85   : > { %v1164_v52 = vsel %vm1116_vm10, %v1159_v38, %v1163_v30  ;;  %762 = vst [vmem:[#allocation2 + $0x90] sm:$0xf] %v761_v63  ;;  %2835 = vmatpush.bf16.msra.mxu0 %v6233_v55  ;;  %6619 = vmatpush.bf16.msra.mxu2 %v6233_v55  ;;  %v6481_v29 = vor.u32 %v6480_v21, %v6479_v47  ;;  %v203_v38 = vsel %vm6887_vm3, 0, %v202_v18  ;;  %v7314_v30 = vld [vmem:[#allocation2 + $0x84] sm:$0xff]   ;;  %v1245_v55 = vshll.u32 %v1110_v35, 16 }
  0x86   : > { %204 = vst [vmem:[#allocation2 + $0x48] sm:$0x1] %v203_v38  ;;  %v1608_v60 = vunpack.c.l.b16 %v901_v48  ;;  %v6724_v47 = vor.u32 %v6723_v2, %v6722_v40  ;;  %v1751_v50 = vshrl.u32 %v7314_v30, 16 }
  0x87   : > { %v1911_v4 = vrot.slane %v6481_v29, 1  ;;  %v1247_v5 = vrot.slane %v1245_v55, 1 }
  0x88   : > { %1968 = vrot.lane.b32.xlu0 %v1931_v25, %s6852_s22  ;;  %v6468_v25 = vld [vmem:[#allocation2 + $0x78] sm:$0xe]  ;;  %v1624_v14 = vpack.c.b16 %v1608_v60, %v1608_v60  ;;  %v1932_v42 = vrot.slane %v6724_v47, 1 }
  0x89   : > { %2836 = vmatpush.bf16.msra.mxu0 %v6232_v16  ;;  %v6469_v20 = vor.u32 %v6468_v25, %v6467_v22  ;;  %6620 = vmatpush.bf16.msra.mxu2 %v6232_v16  ;;  %v1913_v63 = vsel %vm1389_vm9, %v1911_v4, %v1912_v28  ;;  %v457_v22 = vshll.u32 %v337_v49, 16  ;;  %v2120_v25 = vunpack.c.l.b16 %v966_v10  ;;  %v831_v16 = vld [vmem:[#allocation2 + $0x38] sm:$0x1] }
  0x8a   : > { %v1088_v38 = vunpack.c.l.b16 %v831_v16  ;;  %v1933_v40 = vrot.slane %v1624_v14, 1  ;;  %v1248_v48 = vsel %vm1116_vm10, %v7178_v11, %v1247_v5  ;;  %v1758_v2 = vshll.u32 %v1624_v14, 16  ;;  %v6515_v5 = vld [vmem:[#allocation2 + $0x90] sm:$0xf0]  ;;  %v279_v16 = vld [vmem:[#allocation2 + $0xa4] sm:$0x1] }
  0x8b   : > { %1444 = vrot.lane.b32.xlu1 %v1401_v58, %s6850_s20  ;;  %v6720_v58 = vld [vmem:[#allocation2 + $0x3c] sm:$0xe]  ;;  %v1420_v53 = vrot.slane %v6469_v20, 1  ;;  %v459_v35 = vor.u32 %v457_v22, %v456_v17  ;;  %v722_v20 = vld [vmem:[#allocation2 + $0x50] sm:$0x1]  ;;  %v7353_v43 = vpack.c.b16 %v2120_v25, %v2120_v25  ;;  %v318_v17 = vld [vmem:[%s6902_s17 + $0xc0] sm:$0xff] }
  0x8c   : > { %v7285_v56 = vpop.permute.xlu2 %1950  ;;  %1315 = vrot.lane.b32.xlu2 %v1164_v52, %s6851_s21  ;;  %v446_v52 = vshrl.u32 %v336_v44, 16  ;;  %v6721_v15 = vor.u32 %v6720_v58, %v7253_v8  ;;  %v1753_v58 = vshll.u32 %v7314_v30, 16  ;;  %v7346_v18 = vld [vmem:[#allocation2 + $0x90] sm:$0xff]   ;;  %v7363_v4 = vpack.c.b16 %v1088_v38, %v1088_v38 }
  0x8d   : > { %2837 = vmatpush.bf16.msra.mxu0 %v6231_v36  ;;  %6621 = vmatpush.bf16.msra.mxu2 %v6231_v36  ;;  %v718_v12 = vld [vmem:[#allocation2 + $0x48] sm:$0xf]  ;;  %v1422_v13 = vsel %vm1389_vm9, %v1420_v53, %v1421_v57  ;;  %v1934_v28 = vsel %vm1389_vm9, %v1932_v42, %v1933_v40  ;;  %v2270_v11 = vshll.u32 %v7353_v43, 16  ;;  %v1760_v57 = vrot.slane %v1758_v2, 1  ;;  %v6516_v10 = vld [vmem:[#allocation2 + $0x90] sm:$0xe] }
  0x8e   : > { %v448_v61 = vrot.slane %v446_v52, 7  ;;  %v2423_v21 = vrot.slane %v6721_v15, 1  ;;  %v2263_v52 = vshrl.u32 %v7346_v18, 16  ;;  %v7376_v15 = vld [vmem:[#allocation2 + $0x3c] sm:$0xf0]  ;;  %v6517_v22 = vor.u32 %v6516_v10, %v6515_v5 }
  0x8f   : > { %v350_v25 = vpack.c.bf16 %v318_v17, %v318_v17  ;;  %v2445_v38 = vrot.slane %v7353_v43, 1  ;;  %v6459_v40 = vld [vmem:[#allocation2 + $0x30] sm:$0xe]  ;;  %v6726_v43 = vld [vmem:[#allocation2 + $0x3c] sm:$0xe] }
  0x90   : > { %2352 = vrot.lane.b32.xlu0 %v2261_v54, %s6855_s25  ;;  %v452_v8 = vrot.slane %v448_v61, 4  ;;  %v2425_v45 = vsel %vm1389_vm9, %v2423_v21, %v2424_v6  ;;  %v6652_v6 = vld [vmem:[#allocation2] sm:$0xff]  }
  0x91   : > { %v565_v42 = vshrl.u32 %v350_v25, 16 }
  0x92   : > { %v460_v19 = vsel %vm6927_vm7, %v452_v8, %v459_v35  ;;  %v319_v8 = vld [vmem:[%s6902_s17 + $0xc8] sm:$0xff]  ;;  %v280_v35 = vsel %vm6919_vm6, 0, %v279_v16 }
  0x93   : > { %1828 = vrot.lane.b32.xlu1 %v1677_v34, %s6853_s23  ;;  %v449_v34 = vshll.u32 %v336_v44, 16  ;;  %v2265_v44 = vshll.u32 %v7346_v18, 16  ;;  %721 = vst.msk [vmem:[#allocation2 + $0x4c] sm:$0xf] %vm172_vm2, %v460_v19  ;;  %v6458_v19 = vld [vmem:[#allocation2 + $0x30] sm:$0xf0] }
  0x94   : > { %v7317_v46 = vpop.permute.xlu2 %1824  ;;  %2480 = vrot.lane.b32.xlu2 %v2443_v1, %s6854_s24  ;;  %281 = vst [vmem:[#allocation2 + $0xa4] sm:$0x1] %v280_v35 }
  0x95   : > { %v7306_v31 = vpop.permute.xlu1 %1552  ;;  %v451_v37 = vor.u32 %v449_v34, %v448_v61  ;;  %v2267_v53 = vrot.slane %v2265_v44, 1  ;;  %v1173_v34 = vshll.u32 %v7363_v4, 16 }
  0x97   : > { %v719_v1 = vsel %vm6937_vm8, %v451_v37, %v718_v12  ;;  %v7382_v12 = vld [vmem:[#allocation2 + $0x84] sm:$0xff]   ;;  %v7386_v14 = vor.u32 %v2267_v53, %v2263_v52  ;;  %v2272_v37 = vrot.slane %v2270_v11, 1  ;;  %v6460_v11 = vor.u32 %v6459_v40, %v6458_v19  ;;  %v205_v19 = vld [vmem:[#allocation2 + $0x54] sm:$0x1] }
  0x98   : > { %1556 = vrot.lane.b32.xlu0 %v7196_v39, %s6848_s18  ;;  %v6230_v39 = vld [vmem:[%s10149_s1] sm:$0xff]  ;;  %720 = vst [vmem:[#allocation2 + $0x48] sm:$0xf] %v719_v1  ;;  %v1175_v1 = vrot.slane %v1173_v34, 1 }
  0x99   : > { %2838 = vmatpush.bf16.msra.mxu0 %v6230_v39  ;;  %6622 = vmatpush.bf16.msra.mxu2 %v6230_v39  ;;  %v223_v39 = vld [vmem:[#allocation2 + $0x9c] sm:$0x1] }
  0x9a   : > { %v7326_v54 = vpop.permute.xlu0 %1438  ;;  %v1176_v2 = vsel %vm1116_vm10, %v7215_v9, %v1175_v1  ;;  %v902_v1 = vld [vmem:[#allocation2 + $0x98] sm:$0x1] }
  0x9b   : > { %2340 = vrot.lane.b32.xlu1 %v2189_v51, %s6855_s25  ;;  %v1755_v51 = vrot.slane %v1753_v58, 1  ;;  %v351_v58 = vpack.c.bf16 %v319_v8, %v319_v8 }
  0x9c   : > { %1956 = vrot.lane.b32.xlu2 %v1913_v63, %s6852_s22  ;;  %v7343_v29 = vpop.permute.xlu2 %1311  ;;  %v224_v63 = vsel %vm6887_vm3, 0, %v223_v39 }
  0x9d   : > { %v7334_v3 = vpop.permute.xlu1 %1550  ;;  %v1756_v55 = vor.u32 %v1755_v51, %v1751_v50  ;;  %225 = vst [vmem:[#allocation2 + $0x9c] sm:$0x1] %v224_v63  ;;  %v895_v50 = vld [vmem:[#allocation2 + $0x44] sm:$0x1]  ;;  %v567_v51 = vrot.slane %v565_v42, 7  ;;  %v573_v52 = vshrl.u32 %v351_v58, 16  ;;  %v2498_v53 = vsel %vm2494_vm12, %v7027_v24, %v7343_v29 }
  0x9e   : > { %v1602_v39 = vunpack.c.l.b16 %v895_v50  ;;  %v576_v34 = vshll.u32 %v351_v58, 16  ;;  %v1679_v42 = vshrl.u32 %v7374_v62, 16 }
  0x9f   : > { %v1761_v47 = vsel %vm1116_vm10, %v1756_v55, %v1760_v57  ;;  %v575_v17 = vrot.slane %v573_v52, 7 }
  0xa0   : > { %2068 = vrot.lane.b32.xlu0 %v7251_v7, %s6849_s19  ;;  %v723_v7 = vsel %vm6887_vm3, %v461_v59, %v722_v20  ;;  %v2273_v20 = vsel %vm1116_vm10, %v7386_v14, %v2272_v37  ;;  %v1252_v37 = vshll.u32 %v7382_v12, 16 }
  0xa1   : > { %724 = vst [vmem:[#allocation2 + $0x50] sm:$0x1] %v723_v7  ;;  %v838_v7 = vld [vmem:[#allocation2 + $0x8c] sm:$0x1]  ;;  %v578_v58 = vor.u32 %v576_v34, %v575_v17  ;;  %v580_v35 = vrot.slane %v575_v17, 4 }
  0xa2   : > { %v1310_v36 = vpop.permute.xlu0 %1309  ;;  %v7470_v17 = vld [vmem:[#allocation2 + $0x3c] sm:$0xf0] }
  0xa3   : > { %1458 = vrot.lane.b32.xlu1 %v1422_v13, %s6850_s20  ;;  %v7384_v13 = vld [vmem:[#allocation2 + $0x84] sm:$0xf0]  ;;  %v2496_v59 = vsel %vm2494_vm12, %v6652_v6, %v1310_v36 }
  0xa4   : > { %2468 = vrot.lane.b32.xlu2 %v2425_v45, %s6854_s24  ;;  %v2529_v44 = vsel %vm2527_vm13, %v2496_v59, %v7326_v54  ;;  %v1681_v54 = vshll.u32 %v7374_v62, 16  ;;  %v767_v9 = vld [vmem:[#allocation2 + $0x9c] sm:$0xf]  ;;  %v1250_v59 = vshrl.u32 %v7382_v12, 16 }
  0xa5   : > { %v7360_v49 = vpop.permute.xlu1 %2064  ;;  %v2562_v55 = vsel %vm2560_vm14, %v2529_v44, %v7334_v3  ;;  %v571_v3 = vrot.slane %v567_v51, 4 }
  0xa6   : > { %v7370_v60 = vpop.permute.xlu2 %2336 }
  0xa8   : > { %1329 = vrot.lane.b32.xlu0 %v1248_v48, %s6851_s21  ;;  %v2444_v48 = vrot.slane %v6517_v22, 1  ;;  %v960_v8 = vld [vmem:[#allocation2 + $0x50] sm:$0x1]  ;;  %v1402_v22 = vrot.slane %v6460_v11, 1 }
  0xaa   : > { %v7372_v61 = vpop.permute.xlu0 %1440  ;;  %v2446_v10 = vsel %vm1389_vm9, %v2444_v48, %v2445_v38  ;;  %v771_v38 = vld [vmem:[#allocation2 + $0xa4] sm:$0x1] }
  0xab   : > { %1970 = vrot.lane.b32.xlu1 %v1934_v28, %s6852_s22  ;;  %v1095_v28 = vunpack.c.l.b16 %v838_v7  ;;  %v1254_v7 = vrot.slane %v1252_v37, 1  ;;  %v306_v48 = vld [vmem:[%s6902_s17 + $0x60] sm:$0xff]  ;;  %v772_v52 = vsel %vm6887_vm3, %v580_v35, %v771_v38 }
  0xac   : > { %1570 = vrot.lane.b32.xlu2 %v7314_v30, %s6848_s18  ;;  %v568_v30 = vshll.u32 %v350_v25, 16  ;;  %v1403_v25 = vrot.slane %v7363_v4, 1  ;;  %v6727_v4 = vor.u32 %v6726_v43, %v7376_v15  ;;  %v307_v43 = vld [vmem:[%s6902_s17 + $0x68] sm:$0xff]  ;;  %773 = vst [vmem:[#allocation2 + $0xa4] sm:$0x1] %v772_v52 }
  0xad   : > { %v7390_v21 = vpop.permute.xlu1 %2462  ;;  %v7424_v29 = vpack.c.b16 %v1095_v28, %v1095_v28  ;;  %v1609_v28 = vunpack.c.l.b16 %v902_v1 }
  0xae   : > { %v7402_v36 = vpop.permute.xlu2 %1454  ;;  %v570_v63 = vor.u32 %v568_v30, %v567_v51  ;;  %v1683_v30 = vrot.slane %v1681_v54, 1  ;;  %v2114_v51 = vunpack.c.l.b16 %v960_v8  ;;  %v261_v54 = vld [vmem:[#allocation2 + $0x5c] sm:$0x1] }
  0xaf   : > { %v1257_v50 = vshll.u32 %v7424_v29, 16  ;;  %v7477_v1 = vpack.c.b16 %v1609_v28, %v1609_v28  ;;  %v6653_v28 = vld [vmem:[#allocation2 + $0x60] sm:$0xff]  }
  0xb0   : > { %1842 = vrot.lane.b32.xlu0 %v1761_v47, %s6853_s23  ;;  %v768_v16 = vsel %vm6937_vm8, %v570_v63, %v767_v9  ;;  %v1684_v63 = vor.u32 %v1683_v30, %v1679_v42  ;;  %v339_v9 = vpack.c.bf16 %v307_v43, %v307_v43 }
  0xb1   : > { %769 = vst [vmem:[#allocation2 + $0x9c] sm:$0xf] %v768_v16 }
  0xb2   : > { %v7406_v45 = vpop.permute.xlu0 %1952 }
  0xb3   : > { %2354 = vrot.lane.b32.xlu1 %v2273_v20, %s6855_s25 }
  0xb4   : > { %2082 = vrot.lane.b32.xlu2 %v7346_v18, %s6849_s19 }
  0xb5   : > { %v1823_v57 = vpop.permute.xlu1 %1822 }
  0xb6   : > { %v2595_v5 = vsel %vm2593_vm15, %v2562_v55, %v1823_v57  ;;  %v7434_v6 = vpop.permute.xlu2 %1966  ;;  %v1914_v55 = vrot.slane %v6727_v4, 1  ;;  %v262_v57 = vsel %vm6919_vm6, 0, %v261_v54 }
  0xb7   : > { %v2628_v24 = vsel %vm2626_vm0, %v2595_v5, %v7285_v56  ;;  %v7432_v56 = vpack.c.b16 %v1602_v39, %v1602_v39  ;;  %v7463_v39 = vld [vmem:[#allocation2 + $0x48] sm:$0xff]   ;;  %263 = vst [vmem:[#allocation2 + $0x5c] sm:$0x1] %v262_v57 }
  0xb8   : > { %1317 = vrot.lane.b32.xlu0 %v1176_v2, %s6851_s21  ;;  %v2661_v47 = vsel %vm2659_vm1, %v2628_v24, %v7257_v33  ;;  %v2531_v33 = vsel %vm2527_vm13, %v2498_v53, %v7372_v61  ;;  %v579_v61 = vsel %vm6927_vm7, %v571_v3, %v578_v58  ;;  %v1404_v2 = vsel %vm1389_vm9, %v1402_v22, %v1403_v25  ;;  %v7468_v3 = vld [vmem:[#allocation2 + $0x3c] sm:$0xff]   ;;  %v6507_v22 = vld [vmem:[#allocation2 + $0x48] sm:$0xe]  ;;  %v6506_v58 = vld [vmem:[#allocation2 + $0x48] sm:$0xf0] }
  0xb9   : > { %v1686_v44 = vshll.u32 %v7432_v56, 16  ;;  %770 = vst.msk [vmem:[#allocation2 + $0xa0] sm:$0xf] %vm172_vm2, %v579_v61  ;;  %v206_v53 = vsel %vm6887_vm3, 0, %v205_v19  ;;  %v2564_v11 = vsel %vm2560_vm14, %v2531_v33, %v7306_v31  ;;  %v1915_v37 = vrot.slane %v7432_v56, 1 }
  0xba   : > { %v2335_v20 = vpop.permute.xlu0 %2334  ;;  %207 = vst [vmem:[#allocation2 + $0x54] sm:$0x1] %v206_v53  ;;  %v1255_v24 = vor.u32 %v1254_v7, %v1250_v59  ;;  %v1259_v31 = vrot.slane %v1257_v50, 1  ;;  %v2597_v8 = vsel %vm2593_vm15, %v2564_v11, %v7317_v46  ;;  %v2130_v25 = vpack.c.b16 %v2114_v51, %v2114_v51  ;;  %v832_v7 = vld [vmem:[#allocation2 + $0x44] sm:$0x1] }
  0xbb   : > { %v2694_v40 = vsel %vm2692_vm4, %v2661_v47, %v2335_v20  ;;  %1558 = vrot.lane.b32.xlu1 %v7374_v62, %s6848_s18  ;;  %v1688_v34 = vrot.slane %v1686_v44, 1  ;;  %v2193_v47 = vshll.u32 %v7463_v39, 16  ;;  %v2630_v56 = vsel %vm2626_vm0, %v2597_v8, %v7406_v45  ;;  %v6729_v61 = vld [vmem:[#allocation2 + $0x84] sm:$0xe] }
  0xbc   : > { %v2727_v15 = vsel %vm10154_vm5, %v2694_v40, %v7390_v21  ;;  %v338_v21 = vpack.c.bf16 %v306_v48, %v306_v48  ;;  %1446 = vrot.lane.b32.xlu2 %v1404_v2, %s6850_s20  ;;  %v471_v33 = vshrl.u32 %v339_v9, 16  ;;  %v474_v20 = vshll.u32 %v339_v9, 16 }
  0xbd   : > { %6178 = vmatmul.msk.bf16.vlgmr.msra.gmra.mxu0 %vm10153_vm11, %v2727_v15  ;;  %v1326_v62 = vpop.permute.xlu1 %1325  ;;  %v1689_v46 = vsel %vm1116_vm10, %v1684_v63, %v1688_v34  ;;  %v2191_v4 = vshrl.u32 %v7463_v39, 16  ;;  %v2195_v42 = vrot.slane %v2193_v47, 1  ;;  %v2198_v38 = vshll.u32 %v2130_v25, 16 }
  0xbe   : > { %v463_v5 = vshrl.u32 %v338_v21, 16  ;;  %v7475_v16 = vpop.permute.xlu2 %2350  ;;  %v466_v35 = vshll.u32 %v338_v21, 16  ;;  %v473_v40 = vrot.slane %v471_v33, 7  ;;  %v1916_v30 = vsel %vm1389_vm9, %v1914_v55, %v1915_v37  ;;  %v729_v55 = vld [vmem:[#allocation2 + $0x5c] sm:$0x1] }
  0xbf   : > { %v6508_v44 = vor.u32 %v6507_v22, %v6506_v58  ;;  %v2663_v15 = vsel %vm2659_vm1, %v2630_v56, %v7360_v49  ;;  %v1260_v50 = vsel %vm1116_vm10, %v1255_v24, %v1259_v31  ;;  %v1770_v51 = vshll.u32 %v7477_v1, 16 }
  0xc0   : > { %2482 = vrot.lane.b32.xlu0 %v2446_v10, %s6854_s24  ;;  %v465_v10 = vrot.slane %v463_v5, 7  ;;  %v476_v2 = vor.u32 %v474_v20, %v473_v40  ;;  %v2512_v52 = vsel %vm2494_vm12, %v6653_v28, %v1326_v62  ;;  %v1089_v53 = vunpack.c.l.b16 %v832_v7  ;;  %v6731_v33 = vld [vmem:[#allocation2 + $0x9c] sm:$0xf0] }
  0xc1   : > { %v725_v43 = vld [vmem:[#allocation2 + $0x54] sm:$0xf]  ;;  %v478_v54 = vrot.slane %v473_v40, 4  ;;  %v7493_v21 = vor.u32 %v2195_v42, %v2191_v4  ;;  %v2200_v11 = vrot.slane %v2198_v38, 1  ;;  %v2426_v57 = vrot.slane %v6508_v44, 1 }
  0xc2   : > { %v2465_v59 = vpop.permute.xlu0 %2464  ;;  %v469_v19 = vrot.slane %v465_v10, 4  ;;  %v468_v48 = vor.u32 %v466_v35, %v465_v10  ;;  %v2427_v63 = vrot.slane %v2130_v25, 1  ;;  %v1772_v37 = vrot.slane %v1770_v51, 1  ;;  %v7522_v35 = vld [vmem:[#allocation2 + $0x9c] sm:$0xff]   ;;  %v6492_v40 = vld [vmem:[#allocation2 + $0x90] sm:$0xe] }
  0xc3   : > { %2070 = vrot.lane.b32.xlu1 %v7463_v39, %s6849_s19  ;;  %v730_v9 = vsel %vm6887_vm3, %v478_v54, %v729_v55  ;;  %v2696_v24 = vsel %vm2692_vm4, %v2663_v15, %v7370_v60  ;;  %v2545_v31 = vsel %vm2527_vm13, %v2512_v52, %v7402_v36  ;;  %v7509_v47 = vpack.c.b16 %v1089_v53, %v1089_v53  ;;  %v6732_v4 = vld [vmem:[#allocation2 + $0x9c] sm:$0xe]  ;;  %v320_v53 = vld [vmem:[%s6902_s17 + $0xd0] sm:$0xff] }
  0xc4   : > { %1830 = vrot.lane.b32.xlu2 %v1689_v46, %s6853_s23  ;;  %v477_v49 = vsel %vm6927_vm7, %v469_v19, %v476_v2  ;;  %v726_v62 = vsel %vm6937_vm8, %v468_v48, %v725_v43  ;;  %v1180_v8 = vshll.u32 %v7468_v3, 16  ;;  %v2729_v25 = vsel %vm10154_vm5, %v2696_v24, %v2465_v59  ;;  %731 = vst [vmem:[#allocation2 + $0x5c] sm:$0x1] %v730_v9  ;;  %v6491_v19 = vld [vmem:[#allocation2 + $0x90] sm:$0xf0]  ;;  %v321_v55 = vld [vmem:[%s6902_s17 + $0xd8] sm:$0xff] }
  0xc5   : > { %v1839_v45 = vpop.permute.xlu1 %1838  ;;  %728 = vst.msk [vmem:[#allocation2 + $0x58] sm:$0xf] %vm172_vm2, %v477_v49  ;;  %v2201_v10 = vsel %vm1116_vm10, %v7493_v21, %v2200_v11  ;;  %v6730_v56 = vor.u32 %v6729_v61, %v7384_v13  ;;  %v2428_v60 = vsel %vm1389_vm9, %v2426_v57, %v2427_v63  ;;  %v1178_v58 = vshrl.u32 %v7468_v3, 16  ;;  %v967_v13 = vld [vmem:[#allocation2 + $0xa4] sm:$0x1] }
  0xc6   : > { %v7497_v34 = vpop.permute.xlu2 %1554  ;;  %727 = vst [vmem:[#allocation2 + $0x54] sm:$0xf] %v726_v62  ;;  %v1182_v59 = vrot.slane %v1180_v8, 1  ;;  %v1185_v46 = vshll.u32 %v7509_v47, 16  ;;  %v1773_v7 = vsel %vm1116_vm10, %v7386_v14, %v1772_v37  ;;  %v1424_v38 = vrot.slane %v7424_v29, 1 }
  0xc7   : > { %v1423_v42 = vrot.slane %v6730_v56, 1  ;;  %v2121_v61 = vunpack.c.l.b16 %v967_v13  ;;  %v6735_v48 = vld [vmem:[#allocation2 + $0x3c] sm:$0xe]  ;;  %v226_v43 = vld [vmem:[#allocation2 + $0xa8] sm:$0x1]  ;;  %v6733_v49 = vor.u32 %v6732_v4, %v6731_v33  ;;  %v352_v57 = vpack.c.bf16 %v320_v53, %v320_v53 }
  0xc8   : > { %1958 = vrot.lane.b32.xlu0 %v1916_v30, %s6852_s22  ;;  %v1183_v51 = vor.u32 %v1182_v59, %v1178_v58  ;;  %v1187_v2 = vrot.slane %v1185_v46, 1  ;;  %v282_v63 = vld [vmem:[#allocation2 + $0xb0] sm:$0x1]  ;;  %v2277_v37 = vshll.u32 %v7522_v35, 16  ;;  %v6483_v58 = vld [vmem:[#allocation2 + $0x48] sm:$0xe] }
  0xc9   : > { %v1425_v29 = vsel %vm1389_vm9, %v1423_v42, %v1424_v38  ;;  %v2137_v11 = vpack.c.b16 %v2121_v61, %v2121_v61  ;;  %v896_v62 = vld [vmem:[#allocation2 + $0x50] sm:$0x1]  ;;  %v582_v24 = vshrl.u32 %v352_v57, 16  ;;  %v2447_v56 = vrot.slane %v6733_v49, 1 }
  0xca   : > { %v1567_v5 = vpop.permute.xlu0 %1566 }
  0xcb   : > { %1331 = vrot.lane.b32.xlu1 %v1260_v50, %s6851_s21  ;;  %v2578_v22 = vsel %vm2560_vm14, %v2545_v31, %v1567_v5  ;;  %v6493_v50 = vor.u32 %v6492_v40, %v6491_v19  ;;  %v1188_v5 = vsel %vm1116_vm10, %v1183_v51, %v1187_v2  ;;  %v6736_v31 = vor.u32 %v6735_v48, %v7470_v17  ;;  %v961_v53 = vld [vmem:[#allocation2 + $0x5c] sm:$0x1] }
  0xcc   : > { %v2611_v20 = vsel %vm2593_vm15, %v2578_v22, %v1839_v45  ;;  %2342 = vrot.lane.b32.xlu2 %v2201_v10, %s6855_s25  ;;  %v353_v22 = vpack.c.bf16 %v321_v55, %v321_v55  ;;  %v2279_v17 = vrot.slane %v2277_v37, 1  ;;  %v2282_v59 = vshll.u32 %v2137_v11, 16  ;;  %v6737_v38 = vld [vmem:[#allocation2 + $0x54] sm:$0xf0] }
  0xcd   : > { %6179 = vmatmul.msk.bf16.gmra.mxu0 %vm10153_vm11, %v2729_v25  ;;  %v7519_v36 = vpop.permute.xlu1 %1313  ;;  %v2644_v45 = vsel %vm2626_vm0, %v2611_v20, %v7434_v6  ;;  %v227_v6 = vsel %vm6887_vm3, 0, %v226_v43  ;;  %v1935_v9 = vrot.slane %v6493_v50, 1  ;;  %v283_v25 = vsel %vm6919_vm6, 0, %v282_v63  ;;  %v7561_v42 = vld [vmem:[#allocation2 + $0x54] sm:$0xff]  }
  0xce   : > { %v7531_v30 = vpop.permute.xlu2 %2066  ;;  %228 = vst [vmem:[#allocation2 + $0xa8] sm:$0x1] %v227_v6  ;;  %v2275_v20 = vshrl.u32 %v7522_v35, 16  ;;  %v584_v46 = vrot.slane %v582_v24, 7  ;;  %v1405_v4 = vrot.slane %v6736_v31, 1  ;;  %v585_v19 = vshll.u32 %v352_v57, 16 }
  0xcf   : > { %284 = vst [vmem:[#allocation2 + $0xb0] sm:$0x1] %v283_v25  ;;  %v590_v40 = vshrl.u32 %v353_v22, 16  ;;  %v593_v48 = vshll.u32 %v353_v22, 16  ;;  %v6654_v50 = vld [vmem:[#allocation2 + $0x18] sm:$0xff]   ;;  %v2115_v37 = vunpack.c.l.b16 %v961_v53 }
  0xd0   : > { %2470 = vrot.lane.b32.xlu0 %v2428_v60, %s6854_s24  ;;  %v2448_v60 = vrot.slane %v2137_v11, 1  ;;  %v2500_v51 = vsel %vm2494_vm12, %v6654_v50, %v7519_v36  ;;  %v587_v2 = vor.u32 %v585_v19, %v584_v46  ;;  %v2203_v19 = vshrl.u32 %v7561_v42, 16  ;;  %v3602_v27 = vld [vmem:[#allocation2 + $0x54] sm:$0xf] }
  0xd2   : > { %v2079_v44 = vpop.permute.xlu0 %2078 }
  0xd3   : > { %v2677_v15 = vsel %vm2659_vm1, %v2644_v45, %v2079_v44  ;;  %1844 = vrot.lane.b32.xlu1 %v1773_v7, %s6853_s23  ;;  %v1406_v7 = vrot.slane %v7509_v47, 1  ;;  %v2449_v45 = vsel %vm1389_vm9, %v2447_v56, %v2448_v60  ;;  %v592_v47 = vrot.slane %v590_v40, 7 }
  0xd4   : > { %v2710_v28 = vsel %vm2692_vm4, %v2677_v15, %v7475_v16  ;;  %1460 = vrot.lane.b32.xlu2 %v1425_v29, %s6850_s20  ;;  %v1936_v16 = vrot.slane %v7477_v1, 1  ;;  %v1603_v1 = vunpack.c.l.b16 %v896_v62  ;;  %v588_v29 = vrot.slane %v584_v46, 4 }
  0xd5   : > { %v2479_v52 = vpop.permute.xlu1 %2478  ;;  %v774_v15 = vld [vmem:[#allocation2 + $0xa8] sm:$0xf]  ;;  %v595_v11 = vor.u32 %v593_v48, %v592_v47  ;;  %v597_v49 = vrot.slane %v592_v47, 4  ;;  %v1407_v31 = vsel %vm1389_vm9, %v1405_v4, %v1406_v7  ;;  %v2131_v56 = vpack.c.b16 %v2115_v37, %v2115_v37 }
  0xd6   : > { %v2743_v54 = vsel %vm10154_vm5, %v2710_v28, %v2479_v52  ;;  %v7553_v8 = vpop.permute.xlu2 %1327  ;;  %v1937_v33 = vsel %vm1389_vm9, %v1935_v9, %v1936_v16  ;;  %v1619_v44 = vpack.c.b16 %v1603_v1, %v1603_v1  ;;  %v2280_v28 = vor.u32 %v2279_v17, %v2275_v20  ;;  %v778_v63 = vld [vmem:[#allocation2 + $0xb0] sm:$0x1] }
  0xd7   : > { %6186 = vmatmul.msk.bf16.vlgmr.msra.gmra.mxu2 %vm10153_vm11, %v2743_v54  ;;  %v2284_v52 = vrot.slane %v2282_v59, 1  ;;  %v6738_v54 = vld [vmem:[#allocation2 + $0x54] sm:$0xe]  ;;  %v775_v36 = vsel %vm6937_vm8, %v587_v2, %v774_v15  ;;  %v596_v9 = vsel %vm6927_vm7, %v588_v29, %v595_v11  ;;  %v779_v16 = vsel %vm6887_vm3, %v597_v49, %v778_v63  ;;  %v839_v59 = vld [vmem:[#allocation2 + $0x98] sm:$0x1] }
  0xd8   : > { %1572 = vrot.lane.b32.xlu0 %v7346_v18, %s6848_s18  ;;  %v6482_v18 = vld [vmem:[#allocation2 + $0x48] sm:$0xf0]  ;;  %776 = vst [vmem:[#allocation2 + $0xa8] sm:$0xf] %v775_v36  ;;  %v6739_v60 = vor.u32 %v6738_v54, %v6737_v38  ;;  %v2430_v4 = vrot.slane %v2131_v56, 1 }
  0xd9   : > { %v6484_v61 = vor.u32 %v6483_v58, %v6482_v18  ;;  %v2285_v24 = vsel %vm1116_vm10, %v2280_v28, %v2284_v52  ;;  %777 = vst.msk [vmem:[#allocation2 + $0xac] sm:$0xf] %vm172_vm2, %v596_v9  ;;  %v2205_v18 = vshll.u32 %v7561_v42, 16  ;;  %v6471_v2 = vld [vmem:[#allocation2 + $0x90] sm:$0xe] }
  0xda   : > { %v1443_v10 = vpop.permute.xlu0 %1442  ;;  %780 = vst [vmem:[#allocation2 + $0xb0] sm:$0x1] %v779_v16  ;;  %v903_v28 = vld [vmem:[#allocation2 + $0xa4] sm:$0x1]  ;;  %v6741_v36 = vld [vmem:[#allocation2 + $0x9c] sm:$0xe] }
  0xdb   : > { %1319 = vrot.lane.b32.xlu1 %v1188_v5, %s6851_s21  ;;  %v2533_v43 = vsel %vm2527_vm13, %v2500_v51, %v1443_v10  ;;  %v1917_v57 = vrot.slane %v6484_v61, 1  ;;  %v2207_v40 = vrot.slane %v2205_v18, 1  ;;  %v1096_v61 = vunpack.c.l.b16 %v839_v59  ;;  %v6470_v51 = vld [vmem:[#allocation2 + $0x90] sm:$0xf0]  ;;  %v323_v18 = vld [vmem:[%s6902_s17 + $0xe8] sm:$0xff] }
  0xdc   : > { %1972 = vrot.lane.b32.xlu2 %v1937_v33, %s6852_s22  ;;  %v2566_v62 = vsel %vm2560_vm14, %v2533_v43, %v7497_v34  ;;  %v1698_v34 = vshll.u32 %v1619_v44, 16  ;;  %v6472_v52 = vor.u32 %v6471_v2, %v6470_v51  ;;  %v1610_v49 = vunpack.c.l.b16 %v903_v28 }
  0xdd   : > { %v1955_v13 = vpop.permute.xlu1 %1954  ;;  %v2208_v15 = vor.u32 %v2207_v40, %v2203_v19  ;;  %v1112_v43 = vpack.c.b16 %v1096_v61, %v1096_v61 }
  0xde   : > { %v7570_v6 = vpop.permute.xlu2 %1840  ;;  %v1700_v1 = vrot.slane %v1698_v34, 1  ;;  %v229_v34 = vld [vmem:[#allocation2 + $0xb4] sm:$0x1] }
  0xdf   : > { %v1269_v53 = vshll.u32 %v1112_v43, 16 }
  0xe0   : > { %2084 = vrot.lane.b32.xlu0 %v7522_v35, %s6849_s19  ;;  %v1918_v35 = vrot.slane %v1619_v44, 1  ;;  %v1701_v7 = vsel %vm1116_vm10, %v7493_v21, %v1700_v1  ;;  %v7603_v44 = vld [vmem:[#allocation2 + $0x9c] sm:$0xf0] }
  0xe1   : > { %v1271_v16 = vrot.slane %v1269_v53, 1  ;;  %v322_v1 = vld [vmem:[%s6902_s17 + $0xe0] sm:$0xff] }
  0xe2   : > { %v1827_v55 = vpop.permute.xlu0 %1826  ;;  %v1919_v10 = vsel %vm1389_vm9, %v1917_v57, %v1918_v35  ;;  %v968_v57 = vld [vmem:[#allocation2 + $0xb0] sm:$0x1]  ;;  %v7623_v35 = vld [vmem:[#allocation2 + $0x54] sm:$0xf0]  ;;  %v354_v59 = vpack.c.bf16 %v322_v1, %v322_v1  ;;  %v962_v1 = vld [vmem:[#allocation2 + $0x68] sm:$0x1] }
  0xe3   : > { %2484 = vrot.lane.b32.xlu1 %v2449_v45, %s6854_s24  ;;  %v2599_v5 = vsel %vm2593_vm15, %v2566_v62, %v1827_v55  ;;  %v7601_v45 = vld [vmem:[#allocation2 + $0x9c] sm:$0xff]   ;;  %v833_v55 = vld [vmem:[#allocation2 + $0x50] sm:$0x1]  ;;  %v7621_v62 = vld [vmem:[#allocation2 + $0x54] sm:$0xff]  }
  0xe4   : > { %v2632_v25 = vsel %vm2626_vm0, %v2599_v5, %v1955_v13  ;;  %2356 = vrot.lane.b32.xlu2 %v2285_v24, %s6855_s25  ;;  %v2429_v13 = vrot.slane %v6739_v60, 1  ;;  %v1777_v63 = vshll.u32 %v7601_v45, 16  ;;  %v7627_v5 = vpack.c.b16 %v1610_v49, %v1610_v49  ;;  %v6461_v24 = vld [vmem:[#allocation2 + $0x48] sm:$0xf0] }
  0xe5   : > { %v2467_v22 = vpop.permute.xlu1 %2466  ;;  %v2665_v33 = vsel %vm2659_vm1, %v2632_v25, %v7531_v30  ;;  %v2210_v30 = vshll.u32 %v2131_v56, 16  ;;  %v1775_v56 = vshrl.u32 %v7601_v45, 16  ;;  %v230_v60 = vsel %vm6887_vm3, 0, %v229_v34 }
  0xe6   : > { %v7590_v58 = vpop.permute.xlu2 %1315  ;;  %v2431_v48 = vsel %vm1389_vm9, %v2429_v13, %v2430_v4  ;;  %231 = vst [vmem:[#allocation2 + $0xb4] sm:$0x1] %v230_v60  ;;  %v1272_v4 = vsel %vm1116_vm10, %v7386_v14, %v1271_v16  ;;  %v599_v61 = vshrl.u32 %v354_v59, 16  ;;  %v602_v28 = vshll.u32 %v354_v59, 16 }
  0xe7   : > { %v2212_v50 = vrot.slane %v2210_v30, 1 }
  0xe8   : > { %1448 = vrot.lane.b32.xlu0 %v1407_v31, %s6850_s20  ;;  %v6462_v31 = vld [vmem:[#allocation2 + $0x48] sm:$0xe] }
  0xe9   : > { %v2213_v54 = vsel %vm1116_vm10, %v2208_v15, %v2212_v50 }
  0xea   : > { %v2339_v20 = vpop.permute.xlu0 %2338 }
  0xeb   : > { %v2698_v17 = vsel %vm2692_vm4, %v2665_v33, %v2339_v20  ;;  %1960 = vrot.lane.b32.xlu1 %v1919_v10, %s6852_s22  ;;  %v897_v10 = vld [vmem:[#allocation2 + $0x5c] sm:$0x1]  ;;  %v1779_v20 = vrot.slane %v1777_v63, 1 }
  0xec   : > { %v2731_v46 = vsel %vm10154_vm5, %v2698_v17, %v2467_v22  ;;  %1560 = vrot.lane.b32.xlu2 %v7463_v39, %s6848_s18  ;;  %v2514_v39 = vsel %vm2494_vm12, %v7200_v41, %v7553_v8  ;;  %v1426_v41 = vrot.slane %v6472_v52, 1  ;;  %v1427_v8 = vrot.slane %v1112_v43, 1  ;;  %v285_v17 = vld [vmem:[#allocation2 + $0xbc] sm:$0x1] }
  0xed   : > { %6180 = vmatmul.msk.bf16.gmra.mxu0 %vm10153_vm11, %v2731_v46  ;;  %v1569_v38 = vpop.permute.xlu1 %1568  ;;  %v2122_v22 = vunpack.c.l.b16 %v968_v57  ;;  %v355_v46 = vpack.c.bf16 %v323_v18, %v323_v18  ;;  %v286_v19 = vsel %vm6919_vm6, 0, %v285_v17  ;;  %v1604_v50 = vunpack.c.l.b16 %v897_v10 }
  0xee   : > { %v7609_v29 = vpop.permute.xlu2 %2480  ;;  %v1428_v13 = vsel %vm1389_vm9, %v1426_v41, %v1427_v8  ;;  %287 = vst [vmem:[#allocation2 + $0xbc] sm:$0x1] %v286_v19  ;;  %v1780_v2 = vor.u32 %v1779_v20, %v1775_v56 }
  0xef   : > { %v7650_v15 = vpack.c.b16 %v2122_v22, %v2122_v22  ;;  %v607_v14 = vshrl.u32 %v355_v46, 16  ;;  %v610_v53 = vshll.u32 %v355_v46, 16  ;;  %v1703_v46 = vshrl.u32 %v7621_v62, 16 }
  0xf0   : > { %1832 = vrot.lane.b32.xlu0 %v1701_v7, %s6853_s23  ;;  %v1782_v7 = vshll.u32 %v7627_v5, 16 }
  0xf1   : > { %v609_v52 = vrot.slane %v607_v14, 7  ;;  %v2294_v22 = vshll.u32 %v7650_v15, 16 }
  0xf2   : > { %v1457_v47 = vpop.permute.xlu0 %1456  ;;  %v1784_v43 = vrot.slane %v1782_v7, 1 }
  0xf3   : > { %2472 = vrot.lane.b32.xlu1 %v2431_v48, %s6854_s24  ;;  %v2547_v9 = vsel %vm2527_vm13, %v2514_v39, %v1457_v47  ;;  %v601_v47 = vrot.slane %v599_v61, 7  ;;  %v612_v41 = vor.u32 %v610_v53, %v609_v52  ;;  %v614_v20 = vrot.slane %v609_v52, 4  ;;  %v6518_v61 = vld [vmem:[#allocation2 + $0xa8] sm:$0xf0] }
  0xf4   : > { %2072 = vrot.lane.b32.xlu2 %v7561_v42, %s6849_s19  ;;  %v1090_v42 = vunpack.c.l.b16 %v833_v55  ;;  %v2580_v33 = vsel %vm2560_vm14, %v2547_v9, %v1569_v38  ;;  %v6742_v38 = vor.u32 %v6741_v36, %v7603_v44  ;;  %v7655_v44 = vld [vmem:[#allocation2 + $0xa8] sm:$0xff]   ;;  %v2296_v7 = vrot.slane %v2294_v22, 1 }
  0xf5   : > { %v7616_v11 = vpop.permute.xlu1 %2080  ;;  %v2613_v48 = vsel %vm2593_vm15, %v2580_v33, %v7570_v6  ;;  %v1939_v6 = vrot.slane %v7627_v5, 1  ;;  %v605_v36 = vrot.slane %v601_v47, 4  ;;  %v604_v9 = vor.u32 %v602_v28, %v601_v47  ;;  %v785_v33 = vld [vmem:[#allocation2 + $0xbc] sm:$0x1] }
  0xf6   : > { %v7629_v37 = vpop.permute.xlu2 %1956  ;;  %v1106_v30 = vpack.c.b16 %v1090_v42, %v1090_v42  ;;  %v1938_v39 = vrot.slane %v6742_v38, 1  ;;  %v1705_v5 = vshll.u32 %v7621_v62, 16  ;;  %v2287_v56 = vshrl.u32 %v7655_v44, 16 }
  0xf7   : > { %v613_v18 = vsel %vm6927_vm7, %v605_v36, %v612_v41  ;;  %v786_v38 = vsel %vm6887_vm3, %v614_v20, %v785_v33  ;;  %v6746_v36 = vld [vmem:[#allocation2 + $0x9c] sm:$0xf0]  ;;  %v840_v41 = vld [vmem:[#allocation2 + $0xa4] sm:$0x1]  ;;  %v904_v20 = vld [vmem:[#allocation2 + $0xb0] sm:$0x1] }
  0xf8   : > { %2344 = vrot.lane.b32.xlu0 %v2213_v54, %s6855_s25  ;;  %v2289_v54 = vshll.u32 %v7655_v44, 16  ;;  %v1409_v16 = vrot.slane %v1106_v30, 1  ;;  %v1197_v34 = vshll.u32 %v1106_v30, 16  ;;  %784 = vst.msk [vmem:[#allocation2 + $0xb8] sm:$0xf] %vm172_vm2, %v613_v18 }
  0xf9   : > { %787 = vst [vmem:[#allocation2 + $0xbc] sm:$0x1] %v786_v38  ;;  %v1611_v38 = vunpack.c.l.b16 %v904_v20 }
  0xfa   : > { %v1969_v25 = vpop.permute.xlu0 %1968  ;;  %v2291_v60 = vrot.slane %v2289_v54, 1  ;;  %v1199_v19 = vrot.slane %v1197_v34, 1  ;;  %v6744_v54 = vld [vmem:[#allocation2 + $0x54] sm:$0xe] }
  0xfb   : > { %1574 = vrot.lane.b32.xlu1 %v7601_v45, %s6848_s18  ;;  %v6463_v45 = vor.u32 %v6462_v31, %v6461_v24  ;;  %v2646_v51 = vsel %vm2626_vm0, %v2613_v48, %v1969_v25  ;;  %v7666_v24 = vpack.c.b16 %v1604_v50, %v1604_v50  ;;  %v781_v31 = vld [vmem:[#allocation2 + $0xb4] sm:$0xf]  ;;  %v1940_v25 = vsel %vm1389_vm9, %v1938_v39, %v1939_v6  ;;  %v6519_v48 = vld [vmem:[#allocation2 + $0xa8] sm:$0xe] }
  0xfc   : > { %1333 = vrot.lane.b32.xlu2 %v1272_v4, %s6851_s21  ;;  %v2679_v57 = vsel %vm2659_vm1, %v2646_v51, %v7616_v11  ;;  %v1785_v11 = vsel %vm1116_vm10, %v1780_v2, %v1784_v43  ;;  %v782_v17 = vsel %vm6937_vm8, %v604_v9, %v781_v31  ;;  %v7693_v30 = vor.u32 %v2291_v60, %v2287_v56 }
  0xfd   : > { %v7645_v40 = vpop.permute.xlu1 %1444  ;;  %v1408_v63 = vrot.slane %v6463_v45, 1  ;;  %v1710_v4 = vshll.u32 %v7666_v24, 16  ;;  %783 = vst [vmem:[#allocation2 + $0xb4] sm:$0xf] %v782_v17  ;;  %v1200_v52 = vsel %vm1116_vm10, %v7493_v21, %v1199_v19  ;;  %v6520_v53 = vor.u32 %v6519_v48, %v6518_v61  ;;  %v6747_v21 = vld [vmem:[#allocation2 + $0x9c] sm:$0xe] }
  0xfe   : > { %v7659_v49 = vpop.permute.xlu2 %2468  ;;  %v2297_v39 = vsel %vm1116_vm10, %v7693_v30, %v2296_v7  ;;  %v6748_v33 = vor.u32 %v6747_v21, %v6746_v36  ;;  %v6510_v7 = vld [vmem:[#allocation2 + $0x60] sm:$0xe]  ;;  %v6494_v61 = vld [vmem:[#allocation2 + $0xa8] sm:$0xf0]  ;;  %v6495_v48 = vld [vmem:[#allocation2 + $0xa8] sm:$0xe] }
  0xff   : > { %v1410_v59 = vsel %vm1389_vm9, %v1408_v63, %v1409_v16  ;;  %v1712_v2 = vrot.slane %v1710_v4, 1  ;;  %v2450_v16 = vrot.slane %v6520_v53, 1  ;;  %v6509_v4 = vld [vmem:[#allocation2 + $0x60] sm:$0xf0] }
 0x100   : > { %1462 = vrot.lane.b32.xlu0 %v1428_v13, %s6850_s20  ;;  %v1707_v13 = vrot.slane %v1705_v5, 1  ;;  %v2451_v5 = vrot.slane %v7650_v15, 1  ;;  %v6745_v15 = vor.u32 %v6744_v54, %v7623_v35  ;;  %v1921_v35 = vrot.slane %v7666_v24, 1  ;;  %v969_v53 = vld [vmem:[#allocation2 + $0xbc] sm:$0x1] }
 0x101   : > { %v1429_v19 = vrot.slane %v6748_v33, 1  ;;  %v6496_v54 = vor.u32 %v6495_v48, %v6494_v61  ;;  %v2123_v36 = vunpack.c.l.b16 %v969_v53  ;;  %v324_v61 = vld [vmem:[%s6902_s17 + $0xf0] sm:$0xff] }
 0x102   : > { %v2353_v55 = vpop.permute.xlu0 %2352  ;;  %v1708_v51 = vor.u32 %v1707_v13, %v1703_v46  ;;  %v2452_v60 = vsel %vm1389_vm9, %v2450_v16, %v2451_v5  ;;  %v1920_v17 = vrot.slane %v6745_v15, 1  ;;  %v7742_v13 = vld [vmem:[#allocation2 + $0xb4] sm:$0xf0] }
 0x103   : > { %v2712_v8 = vsel %vm2692_vm4, %v2679_v57, %v2353_v55  ;;  %2086 = vrot.lane.b32.xlu1 %v7655_v44, %s6849_s19  ;;  %v1941_v16 = vrot.slane %v6496_v54, 1 }
 0x104   : > { %v2745_v42 = vsel %vm10154_vm5, %v2712_v8, %v7609_v29  ;;  %v2502_v29 = vsel %vm2494_vm12, %v7223_v26, %v7590_v58  ;;  %1846 = vrot.lane.b32.xlu2 %v1785_v11, %s6853_s23  ;;  %v7689_v26 = vld [vmem:[#allocation2 + $0x60] sm:$0xff]   ;;  %v2116_v58 = vunpack.c.l.b16 %v962_v1  ;;  %v1713_v57 = vsel %vm1116_vm10, %v1708_v51, %v1712_v2  ;;  %v7740_v46 = vld [vmem:[#allocation2 + $0xb4] sm:$0xff]  }
 0x105   : > { %6187 = vmatmul.msk.bf16.gmra.mxu2 %vm10153_vm11, %v2745_v42  ;;  %v1829_v10 = vpop.permute.xlu1 %1828  ;;  %v2535_v14 = vsel %vm2527_vm13, %v2502_v29, %v7645_v40  ;;  %v2217_v47 = vshll.u32 %v7689_v26, 16  ;;  %v7708_v40 = vld [vmem:[#allocation2 + $0x9c] sm:$0xff]   ;;  %v2215_v63 = vshrl.u32 %v7689_v26, 16  ;;  %v1097_v11 = vunpack.c.l.b16 %v840_v41 }
 0x106   : > { %v7695_v45 = vpop.permute.xlu2 %1570  ;;  %v7702_v28 = vpack.c.b16 %v2116_v58, %v2116_v58  ;;  %v1922_v24 = vsel %vm1389_vm9, %v1920_v17, %v1921_v35  ;;  %v6511_v51 = vor.u32 %v6510_v7, %v6509_v4  ;;  %v232_v35 = vld [vmem:[#allocation2 + $0xc0] sm:$0x1]  ;;  %v2299_v7 = vshrl.u32 %v7740_v46, 16 }
 0x107   : > { %v2219_v9 = vrot.slane %v2217_v47, 1  ;;  %v1274_v47 = vshrl.u32 %v7708_v40, 16 }
 0x108   : > { %1974 = vrot.lane.b32.xlu0 %v1940_v25, %s6852_s22  ;;  %v2222_v8 = vshll.u32 %v7702_v28, 16 }
 0x109   : > { %v7723_v25 = vor.u32 %v2219_v9, %v2215_v63  ;;  %v2433_v63 = vrot.slane %v7702_v28, 1 }
 0x10a   : > { %v1557_v50 = vpop.permute.xlu0 %1556  ;;  %v2224_v56 = vrot.slane %v2222_v8, 1 }
 0x10b   : > { %1450 = vrot.lane.b32.xlu1 %v1410_v59, %s6850_s20  ;;  %v2568_v43 = vsel %vm2560_vm14, %v2535_v14, %v1557_v50  ;;  %v1276_v59 = vshll.u32 %v7708_v40, 16  ;;  %v7746_v50 = vld [vmem:[#allocation2 + $0x54] sm:$0xff]  }
 0x10c   : > { %v2601_v55 = vsel %vm2593_vm15, %v2568_v43, %v1829_v10  ;;  %1321 = vrot.lane.b32.xlu2 %v1200_v52, %s6851_s21  ;;  %v2225_v29 = vsel %vm1116_vm10, %v7723_v25, %v2224_v56  ;;  %v7748_v14 = vld [vmem:[#allocation2 + $0x54] sm:$0xf0]  ;;  %v1204_v17 = vshll.u32 %v7746_v50, 16 }
 0x10d   : > { %v2341_v6 = vpop.permute.xlu1 %2340  ;;  %v2634_v42 = vsel %vm2626_vm0, %v2601_v55, %v7629_v37  ;;  %v1113_v37 = vpack.c.b16 %v1097_v11, %v1097_v11  ;;  %v1278_v43 = vrot.slane %v1276_v59, 1  ;;  %v834_v55 = vld [vmem:[#allocation2 + $0x5c] sm:$0x1] }
 0x10e   : > { %v7717_v31 = vpop.permute.xlu2 %2082  ;;  %v1206_v53 = vrot.slane %v1204_v17, 1  ;;  %v898_v17 = vld [vmem:[#allocation2 + $0x68] sm:$0x1] }
 0x10f   : > { %v1281_v52 = vshll.u32 %v1113_v37, 16  ;;  %v1279_v9 = vor.u32 %v1278_v43, %v1274_v47 }
 0x110   : > { %2358 = vrot.lane.b32.xlu0 %v2297_v39, %s6855_s25 }
 0x111   : > { %v1283_v41 = vrot.slane %v1281_v52, 1  ;;  %v1202_v52 = vshrl.u32 %v7746_v50, 16 }
 0x112   : > { %v2069_v22 = vpop.permute.xlu0 %2068 }
 0x113   : > { %v2667_v34 = vsel %vm2659_vm1, %v2634_v42, %v2069_v22  ;;  %1834 = vrot.lane.b32.xlu1 %v1713_v57, %s6853_s23  ;;  %v2432_v57 = vrot.slane %v6511_v51, 1  ;;  %v1091_v42 = vunpack.c.l.b16 %v834_v55  ;;  %v6655_v22 = vld [vmem:[#allocation2 + $0x78] sm:$0xff]   ;;  %v1284_v56 = vsel %vm1116_vm10, %v1279_v9, %v1283_v41 }
 0x114   : > { %v2700_v10 = vsel %vm2692_vm4, %v2667_v34, %v2341_v6  ;;  %2486 = vrot.lane.b32.xlu2 %v2452_v60, %s6854_s24  ;;  %v1627_v6 = vpack.c.b16 %v1611_v38, %v1611_v38  ;;  %v7762_v34 = vpack.c.b16 %v2123_v36, %v2123_v36  ;;  %v233_v38 = vsel %vm6887_vm3, 0, %v232_v35  ;;  %v841_v35 = vld [vmem:[#allocation2 + $0xb0] sm:$0x1] }
 0x115   : > { %v2733_v1 = vsel %vm10154_vm5, %v2700_v10, %v7659_v49  ;;  %v1459_v18 = vpop.permute.xlu1 %1458  ;;  %v2301_v10 = vshll.u32 %v7740_v46, 16  ;;  %v2434_v28 = vsel %vm1389_vm9, %v2432_v57, %v2433_v63  ;;  %v7771_v20 = vpack.c.b16 %v1091_v42, %v1091_v42  ;;  %234 = vst [vmem:[#allocation2 + $0xc0] sm:$0x1] %v233_v38  ;;  %v6753_v57 = vld [vmem:[#allocation2 + $0xb4] sm:$0xe] }
 0x116   : > { %6181 = vmatmul.msk.bf16.gmra.mxu0 %vm10153_vm11, %v2733_v1  ;;  %v7738_v49 = vpop.permute.xlu2 %1446  ;;  %v1942_v5 = vrot.slane %v1627_v6, 1  ;;  %v1794_v15 = vshll.u32 %v1627_v6, 16  ;;  %v288_v1 = vld [vmem:[#allocation2 + $0xc8] sm:$0x1]  ;;  %v356_v51 = vpack.c.bf16 %v324_v61, %v324_v61  ;;  %v6750_v63 = vld [vmem:[#allocation2 + $0x54] sm:$0xe]  ;;  %v6754_v38 = vor.u32 %v6753_v57, %v7742_v13 }
 0x117   : > { %v289_v33 = vsel %vm6919_vm6, 0, %v288_v1 }
 0x118   : > { %1562 = vrot.lane.b32.xlu0 %v7621_v62, %s6848_s18  ;;  %v1430_v62 = vrot.slane %v1113_v37, 1  ;;  %v325_v37 = vld [vmem:[%s6902_s17 + $0xf8] sm:$0xff]  ;;  %290 = vst [vmem:[#allocation2 + $0xc8] sm:$0x1] %v289_v33  ;;  %v1943_v4 = vsel %vm1389_vm9, %v1941_v16, %v1942_v5  ;;  %v616_v36 = vshrl.u32 %v356_v51, 16 }
 0x119   : > { %v357_v59 = vpack.c.bf16 %v325_v37, %v325_v37 }
 0x11a   : > { %v1330_v58 = vpop.permute.xlu0 %1329  ;;  %v1431_v39 = vsel %vm1389_vm9, %v1429_v19, %v1430_v62  ;;  %v2306_v19 = vshll.u32 %v7762_v34, 16  ;;  %v1796_v62 = vrot.slane %v1794_v15, 1  ;;  %v618_v5 = vrot.slane %v616_v36, 7  ;;  %v6485_v36 = vld [vmem:[#allocation2 + $0x60] sm:$0xf0] }
 0x11b   : > { %2346 = vrot.lane.b32.xlu1 %v2225_v29, %s6855_s25  ;;  %v2516_v11 = vsel %vm2494_vm12, %v6655_v22, %v1330_v58  ;;  %v2303_v58 = vrot.slane %v2301_v10, 1  ;;  %v624_v47 = vshrl.u32 %v357_v59, 16  ;;  %v619_v22 = vshll.u32 %v356_v51, 16 }
 0x11c   : > { %1962 = vrot.lane.b32.xlu2 %v1922_v24, %s6852_s22  ;;  %v2549_v29 = vsel %vm2527_vm13, %v2516_v11, %v1459_v18  ;;  %v2308_v54 = vrot.slane %v2306_v19, 1  ;;  %v1797_v55 = vsel %vm1116_vm10, %v7693_v30, %v1796_v62  ;;  %v627_v15 = vshll.u32 %v357_v59, 16  ;;  %v788_v1 = vld [vmem:[#allocation2 + $0xc0] sm:$0xf] }
 0x11d   : > { %v7750_v2 = vpop.permute.xlu1 %1970  ;;  %v2582_v48 = vsel %vm2560_vm14, %v2549_v29, %v7695_v45  ;;  %v2304_v6 = vor.u32 %v2303_v58, %v2299_v7  ;;  %v626_v9 = vrot.slane %v624_v47, 7  ;;  %v6656_v7 = vld [vmem:[#allocation2 + $0x30] sm:$0xff]   ;;  %v6751_v59 = vor.u32 %v6750_v63, %v7748_v14 }
 0x11e   : > { %v7758_v21 = vpop.permute.xlu2 %1830  ;;  %v1098_v51 = vunpack.c.l.b16 %v841_v35  ;;  %v6755_v47 = vld [vmem:[#allocation2 + $0x6c] sm:$0xf0] }
 0x11f   : > { %v2309_v42 = vsel %vm1116_vm10, %v2304_v6, %v2308_v54  ;;  %v792_v11 = vld [vmem:[#allocation2 + $0xc8] sm:$0x1]  ;;  %v1411_v13 = vrot.slane %v6751_v59, 1  ;;  %v2453_v6 = vrot.slane %v6754_v38, 1 }
 0x120   : > { %2074 = vrot.lane.b32.xlu0 %v7689_v26, %s6849_s19  ;;  %v7833_v63 = vpack.c.b16 %v1098_v51, %v1098_v51 }
 0x122   : > { %v1843_v8 = vpop.permute.xlu0 %1842 }
 0x123   : > { %1464 = vrot.lane.b32.xlu1 %v1431_v39, %s6850_s20  ;;  %v2615_v43 = vsel %vm2593_vm15, %v2582_v48, %v1843_v8  ;;  %v1209_v39 = vshll.u32 %v7771_v20, 16  ;;  %v1207_v8 = vor.u32 %v1206_v53, %v1202_v52  ;;  %v1605_v48 = vunpack.c.l.b16 %v898_v17  ;;  %v7826_v53 = vld [vmem:[#allocation2 + $0xb4] sm:$0xff]  }
 0x124   : > { %2474 = vrot.lane.b32.xlu2 %v2434_v28, %s6854_s24  ;;  %v2648_v41 = vsel %vm2626_vm0, %v2615_v43, %v7750_v2  ;;  %v631_v2 = vrot.slane %v626_v9, 4  ;;  %v1412_v52 = vrot.slane %v7771_v20, 1  ;;  %v963_v20 = vld [vmem:[#allocation2 + $0x74] sm:$0x1] }
 0x125   : > { %v2355_v60 = vpop.permute.xlu1 %2354  ;;  %v1211_v16 = vrot.slane %v1209_v39, 1  ;;  %v2681_v10 = vsel %vm2659_vm1, %v2648_v41, %v7717_v31  ;;  %v7828_v39 = vld [vmem:[#allocation2 + $0xb4] sm:$0xf0]  ;;  %v1621_v57 = vpack.c.b16 %v1605_v48, %v1605_v48  ;;  %v291_v48 = vld [vmem:[#allocation2 + $0xd4] sm:$0x1] }
 0x126   : > { %v7779_v18 = vpop.permute.xlu2 %2342  ;;  %v2714_v37 = vsel %vm2692_vm4, %v2681_v10, %v2355_v60  ;;  %v793_v31 = vsel %vm6887_vm3, %v631_v2, %v792_v11  ;;  %v2117_v11 = vunpack.c.l.b16 %v963_v20  ;;  %v1293_v10 = vshll.u32 %v7833_v63, 16 }
 0x127   : > { %794 = vst [vmem:[#allocation2 + $0xc8] sm:$0x1] %v793_v31  ;;  %v1212_v19 = vsel %vm1116_vm10, %v1207_v8, %v1211_v16  ;;  %v1722_v8 = vshll.u32 %v1621_v57, 16  ;;  %v905_v16 = vld [vmem:[#allocation2 + $0xbc] sm:$0x1]  ;;  %v1801_v31 = vshll.u32 %v7826_v53, 16 }
 0x128   : > { %1335 = vrot.lane.b32.xlu0 %v1284_v56, %s6851_s21  ;;  %v622_v56 = vrot.slane %v618_v5, 4  ;;  %v1295_v35 = vrot.slane %v1293_v10, 1  ;;  %v7887_v10 = vld [vmem:[#allocation2 + $0xb4] sm:$0xff]  }
 0x12a   : > { %v1318_v24 = vpop.permute.xlu0 %1317 }
 0x12b   : > { %1976 = vrot.lane.b32.xlu1 %v1943_v4, %s6852_s22  ;;  %v629_v4 = vor.u32 %v627_v15, %v626_v9  ;;  %v2504_v58 = vsel %vm2494_vm12, %v6656_v7, %v1318_v24  ;;  %v7821_v24 = vld [vmem:[#allocation2 + $0x6c] sm:$0xff]   ;;  %v1724_v15 = vrot.slane %v1722_v8, 1 }
 0x12c   : > { %1576 = vrot.lane.b32.xlu2 %v7655_v44, %s6848_s18  ;;  %v621_v44 = vor.u32 %v619_v22, %v618_v5  ;;  %v2537_v14 = vsel %vm2527_vm13, %v2504_v58, %v7738_v49  ;;  %v2454_v49 = vrot.slane %v7762_v34, 1  ;;  %v6756_v9 = vld [vmem:[#allocation2 + $0x6c] sm:$0xe]  ;;  %v1413_v34 = vsel %vm1389_vm9, %v1411_v13, %v1412_v52  ;;  %v235_v58 = vld [vmem:[#allocation2 + $0xcc] sm:$0x1] }
 0x12d   : > { %v1559_v45 = vpop.permute.xlu1 %1558  ;;  %v630_v61 = vsel %vm6927_vm7, %v622_v56, %v629_v4  ;;  %v2229_v56 = vshll.u32 %v7821_v24, 16  ;;  %v6757_v17 = vor.u32 %v6756_v9, %v6755_v47  ;;  %v1725_v59 = vsel %vm1116_vm10, %v7723_v25, %v1724_v15 }
 0x12e   : > { %v7800_v28 = vpop.permute.xlu2 %1460  ;;  %v789_v60 = vsel %vm6937_vm8, %v621_v44, %v788_v1  ;;  %791 = vst.msk [vmem:[#allocation2 + $0xc4] sm:$0xf] %vm172_vm2, %v630_v61  ;;  %v2570_v43 = vsel %vm2560_vm14, %v2537_v14, %v1559_v45  ;;  %v2455_v5 = vsel %vm1389_vm9, %v2453_v6, %v2454_v49  ;;  %v1924_v1 = vrot.slane %v1621_v57, 1  ;;  %v6473_v57 = vld [vmem:[#allocation2 + $0xa8] sm:$0xf0] }
 0x12f   : > { %790 = vst [vmem:[#allocation2 + $0xc0] sm:$0xf] %v789_v60  ;;  %v2603_v45 = vsel %vm2593_vm15, %v2570_v43, %v7758_v21  ;;  %v2227_v60 = vshrl.u32 %v7821_v24, 16  ;;  %v2435_v51 = vrot.slane %v6757_v17, 1  ;;  %v1296_v47 = vsel %vm1116_vm10, %v7693_v30, %v1295_v35  ;;  %v6762_v17 = vld [vmem:[#allocation2 + $0xb4] sm:$0xe] }
 0x130   : > { %1848 = vrot.lane.b32.xlu0 %v1797_v55, %s6853_s23  ;;  %v6486_v55 = vld [vmem:[#allocation2 + $0x60] sm:$0xe]  ;;  %v236_v43 = vsel %vm6887_vm3, 0, %v235_v58  ;;  %v1799_v25 = vshrl.u32 %v7826_v53, 16  ;;  %v1803_v13 = vrot.slane %v1801_v31, 1 }
 0x131   : > { %v6487_v22 = vor.u32 %v6486_v55, %v6485_v36  ;;  %237 = vst [vmem:[#allocation2 + $0xcc] sm:$0x1] %v236_v43  ;;  %v292_v36 = vsel %vm6919_vm6, 0, %v291_v48 }
 0x132   : > { %v2483_v33 = vpop.permute.xlu0 %2482  ;;  %293 = vst [vmem:[#allocation2 + $0xd4] sm:$0x1] %v292_v36 }
 0x133   : > { %v2747_v29 = vsel %vm10154_vm5, %v2714_v37, %v2483_v33  ;;  %2360 = vrot.lane.b32.xlu1 %v2309_v42, %s6855_s25  ;;  %v1923_v2 = vrot.slane %v6487_v22, 1 }
 0x134   : > { %6188 = vmatmul.msk.bf16.gmra.mxu2 %vm10153_vm11, %v2747_v29  ;;  %2088 = vrot.lane.b32.xlu2 %v7740_v46, %s6849_s19  ;;  %v2133_v29 = vpack.c.b16 %v2117_v11, %v2117_v11  ;;  %v6759_v11 = vld [vmem:[#allocation2 + $0xb4] sm:$0xe] }
 0x135   : > { %v2071_v62 = vpop.permute.xlu1 %2070  ;;  %v1925_v38 = vsel %vm1389_vm9, %v1923_v2, %v1924_v1  ;;  %v842_v1 = vld [vmem:[#allocation2 + $0xbc] sm:$0x1] }
 0x136   : > { %v7831_v54 = vpop.permute.xlu2 %1972  ;;  %v2436_v14 = vrot.slane %v2133_v29, 1  ;;  %v7872_v49 = vld [vmem:[#allocation2 + $0xc0] sm:$0xff]  }
 0x137   : > { %v6522_v43 = vld [vmem:[#allocation2 + $0xc0] sm:$0xe] }
 0x138   : > { %1323 = vrot.lane.b32.xlu0 %v1212_v19, %s6851_s21  ;;  %v2231_v19 = vrot.slane %v2229_v56, 1  ;;  %v2311_v56 = vshrl.u32 %v7872_v49, 16 }
 0x13a   : > { %v1959_v46 = vpop.permute.xlu0 %1958  ;;  %v2232_v30 = vor.u32 %v2231_v19, %v2227_v60  ;;  %v6760_v19 = vor.u32 %v6759_v11, %v7828_v39 }
 0x13b   : > { %1564 = vrot.lane.b32.xlu1 %v7689_v26, %s6848_s18  ;;  %v2636_v41 = vsel %vm2626_vm0, %v2603_v45, %v1959_v46  ;;  %v1612_v26 = vunpack.c.l.b16 %v905_v16  ;;  %v6474_v45 = vld [vmem:[#allocation2 + $0xa8] sm:$0xe] }
 0x13c   : > { %v2669_v21 = vsel %vm2659_vm1, %v2636_v41, %v2071_v62  ;;  %1452 = vrot.lane.b32.xlu2 %v1413_v34, %s6850_s20  ;;  %v2234_v62 = vshll.u32 %v2133_v29, 16  ;;  %v2313_v34 = vshll.u32 %v7872_v49, 16 }
 0x13d   : > { %v1332_v42 = vpop.permute.xlu1 %1331  ;;  %v2702_v33 = vsel %vm2692_vm4, %v2669_v21, %v7779_v18  ;;  %v7855_v7 = vpack.c.b16 %v1612_v26, %v1612_v26  ;;  %v970_v18 = vld [vmem:[#allocation2 + $0xc8] sm:$0x1] }
 0x13e   : > { %v7847_v37 = vpop.permute.xlu2 %2356  ;;  %v2124_v52 = vunpack.c.l.b16 %v970_v18  ;;  %v2518_v6 = vsel %vm2494_vm12, %v7382_v12, %v1332_v42  ;;  %v2236_v46 = vrot.slane %v2234_v62, 1  ;;  %v1804_v12 = vor.u32 %v1803_v13, %v1799_v25  ;;  %v906_v13 = vld [vmem:[#allocation2 + $0xc8] sm:$0x1] }
 0x13f   : > { %v2551_v9 = vsel %vm2527_vm13, %v2518_v6, %v7800_v28  ;;  %v2437_v42 = vsel %vm1389_vm9, %v2435_v51, %v2436_v14  ;;  %v6761_v28 = vld [vmem:[#allocation2 + $0xb4] sm:$0xf0]  ;;  %v2315_v15 = vrot.slane %v2313_v34, 1  ;;  %v1944_v51 = vrot.slane %v6760_v19, 1  ;;  %v6497_v6 = vld [vmem:[#allocation2 + $0xc0] sm:$0xf0] }
 0x140   : > { %2488 = vrot.lane.b32.xlu0 %v2455_v5, %s6854_s24  ;;  %v7883_v16 = vpack.c.b16 %v2124_v52, %v2124_v52  ;;  %v2237_v23 = vsel %vm1116_vm10, %v2232_v30, %v2236_v46  ;;  %v6475_v5 = vor.u32 %v6474_v45, %v6473_v57  ;;  %v6763_v48 = vor.u32 %v6762_v17, %v6761_v28  ;;  %v6498_v30 = vld [vmem:[#allocation2 + $0xc0] sm:$0xe] }
 0x141   : > { %v7902_v58 = vor.u32 %v2315_v15, %v2311_v56  ;;  %v1945_v39 = vrot.slane %v7855_v7, 1  ;;  %v6765_v56 = vld [vmem:[#allocation2 + $0xcc] sm:$0xe] }
 0x142   : > { %v2471_v44 = vpop.permute.xlu0 %2470  ;;  %v2318_v2 = vshll.u32 %v7883_v16, 16  ;;  %v1435_v52 = vrot.slane %v6763_v48, 1  ;;  %v2457_v11 = vrot.slane %v7883_v16, 1 }
 0x143   : > { %v2735_v4 = vsel %vm10154_vm5, %v2702_v33, %v2471_v44  ;;  %2076 = vrot.lane.b32.xlu1 %v7821_v24, %s6849_s19  ;;  %v1806_v24 = vshll.u32 %v7855_v7, 16  ;;  %v1432_v33 = vrot.slane %v6475_v5, 1  ;;  %v1433_v44 = vrot.slane %v7833_v63, 1 }
 0x144   : > { %6182 = vmatmul.msk.bf16.gmra.mxu0 %vm10153_vm11, %v2735_v4  ;;  %1836 = vrot.lane.b32.xlu2 %v1725_v59, %s6853_s23  ;;  %v1099_v59 = vunpack.c.l.b16 %v842_v1  ;;  %v2320_v18 = vrot.slane %v2318_v2, 1  ;;  %v1946_v46 = vsel %vm1389_vm9, %v1944_v51, %v1945_v39  ;;  %v1298_v7 = vshrl.u32 %v7887_v10, 16 }
 0x145   : > { %v1845_v61 = vpop.permute.xlu1 %1844  ;;  %v1808_v41 = vrot.slane %v1806_v24, 1  ;;  %v1434_v60 = vsel %vm1389_vm9, %v1432_v33, %v1433_v44 }
 0x146   : > { %v7876_v55 = vpop.permute.xlu2 %1560 }
 0x147   : > { %v1809_v26 = vsel %vm1116_vm10, %v1804_v12, %v1808_v41  ;;  %v6764_v12 = vld [vmem:[#allocation2 + $0xcc] sm:$0xf0] }
 0x148   : > { %1964 = vrot.lane.b32.xlu0 %v1925_v38, %s6852_s22 }
 0x14a   : > { %v1573_v20 = vpop.permute.xlu0 %1572 }
 0x14b   : > { %1337 = vrot.lane.b32.xlu1 %v1296_v47, %s6851_s21  ;;  %v2584_v8 = vsel %vm2560_vm14, %v2551_v9, %v1573_v20  ;;  %v6521_v47 = vld [vmem:[#allocation2 + $0xc0] sm:$0xf0]  ;;  %v1613_v20 = vunpack.c.l.b16 %v906_v13  ;;  %v954_v9 = vld [vmem:[#allocation2 + $0xcc] sm:$0xff]  }
 0x14c   : > { %v2617_v21 = vsel %vm2593_vm15, %v2584_v8, %v1845_v61  ;;  %2348 = vrot.lane.b32.xlu2 %v2237_v23, %s6855_s25  ;;  %v2321_v61 = vsel %vm1116_vm10, %v7902_v58, %v2320_v18  ;;  %v6523_v36 = vor.u32 %v6522_v43, %v6521_v47  ;;  %v6499_v8 = vor.u32 %v6498_v30, %v6497_v6  ;;  %v6657_v6 = vld [vmem:[#allocation2 + $0x90] sm:$0xff]  }
 0x14d   : > { %v1320_v22 = vpop.permute.xlu1 %1319  ;;  %v2650_v35 = vsel %vm2626_vm0, %v2617_v21, %v7831_v54  ;;  %v1115_v54 = vpack.c.b16 %v1099_v59, %v1099_v59  ;;  %v1629_v21 = vpack.c.b16 %v1613_v20, %v1613_v20  ;;  %v6766_v59 = vor.u32 %v6765_v56, %v6764_v12 }
 0x14e   : > { %v7896_v29 = vpop.permute.xlu2 %2072  ;;  %v2506_v41 = vsel %vm2494_vm12, %v7468_v3, %v1320_v22  ;;  %v971_v3 = vld [vmem:[#allocation2 + $0xd4] sm:$0x1]  ;;  %v1947_v2 = vrot.slane %v6499_v8, 1  ;;  %v2325_v19 = vshll.u32 %v954_v9, 16  ;;  %v2323_v47 = vshrl.u32 %v954_v9, 16 }
 0x14f   : > { %v1305_v24 = vshll.u32 %v1115_v54, 16  ;;  %v1948_v33 = vrot.slane %v1629_v21, 1  ;;  %v2459_v48 = vrot.slane %v6766_v59, 1 }
 0x150   : > { %2476 = vrot.lane.b32.xlu0 %v2437_v42, %s6854_s24  ;;  %v2456_v42 = vrot.slane %v6523_v36, 1  ;;  %v2327_v43 = vrot.slane %v2325_v19, 1 }
 0x151   : > { %v1307_v34 = vrot.slane %v1305_v24, 1 }
 0x152   : > { %v2085_v4 = vpop.permute.xlu0 %2084  ;;  %v2458_v44 = vsel %vm1389_vm9, %v2456_v42, %v2457_v11  ;;  %v2328_v13 = vor.u32 %v2327_v43, %v2323_v47 }
 0x153   : > { %v2683_v31 = vsel %vm2659_vm1, %v2650_v35, %v2085_v4  ;;  %1850 = vrot.lane.b32.xlu1 %v1809_v26, %s6853_s23  ;;  %v1818_v35 = vshll.u32 %v1629_v21, 16  ;;  %v2125_v4 = vunpack.c.l.b16 %v971_v3 }
 0x154   : > { %v2716_v63 = vsel %vm2692_vm4, %v2683_v31, %v7847_v37  ;;  %1466 = vrot.lane.b32.xlu2 %v1434_v60, %s6850_s20  ;;  %v1300_v37 = vshll.u32 %v7887_v10, 16 }
 0x155   : > { %v2485_v62 = vpop.permute.xlu1 %2484  ;;  %v1820_v18 = vrot.slane %v1818_v35, 1  ;;  %v2141_v60 = vpack.c.b16 %v2125_v4, %v2125_v4 }
 0x156   : > { %v2749_v38 = vsel %vm10154_vm5, %v2716_v63, %v2485_v62  ;;  %v7917_v14 = vpop.permute.xlu2 %1333  ;;  %v1302_v45 = vrot.slane %v1300_v37, 1 }
 0x157   : > { %6189 = vmatmul.msk.bf16.gmra.mxu2 %vm10153_vm11, %v2749_v38  ;;  %v2460_v51 = vrot.slane %v2141_v60, 1  ;;  %v1821_v39 = vsel %vm1116_vm10, %v7902_v58, %v1820_v18  ;;  %v2520_v58 = vsel %vm2494_vm12, %v6657_v6, %v7917_v14 }
 0x158   : > { %1578 = vrot.lane.b32.xlu0 %v7826_v53, %s6848_s18  ;;  %v1436_v53 = vrot.slane %v1115_v54, 1  ;;  %v1303_v28 = vor.u32 %v1302_v45, %v1298_v7 }
 0x15a   : > { %v1449_v25 = vpop.permute.xlu0 %1448  ;;  %v1437_v5 = vsel %vm1389_vm9, %v1435_v52, %v1436_v53  ;;  %v1308_v17 = vsel %vm1116_vm10, %v1303_v28, %v1307_v34 }
 0x15b   : > { %2362 = vrot.lane.b32.xlu1 %v2321_v61, %s6855_s25  ;;  %v2539_v23 = vsel %vm2527_vm13, %v2506_v41, %v1449_v25  ;;  %v2330_v25 = vshll.u32 %v2141_v60, 16 }
 0x15c   : > { %1978 = vrot.lane.b32.xlu2 %v1946_v46, %s6852_s22  ;;  %v2572_v22 = vsel %vm2560_vm14, %v2539_v23, %v7876_v55  ;;  %v1949_v55 = vsel %vm1389_vm9, %v1947_v2, %v1948_v33 }
 0x15d   : > { %v1961_v57 = vpop.permute.xlu1 %1960  ;;  %v2332_v24 = vrot.slane %v2330_v25, 1 }
 0x15e   : > { %v1847_v26 = vpop.permute.xlu2 %1846 }
 0x15f   : > { %v2333_v30 = vsel %vm1116_vm10, %v2328_v13, %v2332_v24 }
 0x160   : > { %2090 = vrot.lane.b32.xlu0 %v7872_v49, %s6849_s19 }
 0x162   : > { %v1833_v15 = vpop.permute.xlu0 %1832 }
 0x163   : > { %1468 = vrot.lane.b32.xlu1 %v1437_v5, %s6850_s20  ;;  %v2605_v1 = vsel %vm2593_vm15, %v2572_v22, %v1833_v15  ;;  %v6658_v5 = vld [vmem:[#allocation2 + $0x48] sm:$0xff]  }
 0x164   : > { %v2638_v31 = vsel %vm2626_vm0, %v2605_v1, %v1961_v57  ;;  %2490 = vrot.lane.b32.xlu2 %v2458_v44, %s6854_s24 }
 0x165   : > { %v2473_v16 = vpop.permute.xlu1 %2472  ;;  %v2671_v62 = vsel %vm2659_vm1, %v2638_v31, %v7896_v29  ;;  %v2461_v29 = vsel %vm1389_vm9, %v2459_v48, %v2460_v51 }
 0x166   : > { %v1322_v63 = vpop.permute.xlu2 %1321 }
 0x167   : > { %v2508_v42 = vsel %vm2494_vm12, %v6658_v5, %v1322_v63 }
 0x168   : > { %1339 = vrot.lane.b32.xlu0 %v1308_v17, %s6851_s21 }
 0x16a   : > { %v2345_v38 = vpop.permute.xlu0 %2344 }
 0x16b   : > { %v2704_v54 = vsel %vm2692_vm4, %v2671_v62, %v2345_v38  ;;  %1980 = vrot.lane.b32.xlu1 %v1949_v55, %s6852_s22 }
 0x16c   : > { %v2737_v61 = vsel %vm10154_vm5, %v2704_v54, %v2473_v16  ;;  %1580 = vrot.lane.b32.xlu2 %v7872_v49, %s6848_s18 }
 0x16d   : > { %6183 = vmatmul.msk.bf16.gmra.mxu0 %vm10153_vm11, %v2737_v61  ;;  %v1575_v37 = vpop.permute.xlu1 %1574 }
 0x16e   : > { %v2487_v52 = vpop.permute.xlu2 %2486 }
 0x170   : > { %1852 = vrot.lane.b32.xlu0 %v1821_v39, %s6853_s23 }
 0x172   : > { %v1463_v53 = vpop.permute.xlu0 %1462 }
 0x173   : > { %2492 = vrot.lane.b32.xlu1 %v2461_v29, %s6854_s24  ;;  %v2553_v49 = vsel %vm2527_vm13, %v2520_v58, %v1463_v53  ;;  %v7992_v58 = vpop.f32.mrf.mxu0 }
 0x174   : > { %2092 = vrot.lane.b32.xlu2 %v954_v9, %s6849_s19  ;;  %v2586_v7 = vsel %vm2560_vm14, %v2553_v49, %v1575_v37 }
 0x175   : > { %v2087_v46 = vpop.permute.xlu1 %2086  ;;  %v2619_v20 = vsel %vm2593_vm15, %v2586_v7, %v1847_v26 }
 0x176   : > { %v1963_v57 = vpop.permute.xlu2 %1962 }
 0x178   : > { %2364 = vrot.lane.b32.xlu0 %v2333_v30, %s6855_s25 }
 0x17a   : > { %v1975_v36 = vpop.permute.xlu0 %1974 }
 0x17b   : > { %v2652_v12 = vsel %vm2626_vm0, %v2619_v20, %v1975_v36  ;;  %v6659_v36 = vld [vmem:[#allocation2 + $0xa8] sm:$0xff]   ;;  %v7998_v20 = vpop.f32.mrf.mxu0 }
 0x17c   : > { %v2685_v14 = vsel %vm2659_vm1, %v2652_v12, %v2087_v46 }
 0x17d   : > { %v1451_v45 = vpop.permute.xlu1 %1450 }
 0x17e   : > { %v2475_v8 = vpop.permute.xlu2 %2474  ;;  %v2541_v28 = vsel %vm2527_vm13, %v2508_v42, %v1451_v45 }
 0x182   : > { %v2359_v41 = vpop.permute.xlu0 %2358 }
 0x183   : > { %v2718_v34 = vsel %vm2692_vm4, %v2685_v14, %v2359_v41 }
 0x184   : > { %v2751_v9 = vsel %vm10154_vm5, %v2718_v34, %v2487_v52 }
 0x185   : > { %6190 = vmatmul.msk.bf16.gmra.mxu2 %vm10153_vm11, %v2751_v9  ;;  %v1835_v23 = vpop.permute.xlu1 %1834 }
 0x186   : > { %v1577_v56 = vpop.permute.xlu2 %1576 }
 0x18a   : > { %v1563_v11 = vpop.permute.xlu0 %1562 }
 0x18b   : > { %v2574_v21 = vsel %vm2560_vm14, %v2541_v28, %v1563_v11  ;;  %v8006_v11 = vpop.f32.mrf.mxu0 }
 0x18c   : > { %v2607_v15 = vsel %vm2593_vm15, %v2574_v21, %v1835_v23 }
 0x18d   : > { %v2347_v26 = vpop.permute.xlu1 %2346  ;;  %v2640_v3 = vsel %vm2626_vm0, %v2607_v15, %v1963_v57 }
 0x18e   : > { %v2089_v17 = vpop.permute.xlu2 %2088 }
 0x192   : > { %v2075_v22 = vpop.permute.xlu0 %2074 }
 0x193   : > { %v2673_v2 = vsel %vm2659_vm1, %v2640_v3, %v2075_v22  ;;  %v8012_v3 = vpop.f32.mrf.mxu0 }
 0x194   : > { %v2706_v1 = vsel %vm2692_vm4, %v2673_v2, %v2347_v26 }
 0x195   : > { %v2739_v33 = vsel %vm10154_vm5, %v2706_v1, %v2475_v8  ;;  %v1465_v44 = vpop.permute.xlu1 %1464 }
 0x196   : > { %6184 = vmatmul.msk.bf16.gmra.mxu0 %vm10153_vm11, %v2739_v33  ;;  %v1453_v31 = vpop.permute.xlu2 %1452 }
 0x19a   : > { %v1336_v16 = vpop.permute.xlu0 %1335 }
 0x19b   : > { %v2522_v55 = vsel %vm2494_vm12, %v7708_v40, %v1336_v16 }
 0x19c   : > { %v2555_v18 = vsel %vm2527_vm13, %v2522_v55, %v1465_v44 }
 0x19d   : > { %v1977_v35 = vpop.permute.xlu1 %1976  ;;  %v2588_v60 = vsel %vm2560_vm14, %v2555_v18, %v1577_v56 }
 0x19e   : > { %v1837_v62 = vpop.permute.xlu2 %1836 }
 0x1a2   : > { %v1849_v4 = vpop.permute.xlu0 %1848 }
 0x1a3   : > { %v2621_v63 = vsel %vm2593_vm15, %v2588_v60, %v1849_v4  ;;  %v8026_v60 = vpop.f32.mrf.mxu2 }
 0x1a4   : > { %v2654_v54 = vsel %vm2626_vm0, %v2621_v63, %v1977_v35 }
 0x1a5   : > { %v2361_v59 = vpop.permute.xlu1 %2360  ;;  %v2687_v61 = vsel %vm2659_vm1, %v2654_v54, %v2089_v17  ;;  %v8017_v17 = vpop.f32.mrf.mxu0 }
 0x1a6   : > { %v2720_v48 = vsel %vm2692_vm4, %v2687_v61, %v2361_v59  ;;  %v2349_v37 = vpop.permute.xlu2 %2348 }
 0x1aa   : > { %v1324_v19 = vpop.permute.xlu0 %1323 }
 0x1ab   : > { %v2510_v40 = vsel %vm2494_vm12, %v7746_v50, %v1324_v19  ;;  %v8030_v63 = vpop.f32.mrf.mxu2 }
 0x1ac   : > { %v2543_v43 = vsel %vm2527_vm13, %v2510_v40, %v1453_v31 }
 0x1ad   : > { %v1565_v38 = vpop.permute.xlu1 %1564  ;;  %v8024_v18 = vpop.f32.mrf.mxu0 }
 0x1ae   : > { %v2576_v25 = vsel %vm2560_vm14, %v2543_v43, %v1565_v38  ;;  %v1467_v53 = vpop.permute.xlu2 %1466  ;;  %v2998_v43 = vmul.f32 %v7998_v20, %v7998_v20 }
 0x1af   : > { %v2609_v13 = vsel %vm2593_vm15, %v2576_v25, %v1837_v62  ;;  %v2997_v25 = vmul.f32 %v7992_v58, %v7992_v58 }
 0x1b2   : > { %v2489_v51 = vpop.permute.xlu0 %2488 }
 0x1b3   : > { %v2753_v39 = vsel %vm10154_vm5, %v2720_v48, %v2489_v51  ;;  %v8034_v38 = vpop.f32.mrf.mxu2 }
 0x1b4   : > { %6191 = vmatmul.msk.bf16.gmra.mxu2 %vm10153_vm11, %v2753_v39 }
 0x1b5   : > { %v2077_v47 = vpop.permute.xlu1 %2076  ;;  %v8028_v19 = vpop.f32.mrf.mxu0 }
 0x1b6   : > { %v1979_v7 = vpop.permute.xlu2 %1978 }
 0x1ba   : > { %v1965_v29 = vpop.permute.xlu0 %1964 }
 0x1bb   : > { %v2642_v24 = vsel %vm2626_vm0, %v2609_v13, %v1965_v29  ;;  %v8038_v61 = vpop.f32.mrf.mxu2  ;;  %v2921_v29 = vsel %vm2494_vm12, %v7998_v20, 0.0  ;;  %v2999_v13 = vmul.f32 %v8006_v11, %v8006_v11 }
 0x1bc   : > { %v2675_v6 = vsel %vm2659_vm1, %v2642_v24, %v2077_v47  ;;  %v2920_v24 = vsel %vm2494_vm12, %v7992_v58, 0.0 }
 0x1bd   : > { %v1338_v52 = vpop.permute.xlu1 %1337  ;;  %v2708_v50 = vsel %vm2692_vm4, %v2675_v6, %v2349_v37  ;;  %v8032_v62 = vpop.f32.mrf.mxu0  ;;  %v3000_v6 = vmul.f32 %v8012_v3, %v8012_v3 }
 0x1be   : > { %v2524_v57 = vsel %vm2494_vm12, %v6659_v36, %v1338_v52  ;;  %v2491_v23 = vpop.permute.xlu2 %2490  ;;  %v3030_v52 = vsel %vm2494_vm12, %v2998_v43, 0.0  ;;  %v2925_v36 = vsel %vm2494_vm12, %v8012_v3, 0.0 }
 0x1bf   : > { %v2557_v12 = vsel %vm2527_vm13, %v2524_v57, %v1467_v53  ;;  %v2923_v53 = vsel %vm2494_vm12, %v8006_v11, 0.0  ;;  %v3001_v57 = vmul.f32 %v8017_v17, %v8017_v17 }
 0x1c2   : > { %v2477_v30 = vpop.permute.xlu0 %2476 }
 0x1c3   : > { %v2741_v46 = vsel %vm10154_vm5, %v2708_v50, %v2477_v30  ;;  %v8042_v51 = vpop.f32.mrf.mxu2  ;;  %v2922_v50 = vadd.f32 %v2921_v29, %v2920_v24 }
 0x1c4   : > { %6185 = vmatmul.msk.bf16.gmra.mxu0 %vm10153_vm11, %v2741_v46  ;;  %v3029_v46 = vsel %vm2494_vm12, %v2997_v25, 0.0 }
 0x1c5   : > { %v1851_v49 = vpop.permute.xlu1 %1850  ;;  %v8036_v54 = vpop.f32.mrf.mxu0 }
 0x1c6   : > { %v1581_v15 = vpop.permute.xlu2 %1580 }
 0x1ca   : > { %v1579_v45 = vpop.permute.xlu0 %1578 }
 0x1cb   : > { %v2590_v41 = vsel %vm2560_vm14, %v2557_v12, %v1579_v45  ;;  %v8046_v40 = vpop.f32.mrf.mxu2  ;;  %v2924_v45 = vadd.f32 %v2923_v53, %v2922_v50  ;;  %v3034_v12 = vsel %vm2494_vm12, %v3000_v6, 0.0 }
 0x1cc   : > { %v2623_v34 = vsel %vm2593_vm15, %v2590_v41, %v1851_v49  ;;  %v3032_v49 = vsel %vm2494_vm12, %v2999_v13, 0.0  ;;  %v2927_v41 = vsel %vm2494_vm12, %v8017_v17, 0.0 }
 0x1cd   : > { %v2363_v14 = vpop.permute.xlu1 %2362  ;;  %v2656_v9 = vsel %vm2626_vm0, %v2623_v34, %v1979_v7  ;;  %v8040_v48 = vpop.f32.mrf.mxu0  ;;  %v3031_v7 = vadd.f32 %v3030_v52, %v3029_v46 }
 0x1ce   : > { %v2093_v35 = vpop.permute.xlu2 %2092  ;;  %v2937_v13 = vsel %vm2494_vm12, %v8040_v48, 0.0 }
 0x1d2   : > { %v2091_v8 = vpop.permute.xlu0 %2090 }
 0x1d3   : > { %v2689_v5 = vsel %vm2659_vm1, %v2656_v9, %v2091_v8  ;;  %v3033_v9 = vadd.f32 %v3032_v49, %v3031_v7  ;;  %v2926_v8 = vadd.f32 %v2925_v36, %v2924_v45 }
 0x1d4   : > { %v2722_v42 = vsel %vm2692_vm4, %v2689_v5, %v2363_v14  ;;  %v3002_v14 = vmul.f32 %v8024_v18, %v8024_v18  ;;  %v2929_v5 = vsel %vm2494_vm12, %v8024_v18, 0.0 }
 0x1d5   : > { %v2755_v28 = vsel %vm10154_vm5, %v2722_v42, %v2491_v23  ;;  %v1469_v21 = vpop.permute.xlu1 %1468  ;;  %v3036_v23 = vsel %vm2494_vm12, %v3001_v57, 0.0  ;;  %v3003_v42 = vmul.f32 %v8028_v19, %v8028_v19 }
 0x1d6   : > { %6192 = vmatmul.msk.bf16.gmra.mxu2 %vm10153_vm11, %v2755_v28  ;;  %v3035_v28 = vadd.f32 %v3034_v12, %v3033_v9 }
 0x1da   : > { %v1340_v26 = vpop.permute.xlu0 %1339  ;;  %v8050_v47 = vpop.f32.mrf.mxu2 }
 0x1db   : > { %v2526_v56 = vsel %vm2494_vm12, %v7887_v10, %v1340_v26  ;;  %v3038_v26 = vsel %vm2494_vm12, %v3002_v14, 0.0 }
 0x1dc   : > { %v2559_v2 = vsel %vm2527_vm13, %v2526_v56, %v1469_v21  ;;  %v2928_v21 = vadd.f32 %v2927_v41, %v2926_v8  ;;  %v2931_v56 = vsel %vm2494_vm12, %v8028_v19, 0.0 }
 0x1dd   : > { %v1981_v22 = vpop.permute.xlu1 %1980  ;;  %v2592_v33 = vsel %vm2560_vm14, %v2559_v2, %v1581_v15  ;;  %v3004_v15 = vmul.f32 %v8032_v62, %v8032_v62 }
 0x1de   : > { %v2930_v2 = vadd.f32 %v2929_v5, %v2928_v21 }
 0x1e2   : > { %v1853_v1 = vpop.permute.xlu0 %1852  ;;  %v8080_v34 = vpop.f32.mrf.mxu2 }
 0x1e3   : > { %v2625_v44 = vsel %vm2593_vm15, %v2592_v33, %v1853_v1  ;;  %v3040_v1 = vsel %vm2494_vm12, %v3003_v42, 0.0  ;;  %v2933_v33 = vsel %vm2494_vm12, %v8032_v62, 0.0 }
 0x1e4   : > { %v2658_v16 = vsel %vm2626_vm0, %v2625_v44, %v1981_v22  ;;  %v3037_v22 = vadd.f32 %v3036_v23, %v3035_v28  ;;  %v3005_v44 = vmul.f32 %v8036_v54, %v8036_v54 }
 0x1e5   : > { %v2493_v4 = vpop.permute.xlu1 %2492  ;;  %v2691_v31 = vsel %vm2659_vm1, %v2658_v16, %v2093_v35  ;;  %v2932_v35 = vadd.f32 %v2931_v56, %v2930_v2 }
 0x1e6   : > { %v3039_v16 = vadd.f32 %v3038_v26, %v3037_v22  ;;  %v3044_v29 = vsel %vm2494_vm12, %v3005_v44, 0.0 }
 0x1e7   : > { %v2934_v25 = vadd.f32 %v2933_v33, %v2932_v35 }
 0x1e8   : > { %v3041_v43 = vadd.f32 %v3040_v1, %v3039_v16 }
 0x1ea   : > { %v2365_v10 = vpop.permute.xlu0 %2364  ;;  %v8044_v39 = vpop.f32.mrf.mxu0 }
 0x1eb   : > { %v2724_v55 = vsel %vm2692_vm4, %v2691_v31, %v2365_v10  ;;  %v3042_v31 = vsel %vm2494_vm12, %v3004_v15, 0.0  ;;  %v2935_v10 = vsel %vm2494_vm12, %v8036_v54, 0.0  ;;  %v3007_v24 = vmul.f32 %v8044_v39, %v8044_v39 }
 0x1ec   : > { %v2757_v59 = vsel %vm10154_vm5, %v2724_v55, %v2493_v4  ;;  %v3006_v55 = vmul.f32 %v8040_v48, %v8040_v48  ;;  %v3043_v52 = vadd.f32 %v3042_v31, %v3041_v43  ;;  %v2936_v53 = vadd.f32 %v2935_v10, %v2934_v25 }
 0x1ed   : > { %6193 = vmatmul.msk.bf16.gmra.mxu2 %vm10153_vm11, %v2757_v59  ;;  %v2939_v50 = vsel %vm2494_vm12, %v8044_v39, 0.0  ;;  %v3048_v57 = vsel %vm2494_vm12, %v3007_v24, 0.0  ;;  %v2951_v24 = vsel %vm2494_vm12, %v8026_v60, 0.0 }
 0x1ee   : > { %v3046_v6 = vsel %vm2494_vm12, %v3006_v55, 0.0  ;;  %v3045_v49 = vadd.f32 %v3044_v29, %v3043_v52  ;;  %v2938_v36 = vadd.f32 %v2937_v13, %v2936_v53  ;;  %v3013_v55 = vmul.f32 %v8026_v60, %v8026_v60 }
 0x1ef   : > { %v3014_v52 = vmul.f32 %v8030_v63, %v8030_v63 }
 0x1f0   : > { %v3047_v12 = vadd.f32 %v3046_v6, %v3045_v49  ;;  %v2940_v41 = vadd.f32 %v2939_v50, %v2938_v36  ;;  %v3060_v49 = vsel %vm2494_vm12, %v3013_v55, 0.0  ;;  %v2953_v36 = vsel %vm2494_vm12, %v8030_v63, 0.0 }
 0x1f2   : > { %v8048_v37 = vpop.f32.mrf.mxu0  ;;  %v3049_v5 = vadd.f32 %v3048_v57, %v3047_v12  ;;  %v3015_v57 = vmul.f32 %v8034_v38, %v8034_v38  ;;  %v3062_v12 = vsel %vm2494_vm12, %v3014_v52, 0.0 }
 0x1f3   : > { %v3008_v46 = vmul.f32 %v8048_v37, %v8048_v37  ;;  %v2941_v7 = vsel %vm2494_vm12, %v8048_v37, 0.0 }
 0x1f4   : > { %v2942_v42 = vadd.f32 %v2941_v7, %v2940_v41  ;;  %v2955_v41 = vsel %vm2494_vm12, %v8034_v38, 0.0 }
 0x1f5   : > { %v3050_v9 = vsel %vm2494_vm12, %v3008_v46, 0.0 }
 0x1f6   : > { %v3051_v15 = vadd.f32 %v3050_v9, %v3049_v5  ;;  %v3016_v9 = vmul.f32 %v8038_v61, %v8038_v61  ;;  %v3064_v5 = vsel %vm2494_vm12, %v3015_v57, 0.0 }
 0x208   : > { %v8104_v59 = vpop.f32.mrf.mxu2 }
 0x210   : > { %v8128_v28 = vpop.f32.mrf.mxu2 }
 0x213   : > { %v8067_v30 = vpop.f32.mrf.mxu0 }
 0x214   : > { %v3009_v45 = vmul.f32 %v8067_v30, %v8067_v30  ;;  %v2943_v8 = vsel %vm2494_vm12, %v8067_v30, 0.0 }
 0x215   : > { %v2944_v22 = vadd.f32 %v2943_v8, %v2942_v42  ;;  %v2957_v42 = vsel %vm2494_vm12, %v8038_v61, 0.0 }
 0x216   : > { %v3052_v21 = vsel %vm2494_vm12, %v3009_v45, 0.0 }
 0x217   : > { %v3053_v33 = vadd.f32 %v3052_v21, %v3051_v15  ;;  %v3017_v21 = vmul.f32 %v8042_v51, %v8042_v51  ;;  %v3066_v15 = vsel %vm2494_vm12, %v3016_v9, 0.0 }
 0x21b   : > { %v8097_v4 = vpop.f32.mrf.mxu0 }
 0x21c   : > { %v3010_v23 = vmul.f32 %v8097_v4, %v8097_v4  ;;  %v2945_v26 = vsel %vm2494_vm12, %v8097_v4, 0.0 }
 0x21d   : > { %v2946_v44 = vadd.f32 %v2945_v26, %v2944_v22  ;;  %v2959_v22 = vsel %vm2494_vm12, %v8042_v51, 0.0 }
 0x21e   : > { %v3054_v2 = vsel %vm2494_vm12, %v3010_v23, 0.0 }
 0x21f   : > { %v3055_v35 = vadd.f32 %v3054_v2, %v3053_v33  ;;  %v3018_v2 = vmul.f32 %v8046_v40, %v8046_v40 }
 0x237   : > { %v8151_v53 = vpop.f32.mrf.mxu2 }
 0x241   : > { %v8121_v14 = vpop.f32.mrf.mxu0 }
 0x242   : > { %v3011_v56 = vmul.f32 %v8121_v14, %v8121_v14  ;;  %v2947_v1 = vsel %vm2494_vm12, %v8121_v14, 0.0 }
 0x243   : > { %v2948_v31 = vadd.f32 %v2947_v1, %v2946_v44  ;;  %v3068_v44 = vsel %vm2494_vm12, %v3017_v21, 0.0 }
 0x244   : > { %v3056_v16 = vsel %vm2494_vm12, %v3011_v56, 0.0 }
 0x245   : > { %v3057_v29 = vadd.f32 %v3056_v16, %v3055_v35  ;;  %v2961_v16 = vsel %vm2494_vm12, %v8046_v40, 0.0  ;;  %v8177_v35 = vpop.f32.mrf.mxu2 }
 0x249   : > { %v8139_v10 = vpop.f32.mrf.mxu0 }
 0x24a   : > { %v2949_v43 = vsel %vm2494_vm12, %v8139_v10, 0.0  ;;  %v3012_v25 = vmul.f32 %v8139_v10, %v8139_v10 }
 0x24b   : > { %v2950_v13 = vadd.f32 %v2949_v43, %v2948_v31  ;;  %v3019_v31 = vmul.f32 %v8050_v47, %v8050_v47 }
 0x24c   : > { %v3058_v6 = vsel %vm2494_vm12, %v3012_v25, 0.0  ;;  %v3070_v25 = vsel %vm2494_vm12, %v3018_v2, 0.0 }
 0x24d   : > { %v2952_v50 = vadd.f32 %v2951_v24, %v2950_v13  ;;  %v3059_v46 = vadd.f32 %v3058_v6, %v3057_v29  ;;  %v2963_v29 = vsel %vm2494_vm12, %v8050_v47, 0.0  ;;  %v3072_v52 = vsel %vm2494_vm12, %v3019_v31, 0.0 }
 0x24e   : > { %v3020_v6 = vmul.f32 %v8080_v34, %v8080_v34  ;;  %v2973_v31 = vsel %vm2494_vm12, %v8177_v35, 0.0 }
 0x24f   : > { %v2954_v7 = vadd.f32 %v2953_v36, %v2952_v50  ;;  %v3061_v45 = vadd.f32 %v3060_v49, %v3059_v46  ;;  %v2965_v46 = vsel %vm2494_vm12, %v8080_v34, 0.0 }
 0x250   : > { %v3074_v57 = vsel %vm2494_vm12, %v3020_v6, 0.0 }
 0x251   : > { %v2956_v8 = vadd.f32 %v2955_v41, %v2954_v7  ;;  %v3063_v23 = vadd.f32 %v3062_v12, %v3061_v45  ;;  %v3021_v7 = vmul.f32 %v8104_v59, %v8104_v59  ;;  %v2967_v12 = vsel %vm2494_vm12, %v8104_v59, 0.0 }
 0x253   : > { %v2958_v26 = vadd.f32 %v2957_v42, %v2956_v8  ;;  %v3065_v56 = vadd.f32 %v3064_v5, %v3063_v23  ;;  %v3076_v9 = vsel %vm2494_vm12, %v3021_v7, 0.0  ;;  %v3022_v8 = vmul.f32 %v8128_v28, %v8128_v28 }
 0x254   : > { %v2969_v5 = vsel %vm2494_vm12, %v8128_v28, 0.0 }
 0x255   : > { %v2960_v1 = vadd.f32 %v2959_v22, %v2958_v26  ;;  %v3067_v33 = vadd.f32 %v3066_v15, %v3065_v56  ;;  %v3078_v21 = vsel %vm2494_vm12, %v3022_v8, 0.0  ;;  %v3023_v26 = vmul.f32 %v8151_v53, %v8151_v53 }
 0x256   : > { %v2971_v22 = vsel %vm2494_vm12, %v8151_v53, 0.0 }
 0x257   : > { %v2962_v55 = vadd.f32 %v2961_v16, %v2960_v1  ;;  %v3069_v43 = vadd.f32 %v3068_v44, %v3067_v33  ;;  %v3080_v1 = vsel %vm2494_vm12, %v3023_v26, 0.0  ;;  %v3024_v33 = vmul.f32 %v8177_v35, %v8177_v35 }
 0x258   : > { %v6856_v16 = vmov 256.0  }
 0x259   : > { %v3071_v13 = vadd.f32 %v3070_v25, %v3069_v43  ;;  %v2964_v24 = vadd.f32 %v2963_v29, %v2962_v55  ;;  %v8189_v49 = vpop.f32.mrf.mxu2  ;;  %6646 = vrcp.f32 %v6856_v16  ;;  %v3082_v43 = vsel %vm2494_vm12, %v3024_v33, 0.0 }
 0x25a   : > { %v3025_v25 = vmul.f32 %v8189_v49, %v8189_v49 }
 0x25b   : > { %v3073_v50 = vadd.f32 %v3072_v52, %v3071_v13  ;;  %v2966_v36 = vadd.f32 %v2965_v46, %v2964_v24  ;;  %v2975_v24 = vsel %vm2494_vm12, %v8189_v49, 0.0 }
 0x25d   : > { %v3075_v45 = vadd.f32 %v3074_v57, %v3073_v50  ;;  %v2968_v41 = vadd.f32 %v2967_v12, %v2966_v36  ;;  %v3084_v50 = vsel %vm2494_vm12, %v3025_v25, 0.0 }
 0x25f   : > { %v3077_v23 = vadd.f32 %v3076_v9, %v3075_v45  ;;  %v2970_v42 = vadd.f32 %v2969_v5, %v2968_v41  ;;  %v6647_v52 = vpop.eup %6646 }
 0x260   : > { %v2990_v12 = vmul.f32 256.0, %v6647_v52  ;;  %vm2994_vm6 = vweird.f32 %v6647_v52 }
 0x261   : > { %v3079_v56 = vadd.f32 %v3078_v21, %v3077_v23  ;;  %v8204_v15 = vpop.f32.mrf.mxu2  ;;  %v2972_v2 = vadd.f32 %v2971_v22, %v2970_v42 }
 0x262   : > { %v3026_v46 = vmul.f32 %v8204_v15, %v8204_v15  ;;  %v2977_v7 = vsel %vm2494_vm12, %v8204_v15, 0.0  ;;  %v2991_v26 = vsub.f32 1.0, %v2990_v12 }
 0x263   : > { %v3081_v44 = vadd.f32 %v3080_v1, %v3079_v56  ;;  %v2974_v55 = vadd.f32 %v2973_v31, %v2972_v2 }
 0x264   : > { %v3086_v9 = vsel %vm2494_vm12, %v3026_v46, 0.0  ;;  %v2992_v16 = vmul.f32 %v6647_v52, %v2991_v26  ;;  %v6335_v26 = vld [vmem:[#allocation2] sm:$0xff]  }
 0x265   : > { %v3083_v29 = vadd.f32 %v3082_v43, %v3081_v44  ;;  %v2976_v6 = vadd.f32 %v2975_v24, %v2974_v55 }
 0x267   : > { %v3085_v57 = vadd.f32 %v3084_v50, %v3083_v29  ;;  %v2978_v41 = vadd.f32 %v2977_v7, %v2976_v6  ;;  %v2993_v29 = vadd.f32 %v6647_v52, %v2992_v16 }
 0x269   : > { %v3087_v23 = vadd.f32 %v3086_v9, %v3085_v57 }
 0x270   : > { %v8216_v13 = vpop.f32.mrf.mxu2 }
 0x271   : > { %v3027_v36 = vmul.f32 %v8216_v13, %v8216_v13  ;;  %v2979_v45 = vsel %vm2494_vm12, %v8216_v13, 0.0 }
 0x272   : > { %v2980_v5 = vadd.f32 %v2979_v45, %v2978_v41 }
 0x273   : > { %v3088_v8 = vsel %vm2494_vm12, %v3027_v36, 0.0  ;;  %v8238_v36 = vsel %vm2994_vm6, %v6647_v52, %v2993_v29  ;;  %v6547_v52 = vld [vmem:[#allocation2] sm:$0xe] }
 0x274   : > { %v3089_v22 = vadd.f32 %v3088_v8, %v3087_v23  ;;  %10181 = vst [vmem:[#allocation3_spill] sm:$0xff] %v8238_v36 }
 0x278   : > { %v8231_v42 = vpop.f32.mrf.mxu2 }
 0x279   : > { %v2981_v21 = vsel %vm2494_vm12, %v8231_v42, 0.0  ;;  %v3028_v56 = vmul.f32 %v8231_v42, %v8231_v42 }
 0x27a   : > { %v2982_v2 = vadd.f32 %v2981_v21, %v2980_v5  ;;  %v3704_v21 = vld [vmem:[#allocation2 + $0x8] sm:$0x1] }
 0x27b   : > { %v3090_v1 = vsel %vm2494_vm12, %v3028_v56, 0.0  ;;  %v6546_v56 = vld [vmem:[#allocation2] sm:$0xf0] }
 0x27c   : > { %v2983_v33 = vrot.slane %v2982_v2, 4  ;;  %v3091_v44 = vadd.f32 %v3090_v1, %v3089_v22  ;;  %v3960_v1 = vunpack.c.l.b16 %v3704_v21  ;;  %v6548_v16 = vor.u32 %v6547_v52, %v6546_v56 }
 0x27e   : > { %v2984_v31 = vadd.f32 %v2983_v33, %v2982_v2  ;;  %v3092_v55 = vrot.slane %v3091_v44, 4  ;;  %v3993_v33 = vshrl.u32 %v6335_v26, 16 }
 0x280   : > { %v2985_v43 = vrot.slane %v2984_v31, 2  ;;  %v3093_v25 = vadd.f32 %v3092_v55, %v3091_v44  ;;  %v3995_v44 = vshll.u32 %v6335_v26, 16 }
 0x282   : > { %v2986_v24 = vadd.f32 %v2985_v43, %v2984_v31  ;;  %v3094_v6 = vrot.slane %v3093_v25, 2  ;;  %v3976_v31 = vpack.c.b16 %v3960_v1, %v3960_v1  ;;  %v3997_v55 = vrot.slane %v3995_v44, 1 }
 0x283   : > { %v4264_v43 = vrot.slane %v6548_v16, 1 }
 0x284   : > { %v2987_v50 = vrot.slane %v2986_v24, 1  ;;  %v3095_v46 = vadd.f32 %v3094_v6, %v3093_v25  ;;  %v4000_v25 = vshll.u32 %v3976_v31, 16  ;;  %v4265_v29 = vrot.slane %v3976_v31, 1 }
 0x285   : > { %v3998_v6 = vor.u32 %v3997_v55, %v3993_v33 }
 0x286   : > { %v2988_v57 = vadd.f32 %v2987_v50, %v2986_v24  ;;  %v3096_v7 = vrot.slane %v3095_v46, 1 }
 0x288   : > { %v8241_v45 = vmul.f32 %v8238_v36, %v2988_v57  ;;  %v3097_v12 = vadd.f32 %v3096_v7, %v3095_v46  ;;  %v4002_v46 = vrot.slane %v4000_v25, 1  ;;  %v4266_v57 = vsel %vm1389_vm9, %v4264_v43, %v4265_v29 }
 0x289   : > { %4312 = vrot.lane.b32.xlu1 %v4266_v57, %s6850_s20 }
 0x28a   : > { %v3098_v41 = vmul.f32 %v3097_v12, %v8238_v36  ;;  %v3099_v9 = vmul.f32 %v8241_v45, %v8241_v45  ;;  %v3130_v22 = vsub.f32 %v8189_v49, %v8241_v45  ;;  %v3131_v2 = vsub.f32 %v8204_v15, %v8241_v45 }
 0x28b   : > { %v4003_v12 = vsel %vm1116_vm10, %v3998_v6, %v4002_v46  ;;  %v3133_v21 = vsub.f32 %v8231_v42, %v8241_v45  ;;  %v3104_v26 = vsub.f32 %v8006_v11, %v8241_v45  ;;  %v3105_v56 = vsub.f32 %v8012_v3, %v8241_v45 }
 0x28c   : > { %v3100_v8 = vsub.f32 %v3098_v41, %v3099_v9  ;;  %4184 = vrot.lane.b32.xlu2 %v4003_v12, %s6851_s21  ;;  %v3112_v1 = vsub.f32 %v8044_v39, %v8241_v45  ;;  %v3115_v11 = vsub.f32 %v8097_v4, %v8241_v45  ;;  %v3116_v3 = vsub.f32 %v8121_v14, %v8241_v45 }
 0x28d   : > { %v3117_v44 = vsub.f32 %v8139_v10, %v8241_v45  ;;  %v3118_v39 = vsub.f32 %v8026_v60, %v8241_v45  ;;  %v3123_v4 = vsub.f32 %v8046_v40, %v8241_v45  ;;  %v3124_v14 = vsub.f32 %v8050_v47, %v8241_v45 }
 0x28e   : > { %v3101_v23 = vmax.f32 %v3100_v8, 0.0  ;;  %v3125_v10 = vsub.f32 %v8080_v34, %v8241_v45  ;;  %v3126_v60 = vsub.f32 %v8104_v59, %v8241_v45  ;;  %v3128_v46 = vsub.f32 %v8151_v53, %v8241_v45 }
 0x28f   : > { %v3103_v15 = vsub.f32 %v7998_v20, %v8241_v45  ;;  %v3111_v20 = vsub.f32 %v8040_v48, %v8241_v45 }
 0x290   : > { %v3134_v5 = vadd.f32 1e-05, %v3101_v23  ;;  %v3132_v23 = vsub.f32 %v8216_v13, %v8241_v45  ;;  %v3114_v13 = vsub.f32 %v8067_v30, %v8241_v45  ;;  %v3122_v30 = vsub.f32 %v8042_v51, %v8241_v45 }
 0x292   : > { %6648 = vrsqrt.f32 %v3134_v5  ;;  %vm3141_vm11 = vweird.f32 %v3134_v5 }
 0x298   : > { %v6649_v24 = vpop.eup %6648 }
 0x299   : > { %v3136_v50 = vmul.f32 %v6649_v24, %v3134_v5  ;;  %vm3142_vm6 = vweird.f32 %v6649_v24  ;;  %v3113_v5 = vsub.f32 %v8048_v37, %v8241_v45  ;;  %v3119_v37 = vsub.f32 %v8030_v63, %v8241_v45 }
 0x29a   : > { %vm3143_vm5 = vmor %vm3141_vm11, %vm3142_vm6 }
 0x29b   : > { %v3137_v7 = vmul.f32 %v6649_v24, %v3136_v50  ;;  %v3127_v50 = vsub.f32 %v8128_v28, %v8241_v45 }
 0x29d   : > { %v3138_v41 = vmul.f32 0.5, %v3137_v7  ;;  %v3129_v7 = vsub.f32 %v8177_v35, %v8241_v45 }
 0x29f   : > { %v3139_v9 = vsub.f32 1.5, %v3138_v41 }
 0x2a1   : > { %v3140_v8 = vmul.f32 %v6649_v24, %v3139_v9 }
 0x2a3   : > { %v8262_v52 = vsel %vm3143_vm5, %v6649_v24, %v3140_v8 }
 0x2a4   : > { %v3175_v42 = vmul.f32 %v8262_v52, %v3132_v23  ;;  %v3176_v33 = vmul.f32 %v8262_v52, %v3133_v21  ;;  %v8293_v55 = vmul.f32 %v8262_v52, %v3112_v1  ;;  %v8296_v63 = vmul.f32 %v8262_v52, %v3113_v5  ;;  %v3669_v21 = vld [vmem:[#allocation2 + $0xc8] sm:$0x1] }
 0x2a5   : > { %v8299_v25 = vmul.f32 %v8262_v52, %v3114_v13  ;;  %v8302_v40 = vmul.f32 %v8262_v52, %v3115_v11  ;;  %v8305_v47 = vmul.f32 %v8262_v52, %v3116_v3  ;;  %v8308_v34 = vmul.f32 %v8262_v52, %v3117_v44 }
 0x2a6   : > { %v3207_v16 = vmax.f32 %v3175_v42, 0.0  ;;  %v3208_v31 = vmax.f32 %v3176_v33, 0.0  ;;  %v8311_v59 = vmul.f32 %v8262_v52, %v3118_v39  ;;  %v8314_v29 = vmul.f32 %v8262_v52, %v3119_v37 }
 0x2a7   : > { %v8323_v12 = vmul.f32 %v8262_v52, %v3122_v30  ;;  %v8326_v41 = vmul.f32 %v8262_v52, %v3123_v4  ;;  %v8329_v23 = vmul.f32 %v8262_v52, %v3124_v14  ;;  %v8332_v28 = vmul.f32 %v8262_v52, %v3125_v10  ;;  %v3665_v4 = vld [vmem:[#allocation2 + $0xc0] sm:$0xf] }
 0x2a8   : > { %v3239_v51 = vpack.c.bf16 %v3207_v16, %v3207_v16  ;;  %v3240_v43 = vpack.c.bf16 %v3208_v31, %v3208_v31  ;;  %v8335_v53 = vmul.f32 %v8262_v52, %v3126_v60  ;;  %v8338_v35 = vmul.f32 %v8262_v52, %v3127_v50 }
 0x2a9   : > { %v8341_v1 = vmul.f32 %v8262_v52, %v3128_v46  ;;  %v8344_v5 = vmul.f32 %v8262_v52, %v3129_v7  ;;  %v8350_v11 = vmul.f32 %v8262_v52, %v3130_v22  ;;  %v3147_v3 = vmul.f32 %v8262_v52, %v3104_v26 }
 0x2aa   : > { %v3497_v24 = vshrl.u32 %v3239_v51, 16  ;;  %v3505_v6 = vshrl.u32 %v3240_v43, 16  ;;  %v3508_v57 = vshll.u32 %v3240_v43, 16  ;;  %v8357_v44 = vmul.f32 %v8262_v52, %v3131_v2 }
 0x2ab   : > { %v3148_v30 = vmul.f32 %v8262_v52, %v3105_v56  ;;  %v3500_v49 = vshll.u32 %v3239_v51, 16  ;;  %v3102_v22 = vsub.f32 %v7992_v58, %v8241_v45  ;;  %v3106_v2 = vsub.f32 %v8017_v17, %v8241_v45 }
 0x2ac   : > { %v3499_v9 = vrot.slane %v3497_v24, 7  ;;  %v3507_v8 = vrot.slane %v3505_v6, 7  ;;  %v3107_v26 = vsub.f32 %v8024_v18, %v8241_v45  ;;  %v3108_v16 = vsub.f32 %v8028_v19, %v8241_v45 }
 0x2ad   : > { %v3179_v31 = vmax.f32 %v3147_v3, 0.0  ;;  %v3109_v14 = vsub.f32 %v8032_v62, %v8241_v45  ;;  %v3110_v58 = vsub.f32 %v8036_v54, %v8241_v45  ;;  %v3180_v10 = vmax.f32 %v3148_v30, 0.0  ;;  %v3567_v30 = vld [vmem:[#allocation2 + $0x18] sm:$0xf] }
 0x2ae   : > { %v3503_v13 = vrot.slane %v3499_v9, 4  ;;  %v3510_v42 = vor.u32 %v3508_v57, %v3507_v8  ;;  %v3512_v33 = vrot.slane %v3507_v8, 4  ;;  %v3502_v56 = vor.u32 %v3500_v49, %v3499_v9 }
 0x2af   : > { %v3120_v17 = vsub.f32 %v8034_v38, %v8241_v45  ;;  %v3145_v18 = vmul.f32 %v8262_v52, %v3102_v22  ;;  %v3146_v19 = vmul.f32 %v8262_v52, %v3103_v15  ;;  %v3149_v60 = vmul.f32 %v8262_v52, %v3106_v2 }
 0x2b0   : > { %v3511_v39 = vsel %vm6927_vm7, %v3503_v13, %v3510_v42  ;;  %v3670_v37 = vsel %vm6887_vm3, %v3512_v33, %v3669_v21  ;;  %v3121_v51 = vsub.f32 %v8038_v61, %v8241_v45  ;;  %v3150_v62 = vmul.f32 %v8262_v52, %v3107_v26 }
 0x2b1   : > { %3668 = vst.msk [vmem:[#allocation2 + $0xc4] sm:$0xf] %vm172_vm2, %v3511_v39  ;;  %v3151_v54 = vmul.f32 %v8262_v52, %v3108_v16  ;;  %v3152_v43 = vmul.f32 %v8262_v52, %v3109_v14  ;;  %v3153_v48 = vmul.f32 %v8262_v52, %v3110_v58  ;;  %v3154_v24 = vmul.f32 %v8262_v52, %v3111_v20 }
 0x2b2   : > { %3671 = vst [vmem:[#allocation2 + $0xc8] sm:$0x1] %v3670_v37  ;;  %v3666_v38 = vsel %vm6937_vm8, %v3502_v56, %v3665_v4  ;;  %v3211_v6 = vpack.c.bf16 %v3179_v31, %v3179_v31  ;;  %v8396_v50 = vmul.f32 %v8262_v52, %v3120_v17  ;;  %v8399_v46 = vmul.f32 %v8262_v52, %v3121_v51 }
 0x2b3   : > { %v3212_v61 = vpack.c.bf16 %v3180_v10, %v3180_v10  ;;  %3667 = vst [vmem:[#allocation2 + $0xc0] sm:$0xf] %v3666_v38  ;;  %v3177_v45 = vmax.f32 %v3145_v18, 0.0  ;;  %v3178_v57 = vmax.f32 %v3146_v19, 0.0  ;;  %v3181_v7 = vmax.f32 %v3149_v60, 0.0 }
 0x2b4   : > { %v3259_v9 = vshrl.u32 %v3211_v6, 16  ;;  %v3182_v8 = vmax.f32 %v3150_v62, 0.0  ;;  %v3183_v21 = vmax.f32 %v3151_v54, 0.0  ;;  %v3184_v13 = vmax.f32 %v3152_v43, 0.0 }
 0x2b5   : > { %v3267_v42 = vshrl.u32 %v3212_v61, 16  ;;  %v3185_v33 = vmax.f32 %v3153_v48, 0.0  ;;  %v3186_v3 = vmax.f32 %v3154_v24, 0.0  ;;  %v3262_v37 = vshll.u32 %v3211_v6, 16 }
 0x2b6   : > { %v3261_v39 = vrot.slane %v3259_v9, 7  ;;  %v3187_v49 = vmax.f32 %v8293_v55, 0.0  ;;  %v3188_v52 = vmax.f32 %v8296_v63, 0.0  ;;  %v3270_v15 = vshll.u32 %v3212_v61, 16 }
 0x2b7   : > { %v8403_v22 = vrot.slane %v3267_v42, 7  ;;  %v3189_v2 = vmax.f32 %v8299_v25, 0.0  ;;  %v3190_v26 = vmax.f32 %v8302_v40, 0.0  ;;  %v3191_v31 = vmax.f32 %v8305_v47, 0.0 }
 0x2b8   : > { %v3264_v16 = vor.u32 %v3262_v37, %v3261_v39  ;;  %v3265_v56 = vrot.slane %v3261_v39, 4  ;;  %v3192_v4 = vmax.f32 %v8308_v34, 0.0  ;;  %v3193_v14 = vmax.f32 %v8311_v59, 0.0 }
 0x2b9   : > { %v3272_v58 = vor.u32 %v3270_v15, %v8403_v22  ;;  %v3194_v55 = vmax.f32 %v8314_v29, 0.0  ;;  %v3195_v63 = vmax.f32 %v8396_v50, 0.0  ;;  %v3196_v20 = vmax.f32 %v8399_v46, 0.0 }
 0x2ba   : > { %v3568_v25 = vsel %vm6937_vm8, %v3264_v16, %v3567_v30  ;;  %v3197_v40 = vmax.f32 %v8323_v12, 0.0  ;;  %v3198_v10 = vmax.f32 %v8326_v41, 0.0  ;;  %v3199_v47 = vmax.f32 %v8329_v23, 0.0 }
 0x2bb   : > { %v3273_v34 = vsel %vm6927_vm7, %v3265_v56, %v3272_v58  ;;  %3569 = vst [vmem:[#allocation2 + $0x18] sm:$0xf] %v3568_v25  ;;  %v3200_v59 = vmax.f32 %v8332_v28, 0.0  ;;  %v3201_v29 = vmax.f32 %v8335_v53, 0.0  ;;  %v3202_v17 = vmax.f32 %v8338_v35, 0.0 }
 0x2bc   : > { %v3203_v18 = vmax.f32 %v8341_v1, 0.0  ;;  %3570 = vst.msk [vmem:[#allocation2 + $0x1c] sm:$0xf] %vm172_vm2, %v3273_v34  ;;  %v3204_v12 = vmax.f32 %v8344_v5, 0.0  ;;  %v3205_v41 = vmax.f32 %v8350_v11, 0.0  ;;  %v3206_v23 = vmax.f32 %v8357_v44, 0.0 }
 0x2bd   : > { %v8429_v19 = vpack.c.bf16 %v3177_v45, %v3177_v45  ;;  %v8431_v60 = vpack.c.bf16 %v3178_v57, %v3178_v57  ;;  %v8433_v51 = vpack.c.bf16 %v3181_v7, %v3181_v7  ;;  %v8435_v28 = vpack.c.bf16 %v3182_v8, %v3182_v8 }
 0x2be   : > { %v8437_v53 = vpack.c.bf16 %v3183_v21, %v3183_v21  ;;  %v8439_v35 = vpack.c.bf16 %v3184_v13, %v3184_v13  ;;  %v8441_v1 = vpack.c.bf16 %v3185_v33, %v3185_v33  ;;  %v8443_v62 = vpack.c.bf16 %v3186_v3, %v3186_v3 }
 0x2bf   : > { %v8445_v5 = vpack.c.bf16 %v3187_v49, %v3187_v49  ;;  %v8447_v11 = vpack.c.bf16 %v3188_v52, %v3188_v52  ;;  %v8449_v44 = vpack.c.bf16 %v3189_v2, %v3189_v2  ;;  %v8451_v54 = vpack.c.bf16 %v3190_v26, %v3190_v26 }
 0x2c0   : > { %v8453_v43 = vpack.c.bf16 %v3191_v31, %v3191_v31  ;;  %v8455_v48 = vpack.c.bf16 %v3192_v4, %v3192_v4  ;;  %v8457_v24 = vpack.c.bf16 %v3193_v14, %v3193_v14  ;;  %v8459_v38 = vpack.c.bf16 %v3194_v55, %v3194_v55  ;;  %v3571_v55 = vld [vmem:[#allocation2 + $0x20] sm:$0x1] }
 0x2c1   : > { %v8461_v6 = vpack.c.bf16 %v3195_v63, %v3195_v63  ;;  %v8463_v50 = vpack.c.bf16 %v3196_v20, %v3196_v20  ;;  %v8465_v46 = vpack.c.bf16 %v3197_v40, %v3197_v40  ;;  %v8467_v61 = vpack.c.bf16 %v3198_v10, %v3198_v10  ;;  %v3623_v10 = vld [vmem:[#allocation2 + $0x78] sm:$0xf] }
 0x2c2   : > { %v8469_v45 = vpack.c.bf16 %v3199_v47, %v3199_v47  ;;  %v8473_v7 = vpack.c.bf16 %v3200_v59, %v3200_v59  ;;  %v8475_v9 = vpack.c.bf16 %v3201_v29, %v3201_v29  ;;  %v8477_v8 = vpack.c.bf16 %v3202_v17, %v3202_v17 }
 0x2c3   : > { %v8471_v57 = vld [vmem:[#allocation2 + $0x18] sm:$0xff]   ;;  %v8479_v21 = vpack.c.bf16 %v3203_v18, %v3203_v18  ;;  %v8483_v13 = vpack.c.bf16 %v3204_v12, %v3204_v12  ;;  %v8485_v42 = vpack.c.bf16 %v3205_v41, %v3205_v41  ;;  %v8487_v33 = vpack.c.bf16 %v3206_v23, %v3206_v23  ;;  %v3564_v41 = vld [vmem:[#allocation2 + $0x14] sm:$0x1] }
 0x2c4   : > { %10182 = vst [vmem:[#allocation4_spill] sm:$0xff] %v8469_v45  ;;  %4936 = vrot.lane.b32.xlu2 %v8471_v57, %s6849_s19  ;;  %4426 = vrot.lane.b32.xlu0 %v8471_v57, %s6848_s18  ;;  %v3274_v3 = vrot.slane %v8403_v22, 4  ;;  %v3242_v39 = vshrl.u32 %v8429_v19, 16  ;;  %v3245_v37 = vshll.u32 %v8429_v19, 16  ;;  %v3250_v30 = vshrl.u32 %v8431_v60, 16 }
 0x2c5   : > { %10183 = vst [vmem:[#allocation5_spill] sm:$0xff] %v8471_v57  ;;  %v3253_v49 = vshll.u32 %v8431_v60, 16  ;;  %v3276_v52 = vshrl.u32 %v8433_v51, 16  ;;  %v3284_v2 = vshrl.u32 %v8435_v28, 16  ;;  %v3293_v16 = vshrl.u32 %v8437_v53, 16 }
 0x2c6   : > { %10184 = vst [vmem:[#allocation6_spill] sm:$0xff] %v8475_v9  ;;  %v3301_v56 = vshrl.u32 %v8439_v35, 16  ;;  %v3318_v58 = vshrl.u32 %v8443_v62, 16  ;;  %v3327_v20 = vshrl.u32 %v8445_v5, 16  ;;  %v3335_v40 = vshrl.u32 %v8447_v11, 16 }
 0x2c7   : > { %10185 = vst [vmem:[#allocation7_spill] sm:$0xff] %v8479_v21  ;;  %v3344_v47 = vshrl.u32 %v8449_v44, 16  ;;  %v3352_v34 = vshrl.u32 %v8451_v54, 16  ;;  %v3361_v29 = vshrl.u32 %v8453_v43, 16  ;;  %v3369_v17 = vshrl.u32 %v8455_v48, 16 }
 0x2c8   : > { %10186 = vst [vmem:[#allocation8_spill] sm:$0xff] %v8485_v42  ;;  %v3378_v12 = vshrl.u32 %v8457_v24, 16  ;;  %v3386_v23 = vshrl.u32 %v8459_v38, 16  ;;  %v3572_v19 = vsel %vm6887_vm3, %v3274_v3, %v3571_v55  ;;  %v3244_v60 = vrot.slane %v3242_v39, 7  ;;  %v6660_v55 = vld [vmem:[#allocation2 + $0xc] sm:$0xf] }
 0x2c9   : > { %v3252_v25 = vrot.slane %v3250_v30, 7  ;;  %v3395_v59 = vshrl.u32 %v8461_v6, 16  ;;  %v3398_v63 = vshll.u32 %v8461_v6, 16  ;;  %v3403_v14 = vshrl.u32 %v8463_v50, 16  ;;  %3573 = vst [vmem:[#allocation2 + $0x20] sm:$0x1] %v3572_v19 }
 0x2ca   : > { %v3247_v18 = vor.u32 %v3245_v37, %v3244_v60  ;;  %v3248_v31 = vrot.slane %v3244_v60, 4  ;;  %v3406_v15 = vshll.u32 %v8463_v50, 16  ;;  %v3412_v4 = vshrl.u32 %v8465_v46, 16  ;;  %v6549_v0 = vld [vmem:[#allocation2 + $0x18] sm:$0xf0] }
 0x2cb   : > { %v3255_v22 = vor.u32 %v3253_v49, %v3252_v25  ;;  %v3257_v26 = vrot.slane %v3252_v25, 4  ;;  %v3420_v3 = vshrl.u32 %v8467_v61, 16  ;;  %v3429_v30 = vshrl.u32 %v8469_v45, 16 }
 0x2cc   : > { %v3561_v37 = vsel %vm6937_vm8, %v3247_v18, %v6660_v55  ;;  %v3437_v50 = vshrl.u32 %v8473_v7, 16  ;;  %v3446_v19 = vshrl.u32 %v8475_v9, 16  ;;  %v3454_v60 = vshrl.u32 %v8477_v8, 16 }
 0x2cd   : > { %v3256_v6 = vsel %vm6927_vm7, %v3248_v31, %v3255_v22  ;;  %v3565_v49 = vsel %vm6887_vm3, %v3257_v26, %v3564_v41  ;;  %3562 = vst [vmem:[#allocation2 + $0xc] sm:$0xf] %v3561_v37  ;;  %v3463_v22 = vshrl.u32 %v8479_v21, 16  ;;  %v3397_v31 = vrot.slane %v3395_v59, 7 }
 0x2ce   : > { %3563 = vst.msk [vmem:[#allocation2 + $0x10] sm:$0xf] %vm172_vm2, %v3256_v6  ;;  %v8544_v18 = vrot.slane %v3403_v14, 7  ;;  %v3471_v26 = vshrl.u32 %v8483_v13, 16  ;;  %v3480_v55 = vshrl.u32 %v8485_v42, 16  ;;  %v3488_v25 = vshrl.u32 %v8487_v33, 16 }
 0x2cf   : > { %3566 = vst [vmem:[#allocation2 + $0x14] sm:$0x1] %v3565_v49  ;;  %v8553_v39 = vrot.slane %v3276_v52, 7  ;;  %v8555_v6 = vrot.slane %v3284_v2, 7  ;;  %v8557_v14 = vrot.slane %v3293_v16, 7  ;;  %v8559_v59 = vrot.slane %v3301_v56, 7 }
 0x2d0   : > { %10187 = vst [vmem:[#allocation9_spill] sm:$0xff] %v8544_v18  ;;  %v3400_v36 = vor.u32 %v3398_v63, %v3397_v31  ;;  %v3401_v41 = vrot.slane %v3397_v31, 4  ;;  %v3408_v57 = vor.u32 %v3406_v15, %v8544_v18  ;;  %v10188_v42 = vshrl.u32 %v8441_v1, 16 }
 0x2d1   : > { %v8566_v21 = vrot.slane %v3318_v58, 7  ;;  %v8568_v37 = vrot.slane %v3327_v20, 7  ;;  %v8570_v52 = vrot.slane %v3335_v40, 7  ;;  %v8572_v2 = vrot.slane %v3344_v47, 7 }
 0x2d2   : > { %v8564_v49 = vrot.slane %v10188_v42, 7  ;;  %v8574_v16 = vrot.slane %v3352_v34, 7  ;;  %v3409_v56 = vsel %vm6927_vm7, %v3401_v41, %v3408_v57  ;;  %v3624_v15 = vsel %vm6937_vm8, %v3400_v36, %v3623_v10 }
 0x2d3   : > { %v8580_v31 = vrot.slane %v3361_v29, 7  ;;  %v8582_v42 = vrot.slane %v3369_v17, 7  ;;  %3625 = vst [vmem:[#allocation2 + $0x78] sm:$0xf] %v3624_v15  ;;  %v8586_v40 = vrot.slane %v3378_v12, 7  ;;  %v8588_v47 = vrot.slane %v3386_v23, 7 }
 0x2d4   : > { %v6832_v63 = vld [vmem:[#allocation2 + $0xc] sm:$0xe]  ;;  %v8590_v34 = vrot.slane %v3412_v4, 7  ;;  %3626 = vst.msk [vmem:[#allocation2 + $0x7c] sm:$0xf] %vm172_vm2, %v3409_v56  ;;  %v8593_v41 = vrot.slane %v3420_v3, 7 }
 0x2d5   : > { %v8584_v58 = vld [vmem:[#allocation2 + $0xc] sm:$0xff]   ;;  %v8595_v36 = vrot.slane %v3429_v30, 7  ;;  %v8597_v10 = vrot.slane %v3437_v50, 7  ;;  %v8599_v17 = vrot.slane %v3446_v19, 7  ;;  %v8601_v15 = vrot.slane %v3454_v60, 7 }
 0x2d6   : > { %10189 = vst [vmem:[#allocation10_spill] sm:$0xff] %v8584_v58  ;;  %v6831_v20 = vld [vmem:[#allocation2 + $0xc] sm:$0xf0]  ;;  %v3768_v57 = vld [vmem:[#allocation2 + $0x14] sm:$0x1]  ;;  %v8603_v12 = vrot.slane %v3463_v22, 7 }
 0x2d7   : > { %10190 = vst [vmem:[#allocation11_spill] sm:$0xff] %v8590_v34  ;;  %v4472_v29 = vunpack.c.l.b16 %v3768_v57  ;;  %v6833_v23 = vor.u32 %v6832_v63, %v6831_v20  ;;  %v8605_v58 = vrot.slane %v3471_v26, 7  ;;  %v8607_v4 = vrot.slane %v3480_v55, 7 }
 0x2d8   : > { %10191 = vst [vmem:[#allocation12_spill] sm:$0xff] %v8595_v36  ;;  %v8609_v56 = vrot.slane %v3488_v25, 7  ;;  %v10196_v30 = vshll.u32 %v8433_v51, 16  ;;  %v3282_v19 = vrot.slane %v8553_v39, 4  ;;  %v10197_v60 = vshll.u32 %v8435_v28, 16 }
 0x2d9   : > { %10192 = vst [vmem:[#allocation13_spill] sm:$0xff] %v8599_v17  ;;  %v8611_v3 = vpack.c.b16 %v4472_v29, %v4472_v29  ;;  %v4776_v63 = vrot.slane %v6833_v23, 1  ;;  %v3291_v26 = vrot.slane %v8555_v6, 4  ;;  %v10198_v25 = vshll.u32 %v8437_v53, 16 }
 0x2da   : > { %10193 = vst [vmem:[#allocation14_spill] sm:$0xff] %v8601_v15  ;;  %v8616_v50 = vor.u32 %v10196_v30, %v8553_v39  ;;  %v3289_v22 = vor.u32 %v10197_v60, %v8555_v6  ;;  %v3299_v20 = vrot.slane %v8557_v14, 4  ;;  %v10199_v51 = vshll.u32 %v8439_v35, 16 }
 0x2db   : > { %10194 = vst [vmem:[#allocation15_spill] sm:$0xff] %v8603_v12  ;;  %v3298_v55 = vor.u32 %v10198_v25, %v8557_v14  ;;  %v4777_v57 = vrot.slane %v8611_v3, 1  ;;  %v3308_v39 = vrot.slane %v8559_v59, 4  ;;  %v10200_v28 = vshll.u32 %v8441_v1, 16  ;;  %v8637_v6 = vld [vmem:[#allocation2 + $0x78] sm:$0xff]  }
 0x2dc   : > { %10195 = vst [vmem:[#allocation16_spill] sm:$0xff] %v8611_v3  ;;  %v3306_v29 = vor.u32 %v10199_v51, %v8559_v59  ;;  %v3316_v53 = vrot.slane %v8564_v49, 4  ;;  %v10201_v14 = vshll.u32 %v8443_v62, 16  ;;  %v3333_v60 = vrot.slane %v8568_v37, 4  ;;  %4952 = vrot.lane.b32.xlu2 %v8637_v6, %s6849_s19  ;;  %v3581_v3 = vld [vmem:[#allocation2 + $0x30] sm:$0xf] }
 0x2dd   : > { %v8635_v23 = vor.u32 %v10200_v28, %v8564_v49  ;;  %v10202_v35 = vshll.u32 %v8447_v11, 16  ;;  %v4778_v59 = vsel %vm1389_vm9, %v4776_v63, %v4777_v57  ;;  %v3350_v1 = vrot.slane %v8572_v2, 4 }
 0x2de   : > { %v3323_v30 = vor.u32 %v10201_v14, %v8566_v21  ;;  %v10203_v49 = vshll.u32 %v8451_v54, 16  ;;  %v3367_v62 = vrot.slane %v8580_v31, 4  ;;  %4824 = vrot.lane.b32.xlu1 %v4778_v59, %s6852_s22  ;;  %v10204_v28 = vshll.u32 %v8455_v48, 16 }
 0x2df   : > { %v3340_v25 = vor.u32 %v10202_v35, %v8570_v52  ;;  %v3384_v14 = vrot.slane %v8586_v40, 4  ;;  %v10205_v63 = vshll.u32 %v8459_v38, 16  ;;  %v3418_v35 = vrot.slane %v8590_v34, 4 }
 0x2e0   : > { %v3357_v51 = vor.u32 %v10203_v49, %v8574_v16  ;;  %v3374_v11 = vor.u32 %v10204_v28, %v8582_v42  ;;  %v10206_v54 = vshll.u32 %v8467_v61, 16  ;;  %v3435_v9 = vrot.slane %v8595_v36, 4 }
 0x2e1   : > { %v3391_v57 = vor.u32 %v10205_v63, %v8588_v47  ;;  %v10207_v59 = vshll.u32 %v8473_v7, 16  ;;  %v3452_v28 = vrot.slane %v8599_v17, 4  ;;  %v10208_v45 = vshll.u32 %v8477_v8, 16 }
 0x2e2   : > { %v3425_v49 = vor.u32 %v10206_v54, %v8593_v41  ;;  %v3469_v63 = vrot.slane %v8603_v12, 4  ;;  %v10209_v34 = vshll.u32 %v8483_v13, 16  ;;  %v3486_v61 = vrot.slane %v8607_v4, 4  ;;  %v3574_v54 = vld [vmem:[#allocation2 + $0x24] sm:$0xf] }
 0x2e3   : > { %v3442_v48 = vor.u32 %v10207_v59, %v8597_v10  ;;  %v3459_v38 = vor.u32 %v10208_v45, %v8601_v15  ;;  %v3325_v36 = vrot.slane %v8566_v21, 4  ;;  %v10210_v7 = vshll.u32 %v8445_v5, 16  ;;  %v3578_v12 = vld [vmem:[#allocation2 + $0x2c] sm:$0x1]  ;;  %v3585_v15 = vld [vmem:[#allocation2 + $0x38] sm:$0x1] }
 0x2e4   : > { %v3476_v18 = vor.u32 %v10209_v34, %v8605_v58  ;;  %v10211_v17 = vshll.u32 %v8487_v33, 16  ;;  %v3307_v45 = vsel %vm6927_vm7, %v3299_v20, %v3306_v29  ;;  %v3582_v13 = vsel %vm6937_vm8, %v3298_v55, %v3581_v3  ;;  %v3595_v55 = vld [vmem:[#allocation2 + $0x48] sm:$0xf]  ;;  %4442 = vrot.lane.b32.xlu2 %v8637_v6, %s6848_s18 }
 0x2e5   : > { %v3332_v59 = vor.u32 %v10210_v7, %v8568_v37  ;;  %3584 = vst.msk [vmem:[#allocation2 + $0x34] sm:$0xf] %vm172_vm2, %v3307_v45  ;;  %v3290_v21 = vsel %vm6927_vm7, %v3282_v19, %v3289_v22  ;;  %v3324_v5 = vsel %vm6927_vm7, %v3316_v53, %v3323_v30  ;;  %v3341_v33 = vsel %vm6927_vm7, %v3333_v60, %v3340_v25  ;;  %v3588_v37 = vld [vmem:[#allocation2 + $0x3c] sm:$0xf]  ;;  %v3592_v22 = vld [vmem:[#allocation2 + $0x44] sm:$0x1] }
 0x2e6   : > { %v3493_v8 = vor.u32 %v10211_v17, %v8609_v56  ;;  %3583 = vst [vmem:[#allocation2 + $0x30] sm:$0xf] %v3582_v13  ;;  %v3358_v34 = vsel %vm6927_vm7, %v3350_v1, %v3357_v51  ;;  %v8702_v17 = vsel %vm6927_vm7, %v3367_v62, %v3374_v11  ;;  %v8706_v3 = vsel %vm6927_vm7, %v3384_v14, %v3391_v57  ;;  %v3599_v60 = vld [vmem:[#allocation2 + $0x50] sm:$0x1]  ;;  %v6595_v11 = vld [vmem:[#allocation2 + $0x18] sm:$0xe] }
 0x2e7   : > { %v8710_v19 = vsel %vm6927_vm7, %v3418_v35, %v3425_v49  ;;  %v8714_v20 = vsel %vm6927_vm7, %v3435_v9, %v3442_v48  ;;  %v8718_v29 = vsel %vm6927_vm7, %v3452_v28, %v3459_v38  ;;  %v8722_v53 = vsel %vm6927_vm7, %v3469_v63, %v3476_v18  ;;  %3577 = vst.msk [vmem:[#allocation2 + $0x28] sm:$0xf] %vm172_vm2, %v3290_v21  ;;  %v3613_v48 = vld [vmem:[#allocation2 + $0x68] sm:$0x1]  ;;  %v3616_v63 = vld [vmem:[#allocation2 + $0x6c] sm:$0xf] }
 0x2e8   : > { %v8726_v30 = vsel %vm6927_vm7, %v3486_v61, %v3493_v8  ;;  %v3347_v25 = vshll.u32 %v8449_v44, 16  ;;  %v3575_v9 = vsel %vm6937_vm8, %v8616_v50, %v3574_v54  ;;  %v3579_v1 = vsel %vm6887_vm3, %v3291_v26, %v3578_v12  ;;  %3591 = vst.msk [vmem:[#allocation2 + $0x40] sm:$0xf] %vm172_vm2, %v3324_v5  ;;  %v6594_v26 = vld [vmem:[#allocation2 + $0x18] sm:$0xf0]  ;;  %v10212_v8 = vld [vmem:[#allocation9_spill] sm:$0xff] }
 0x2e9   : > { %v3586_v18 = vsel %vm6887_vm3, %v3308_v39, %v3585_v15  ;;  %v3342_v51 = vrot.slane %v8570_v52, 4  ;;  %v3589_v62 = vsel %vm6937_vm8, %v8635_v23, %v3588_v37  ;;  %3576 = vst [vmem:[#allocation2 + $0x24] sm:$0xf] %v3575_v9  ;;  %v3364_v44 = vshll.u32 %v8453_v43, 16  ;;  %v3832_v39 = vld [vmem:[#allocation2 + $0x20] sm:$0x1] }
 0x2ea   : > { %v3349_v50 = vor.u32 %v3347_v25, %v8572_v2  ;;  %v3593_v12 = vsel %vm6887_vm3, %v3325_v36, %v3592_v22  ;;  %3580 = vst [vmem:[#allocation2 + $0x2c] sm:$0x1] %v3579_v1  ;;  %v3596_v15 = vsel %vm6937_vm8, %v3332_v59, %v3595_v55  ;;  %v3359_v52 = vrot.slane %v8574_v16, 4  ;;  %v3606_v23 = vld [vmem:[#allocation2 + $0x5c] sm:$0x1]  ;;  %v10214_v22 = vld [vmem:[#allocation4_spill] sm:$0xff] }
 0x2eb   : > { %3587 = vst [vmem:[#allocation2 + $0x38] sm:$0x1] %v3586_v18  ;;  %v3366_v14 = vor.u32 %v3364_v44, %v8580_v31  ;;  %v3600_v2 = vsel %vm6887_vm3, %v3342_v51, %v3599_v60  ;;  %v3609_v36 = vld [vmem:[#allocation2 + $0x60] sm:$0xf]  ;;  %v3381_v57 = vshll.u32 %v8457_v24, 16  ;;  %v4984_v16 = vunpack.c.l.b16 %v3832_v39  ;;  %v10213_v5 = vld [vmem:[#allocation11_spill] sm:$0xff] }
 0x2ec   : > { %3590 = vst [vmem:[#allocation2 + $0x3c] sm:$0xf] %v3589_v62  ;;  %v3603_v35 = vsel %vm6937_vm8, %v3349_v50, %v3602_v27  ;;  %v6596_v49 = vor.u32 %v6595_v11, %v6594_v26  ;;  %v3376_v31 = vrot.slane %v8582_v42, 4  ;;  %v3607_v24 = vsel %vm6887_vm3, %v3359_v52, %v3606_v23  ;;  %v3627_v21 = vld [vmem:[#allocation2 + $0x80] sm:$0x1]  ;;  %v10217_v39 = vld [vmem:[#allocation13_spill] sm:$0xff] }
 0x2ed   : > { %v8750_v43 = vld [vmem:[#allocation2 + $0x30] sm:$0xff]   ;;  %3594 = vst [vmem:[#allocation2 + $0x44] sm:$0x1] %v3593_v12  ;;  %v3383_v28 = vor.u32 %v3381_v57, %v8586_v40  ;;  %v8766_v38 = vpack.c.b16 %v4984_v16, %v4984_v16  ;;  %v3610_v61 = vsel %vm6937_vm8, %v3366_v14, %v3609_v36  ;;  %v3415_v54 = vshll.u32 %v8465_v46, 16  ;;  %v3630_v37 = vld [vmem:[#allocation2 + $0x84] sm:$0xf] }
 0x2ee   : > { %4940 = vrot.lane.b32.xlu0 %v8750_v43, %s6849_s19  ;;  %3597 = vst [vmem:[#allocation2 + $0x48] sm:$0xf] %v3596_v15  ;;  %v3393_v42 = vrot.slane %v8588_v47, 4  ;;  %v5288_v7 = vrot.slane %v6596_v49, 1  ;;  %v3620_v40 = vld [vmem:[#allocation2 + $0x74] sm:$0x1]  ;;  %v3614_v13 = vsel %vm6887_vm3, %v3376_v31, %v3613_v48 }
 0x2ef   : > { %3598 = vst.msk [vmem:[#allocation2 + $0x4c] sm:$0xf] %vm172_vm2, %v3341_v33  ;;  %v5289_v59 = vrot.slane %v8766_v38, 1  ;;  %v3410_v45 = vrot.slane %v10212_v8, 4  ;;  %v3417_v33 = vor.u32 %v3415_v54, %v10213_v5  ;;  %v3617_v46 = vsel %vm6937_vm8, %v3383_v28, %v3616_v63  ;;  %v3634_v25 = vld [vmem:[#allocation2 + $0x8c] sm:$0x1] }
 0x2f0   : > { %3601 = vst [vmem:[#allocation2 + $0x50] sm:$0x1] %v3600_v2  ;;  %v3432_v55 = vshll.u32 %v10214_v22, 16  ;;  %v3621_v60 = vsel %vm6887_vm3, %v3393_v42, %v3620_v40  ;;  %v10215_v9 = vld [vmem:[#allocation12_spill] sm:$0xff]  ;;  %v8795_v51 = vld [vmem:[#allocation2 + $0x24] sm:$0xf0] }
 0x2f1   : > { %3604 = vst [vmem:[#allocation2 + $0x54] sm:$0xf] %v3603_v35  ;;  %v5290_v47 = vsel %vm1389_vm9, %v5288_v7, %v5289_v59  ;;  %v3628_v18 = vsel %vm6887_vm3, %v3410_v45, %v3627_v21  ;;  %v8793_v27 = vld [vmem:[#allocation2 + $0x24] sm:$0xff]   ;;  %v3631_v44 = vsel %vm6937_vm8, %v3417_v33, %v3630_v37  ;;  %v3641_v50 = vld [vmem:[#allocation2 + $0x98] sm:$0x1]  ;;  %v3444_v12 = vrot.slane %v8597_v10, 4 }
 0x2f2   : > { %3605 = vst.msk [vmem:[#allocation2 + $0x58] sm:$0xf] %vm172_vm2, %v3358_v34  ;;  %5336 = vrot.lane.b32.xlu1 %v5290_v47, %s6854_s24  ;;  %v3427_v34 = vrot.slane %v8593_v41, 4  ;;  %v3434_v1 = vor.u32 %v3432_v55, %v10215_v9  ;;  %v10216_v41 = vld [vmem:[#allocation6_spill] sm:$0xff]  ;;  %v3644_v26 = vld [vmem:[#allocation2 + $0x9c] sm:$0xf] }
 0x2f3   : > { %3608 = vst [vmem:[#allocation2 + $0x5c] sm:$0x1] %v3607_v24  ;;  %v3449_v62 = vshll.u32 %v10216_v41, 16  ;;  %v3648_v15 = vld [vmem:[#allocation2 + $0xa4] sm:$0x1]  ;;  %v10218_v23 = vld [vmem:[#allocation7_spill] sm:$0xff]  ;;  %v3642_v63 = vsel %vm6887_vm3, %v3444_v12, %v3641_v50 }
 0x2f4   : > { %3611 = vst [vmem:[#allocation2 + $0x60] sm:$0xf] %v3610_v61  ;;  %v3635_v52 = vsel %vm6887_vm3, %v3427_v34, %v3634_v25  ;;  %v3466_v14 = vshll.u32 %v10218_v23, 16  ;;  %v10219_v2 = vld [vmem:[#allocation14_spill] sm:$0xff]  ;;  %v3651_v35 = vld [vmem:[#allocation2 + $0xa8] sm:$0xf] }
 0x2f5   : > { %3612 = vst.msk [vmem:[#allocation2 + $0x64] sm:$0xf] %vm172_vm2, %v8702_v17  ;;  %v3637_v17 = vld [vmem:[#allocation2 + $0x90] sm:$0xf]  ;;  %v3451_v11 = vor.u32 %v3449_v62, %v10217_v39  ;;  %v3461_v36 = vrot.slane %v10219_v2, 4  ;;  %v8812_v16 = vld [vmem:[#allocation2 + $0x24] sm:$0xff]  }
 0x2f6   : > { %3615 = vst [vmem:[#allocation2 + $0x68] sm:$0x1] %v3614_v13  ;;  %4430 = vrot.lane.b32.xlu0 %v8750_v43, %s6848_s18  ;;  %v3638_v57 = vsel %vm6937_vm8, %v3434_v1, %v3637_v17  ;;  %v8814_v49 = vld [vmem:[#allocation2 + $0x24] sm:$0xf0]  ;;  %v10220_v31 = vld [vmem:[#allocation8_spill] sm:$0xff]  ;;  %v10221_v28 = vld [vmem:[#allocation15_spill] sm:$0xff] }
 0x2f7   : > { %3618 = vst [vmem:[#allocation2 + $0x6c] sm:$0xf] %v3617_v46  ;;  %v3483_v48 = vshll.u32 %v10220_v31, 16  ;;  %v3468_v24 = vor.u32 %v3466_v14, %v10221_v28  ;;  %v8820_v54 = vld [vmem:[#allocation2 + $0x48] sm:$0xff]   ;;  %v3478_v42 = vrot.slane %v8605_v58, 4  ;;  %v3649_v13 = vsel %vm6887_vm3, %v3461_v36, %v3648_v15 }
 0x2f8   : > { %3619 = vst.msk [vmem:[#allocation2 + $0x70] sm:$0xf] %vm172_vm2, %v8706_v3  ;;  %v3655_v8 = vld [vmem:[#allocation2 + $0xb0] sm:$0x1]  ;;  %v3658_v46 = vld [vmem:[#allocation2 + $0xb4] sm:$0xf] }
 0x2f9   : > { %3622 = vst [vmem:[#allocation2 + $0x74] sm:$0x1] %v3621_v60  ;;  %v3485_v45 = vor.u32 %v3483_v48, %v8607_v4  ;;  %v3652_v4 = vsel %vm6937_vm8, %v3468_v24, %v3651_v35  ;;  %v3495_v55 = vrot.slane %v8609_v56, 4  ;;  %v3662_v60 = vld [vmem:[#allocation2 + $0xbc] sm:$0x1]  ;;  %v3656_v25 = vsel %vm6887_vm3, %v3478_v42, %v3655_v8 }
 0x2fa   : > { %3629 = vst [vmem:[#allocation2 + $0x80] sm:$0x1] %v3628_v18  ;;  %v3706_v17 = vld [vmem:[#allocation2 + $0x20] sm:$0x1]  ;;  %v8858_v41 = vld [vmem:[#allocation2 + $0x24] sm:$0xf0] }
 0x2fb   : > { %3632 = vst [vmem:[#allocation2 + $0x84] sm:$0xf] %v3631_v44  ;;  %v6559_v3 = vld [vmem:[#allocation2 + $0x60] sm:$0xe]  ;;  %v3659_v9 = vsel %vm6937_vm8, %v3485_v45, %v3658_v46  ;;  %v3663_v32 = vsel %vm6887_vm3, %v3495_v55, %v3662_v60  ;;  %v6550_v12 = vld [vmem:[#allocation2 + $0x18] sm:$0xe] }
 0x2fc   : > { %3633 = vst.msk [vmem:[#allocation2 + $0x88] sm:$0xf] %vm172_vm2, %v8710_v19  ;;  %v6558_v10 = vld [vmem:[#allocation2 + $0x60] sm:$0xf0]  ;;  %v3645_v19 = vsel %vm6937_vm8, %v3451_v11, %v3644_v26  ;;  %v8877_v23 = vld [vmem:[#allocation2 + $0x3c] sm:$0xf0]  ;;  %v6551_v14 = vor.u32 %v6550_v12, %v6549_v0 }
 0x2fd   : > { %3636 = vst [vmem:[#allocation2 + $0x8c] sm:$0x1] %v3635_v52  ;;  %v3712_v61 = vld [vmem:[#allocation2 + $0x68] sm:$0x1]  ;;  %v6560_v59 = vor.u32 %v6559_v3, %v6558_v10  ;;  %v8875_v52 = vld [vmem:[#allocation2 + $0x3c] sm:$0xff]   ;;  %v5043_v8 = vshll.u32 %v8750_v43, 16 }
 0x2fe   : > { %3639 = vst [vmem:[#allocation2 + $0x90] sm:$0xf] %v3638_v57  ;;  %v3968_v7 = vunpack.c.l.b16 %v3712_v61  ;;  %4944 = vrot.lane.b32.xlu0 %v8820_v54, %s6849_s19  ;;  %v6835_v40 = vld [vmem:[#allocation2 + $0x6c] sm:$0xe]  ;;  %v4270_v57 = vrot.slane %v6551_v14, 1  ;;  %v8888_v48 = vld [vmem:[#allocation2 + $0x3c] sm:$0xff]  }
 0x2ff   : > { %3640 = vst.msk [vmem:[#allocation2 + $0x94] sm:$0xf] %vm172_vm2, %v8714_v20  ;;  %v8832_v58 = vld [vmem:[#allocation2 + $0x6c] sm:$0xff]   ;;  %v4288_v20 = vrot.slane %v6560_v59, 1  ;;  %v3708_v3 = vld [vmem:[#allocation2 + $0x38] sm:$0x1] }
 0x300   : > { %v6834_v21 = vld [vmem:[#allocation2 + $0x6c] sm:$0xf0]  ;;  %3643 = vst [vmem:[#allocation2 + $0x98] sm:$0x1] %v3642_v63  ;;  %v8838_v47 = vpack.c.b16 %v3968_v7, %v3968_v7  ;;  %v3776_v37 = vld [vmem:[#allocation2 + $0x74] sm:$0x1]  ;;  %v3964_v63 = vunpack.c.l.b16 %v3708_v3 }
 0x301   : > { %v8834_v5 = vld [vmem:[#allocation2 + $0x6c] sm:$0xff]   ;;  %3646 = vst [vmem:[#allocation2 + $0x9c] sm:$0xf] %v3645_v19  ;;  %v4480_v22 = vunpack.c.l.b16 %v3776_v37  ;;  %v6836_v56 = vor.u32 %v6835_v40, %v6834_v21  ;;  %v3713_v39 = vld [vmem:[#allocation2 + $0x74] sm:$0x1]  ;;  %vm10242_vm3 = vcmask 523264  }
 0x302   : > { %v8836_v33 = vld [vmem:[#allocation2 + $0x6c] sm:$0xf0]  ;;  %3647 = vst.msk [vmem:[#allocation2 + $0xa0] sm:$0xf] %vm172_vm2, %v8718_v29  ;;  %v4289_v34 = vrot.slane %v8838_v47, 1  ;;  %v8856_v29 = vld [vmem:[#allocation2 + $0x24] sm:$0xff]   ;;  %v3969_v36 = vunpack.c.l.b16 %v3713_v39  ;;  %v8902_v40 = vpack.c.b16 %v3964_v63, %v3964_v63  ;;  %vm10244_vm8 = vmmov %vm10242_vm3 }
 0x303   : > { %3650 = vst [vmem:[#allocation2 + $0xa4] sm:$0x1] %v3649_v13  ;;  %v8851_v18 = vpack.c.b16 %v4480_v22, %v4480_v22  ;;  %v4800_v44 = vrot.slane %v6836_v56, 1  ;;  %v6768_v11 = vld [vmem:[#allocation2 + $0x6c] sm:$0xe]  ;;  %v8895_v61 = vld [vmem:[#allocation2 + $0x84] sm:$0xff]   ;;  %vm10246_vm5 = vmmov %vm10242_vm3 }
 0x304   : > { %3653 = vst [vmem:[#allocation2 + $0xa8] sm:$0xf] %v3652_v4  ;;  %v4290_v1 = vsel %vm1389_vm9, %v4288_v20, %v4289_v34  ;;  %v8885_v10 = vpack.c.b16 %v3969_v36, %v3969_v36  ;;  %v6769_v31 = vor.u32 %v6768_v11, %v8836_v33  ;;  %v8890_v28 = vld [vmem:[#allocation2 + $0x3c] sm:$0xf0]  ;;  %v8897_v42 = vld [vmem:[#allocation2 + $0x84] sm:$0xf0] }
 0x305   : > { %3654 = vst.msk [vmem:[#allocation2 + $0xac] sm:$0xf] %vm172_vm2, %v8722_v53  ;;  %4328 = vrot.lane.b32.xlu1 %v4290_v1, %s6850_s20  ;;  %v3962_v53 = vunpack.c.l.b16 %v3706_v17  ;;  %v4801_v50 = vrot.slane %v8851_v18, 1  ;;  %v3777_v24 = vld [vmem:[#allocation2 + $0x80] sm:$0x1]  ;;  %v4048_v4 = vshll.u32 %v8902_v40, 16 }
 0x306   : > { %3657 = vst [vmem:[#allocation2 + $0xb0] sm:$0x1] %v3656_v25  ;;  %v8862_v62 = vld [vmem:[#allocation2 + $0x90] sm:$0xff]   ;;  %4938 = vrot.lane.b32.xlu0 %v8812_v16, %s6849_s19  ;;  %v4291_v19 = vrot.slane %v6769_v31, 1  ;;  %v4292_v7 = vrot.slane %v8885_v10, 1  ;;  %v4481_v59 = vunpack.c.l.b16 %v3777_v24  ;;  %v8912_v55 = vld [vmem:[#allocation2 + $0x84] sm:$0xff]  }
 0x307   : > { %3660 = vst [vmem:[#allocation2 + $0xb4] sm:$0xf] %v3659_v9  ;;  %4956 = vrot.lane.b32.xlu2 %v8862_v62, %s6849_s19  ;;  %v8871_v26 = vpack.c.b16 %v3962_v53, %v3962_v53  ;;  %v4802_v15 = vsel %vm1389_vm9, %v4800_v44, %v4801_v50  ;;  %v6582_v45 = vld [vmem:[#allocation2 + $0x78] sm:$0xf0]  ;;  %v6583_v13 = vld [vmem:[#allocation2 + $0x78] sm:$0xe] }
 0x308   : > { %3661 = vst.msk [vmem:[#allocation2 + $0xb8] sm:$0xf] %vm172_vm2, %v8726_v30  ;;  %v10222_v30 = vld [vmem:[#allocation10_spill] sm:$0xff]  ;;  %v4293_v21 = vsel %vm1389_vm9, %v4291_v19, %v4292_v7  ;;  %v8906_v33 = vpack.c.b16 %v4481_v59, %v4481_v59  ;;  %v3707_v46 = vld [vmem:[#allocation2 + $0x2c] sm:$0x1]  ;;  %v6584_v22 = vor.u32 %v6583_v13, %v6582_v45  ;;  %v5045_v34 = vrot.slane %v5043_v8, 1 }
 0x309   : > { %3664 = vst [vmem:[#allocation2 + $0xbc] sm:$0x1] %v3663_v32  ;;  %v4271_v2 = vrot.slane %v8871_v26, 1  ;;  %v6771_v37 = vld [vmem:[#allocation2 + $0x24] sm:$0xe]  ;;  %v8918_v60 = vld [vmem:[#allocation2 + $0xc] sm:$0xff]   ;;  %v3963_v17 = vunpack.c.l.b16 %v3707_v46 }
 0x30a   : > { %v8914_v20 = vld [vmem:[#allocation2 + $0x84] sm:$0xf0]  ;;  %v6837_v25 = vld [vmem:[#allocation2 + $0xc] sm:$0xf0]  ;;  %v3705_v9 = vld [vmem:[#allocation2 + $0x14] sm:$0x1] }
 0x30b   : > { %v4272_v35 = vsel %vm1389_vm9, %v4270_v57, %v4271_v2  ;;  %v6838_v1 = vld [vmem:[#allocation2 + $0xc] sm:$0xe]  ;;  %v4804_v56 = vrot.slane %v8906_v33, 1  ;;  %v5041_v32 = vshrl.u32 %v8750_v43, 16  ;;  %v4050_v53 = vrot.slane %v4048_v4, 1  ;;  %v6527_v59 = vld [vmem:[#allocation2 + $0x60] sm:$0xff]  }
 0x30c   : > { %v4803_v44 = vrot.slane %v6584_v22, 1  ;;  %v3961_v50 = vunpack.c.l.b16 %v3705_v9  ;;  %v10223_v0 = vld [vmem:[#allocation5_spill] sm:$0xff]  ;;  %v4603_v39 = vshll.u32 %v8832_v58, 16  ;;  %v8927_v14 = vpack.c.b16 %v3963_v17, %v3963_v17  ;;  %v3714_v36 = vld [vmem:[#allocation2 + $0x80] sm:$0x1] }
 0x30d   : > { %4840 = vrot.lane.b32.xlu1 %v4802_v15, %s6852_s22  ;;  %v5019_v12 = vshll.u32 %v10223_v0, 16  ;;  %v8923_v15 = vor.u32 %v5045_v34, %v5041_v32  ;;  %v6772_v2 = vor.u32 %v6771_v37, %v8795_v51  ;;  %v5024_v57 = vshll.u32 %v8766_v38, 16  ;;  %v3769_v63 = vld [vmem:[#allocation2 + $0x20] sm:$0x1]  ;;  %v6561_v22 = vld [vmem:[#allocation2 + $0x78] sm:$0xf0] }
 0x30e   : > { %4428 = vrot.lane.b32.xlu0 %v8856_v29, %s6848_s18  ;;  %v4805_v11 = vsel %vm1389_vm9, %v4803_v44, %v4804_v56  ;;  %v8935_v3 = vpack.c.b16 %v3961_v50, %v3961_v50  ;;  %v4605_v24 = vrot.slane %v4603_v39, 1  ;;  %v4274_v19 = vrot.slane %v8927_v14, 1  ;;  %v3840_v37 = vld [vmem:[#allocation2 + $0x80] sm:$0x1]  ;;  %v6562_v34 = vld [vmem:[#allocation2 + $0x78] sm:$0xe] }
 0x30f   : > { %4424 = vrot.lane.b32.xlu2 %v10222_v30, %s6848_s18  ;;  %v4051_v43 = vsel %vm1116_vm10, %v8923_v15, %v4050_v53  ;;  %v5021_v31 = vrot.slane %v5019_v12, 1  ;;  %v4273_v51 = vrot.slane %v6772_v2, 1  ;;  %v3970_v7 = vunpack.c.l.b16 %v3714_v36  ;;  %v6570_v32 = vld [vmem:[#allocation2 + $0x18] sm:$0xf0]  ;;  %v3778_v44 = vld [vmem:[#allocation2 + $0x8c] sm:$0x1] }
 0x310   : > { %v5017_v8 = vshrl.u32 %v10223_v0, 16  ;;  %v4601_v38 = vshrl.u32 %v8832_v58, 16  ;;  %v5026_v45 = vrot.slane %v5024_v57, 1  ;;  %v4473_v46 = vunpack.c.l.b16 %v3769_v63  ;;  %v6774_v50 = vld [vmem:[#allocation2 + $0x84] sm:$0xe] }
 0x311   : > { %v4275_v56 = vsel %vm1389_vm9, %v4273_v51, %v4274_v19  ;;  %v8947_v17 = vpack.c.b16 %v3970_v7, %v3970_v7  ;;  %v4096_v0 = vshll.u32 %v8838_v47, 16  ;;  %v4992_v12 = vunpack.c.l.b16 %v3840_v37  ;;  %v3833_v57 = vld [vmem:[#allocation2 + $0x2c] sm:$0x1] }
 0x312   : > { %v8943_v4 = vor.u32 %v5021_v31, %v5017_v8  ;;  %v4606_v9 = vor.u32 %v4605_v24, %v4601_v38  ;;  %v8955_v2 = vpack.c.b16 %v4473_v46, %v4473_v46  ;;  %v4482_v24 = vunpack.c.l.b16 %v3778_v44  ;;  %v4185_v44 = vpop.permute.xlu2 %4184 }
 0x313   : > { %v4295_v31 = vrot.slane %v8947_v17, 1  ;;  %v4089_v63 = vshrl.u32 %v6527_v59, 16  ;;  %v4098_v51 = vrot.slane %v4096_v0, 1  ;;  %v8962_v19 = vpack.c.b16 %v4992_v12, %v4992_v12 }
 0x314   : > { %v5027_v53 = vsel %vm1116_vm10, %v8943_v4, %v5026_v45  ;;  %v4780_v8 = vrot.slane %v8955_v2, 1  ;;  %v4985_v38 = vunpack.c.l.b16 %v3833_v57  ;;  %v5115_v45 = vshll.u32 %v8637_v6, 16 }
 0x315   : > { %4316 = vrot.lane.b32.xlu1 %v4272_v35, %s6850_s20  ;;  %v6839_v35 = vor.u32 %v6838_v1, %v6837_v25  ;;  %v4091_v25 = vshll.u32 %v6527_v59, 16  ;;  %v4608_v1 = vshll.u32 %v8851_v18, 16  ;;  %v6563_v18 = vor.u32 %v6562_v34, %v6561_v22 }
 0x316   : > { %4942 = vrot.lane.b32.xlu0 %v8875_v52, %s6849_s19  ;;  %v4498_v37 = vpack.c.b16 %v4482_v24, %v4482_v24  ;;  %v6775_v22 = vor.u32 %v6774_v50, %v8914_v20  ;;  %v5120_v34 = vshll.u32 %v8962_v19, 16  ;;  %v4627_v20 = vshll.u32 %v8912_v55, 16  ;;  %v6661_v24 = vld [vmem:[#allocation2] sm:$0xff]  }
 0x317   : > { %4440 = vrot.lane.b32.xlu2 %v8832_v58, %s6848_s18  ;;  %v4267_v13 = vrot.slane %v6839_v35, 1  ;;  %v6571_v58 = vld [vmem:[#allocation2 + $0x18] sm:$0xe]  ;;  %v4610_v39 = vrot.slane %v4608_v1, 1  ;;  %v4093_v36 = vrot.slane %v4091_v25, 1  ;;  %v4294_v7 = vrot.slane %v6563_v18, 1 }
 0x318   : > { %v6572_v47 = vor.u32 %v6571_v58, %v6570_v32  ;;  %v8974_v1 = vpack.c.b16 %v4985_v38, %v4985_v38  ;;  %v4806_v32 = vrot.slane %v6775_v22, 1  ;;  %v4807_v58 = vrot.slane %v4498_v37, 1 }
 0x319   : > { %v8959_v35 = vsel %vm1116_vm10, %v4606_v9, %v4610_v39  ;;  %v5122_v50 = vrot.slane %v5120_v34, 1  ;;  %v4632_v0 = vshll.u32 %v4498_v37, 16  ;;  %v4625_v39 = vshrl.u32 %v8912_v55, 16  ;;  %v4313_v37 = vpop.permute.xlu1 %4312 }
 0x31a   : > { %v4779_v46 = vrot.slane %v6572_v47, 1  ;;  %v4808_v57 = vsel %vm1389_vm9, %v4806_v32, %v4807_v58  ;;  %v4277_v22 = vrot.slane %v8902_v40, 1  ;;  %v3842_v58 = vld [vmem:[#allocation2 + $0x98] sm:$0x1]  ;;  %vm10234_vm2 = vcmask 1043456  }
 0x31b   : > { %v4634_v47 = vrot.slane %v4632_v0, 1  ;;  %v4120_v0 = vshll.u32 %v8947_v17, 16  ;;  %vm10243_vm7 = vcmask 588800  }
 0x31c   : > { %v4781_v9 = vsel %vm1389_vm9, %v4779_v46, %v4780_v8  ;;  %v4620_v8 = vshll.u32 %v8906_v33, 16  ;;  %v3770_v46 = vld [vmem:[#allocation2 + $0x2c] sm:$0x1]  ;;  %vm10245_vm11 = vmmov %vm10243_vm7 }
 0x31d   : > { %4330 = vrot.lane.b32.xlu1 %v4293_v21, %s6850_s20  ;;  %v4268_v21 = vrot.slane %v8935_v3, 1  ;;  %v4474_v32 = vunpack.c.l.b16 %v3770_v46  ;;  %vm10247_vm6 = vmmov %vm10243_vm7 }
 0x31e   : > { %4432 = vrot.lane.b32.xlu0 %v8888_v48, %s6848_s18  ;;  %v4622_v33 = vrot.slane %v4620_v8, 1 }
 0x31f   : > { %4954 = vrot.lane.b32.xlu2 %v8895_v61, %s6849_s19 }
 0x325   : > { %4842 = vrot.lane.b32.xlu1 %v4805_v11, %s6852_s22  ;;  %v4269_v11 = vsel %vm1389_vm9, %v4267_v13, %v4268_v21  ;;  %v4094_v13 = vor.u32 %v4093_v36, %v4089_v63  ;;  %v4296_v21 = vsel %vm1389_vm9, %v4294_v7, %v4295_v31  ;;  %v6553_v36 = vld [vmem:[#allocation2 + $0x30] sm:$0xe]  ;;  %v6607_v7 = vld [vmem:[#allocation2 + $0x78] sm:$0xe] }
 0x326   : > { %4192 = vrot.lane.b32.xlu0 %v4051_v43, %s6851_s21  ;;  %v6777_v43 = vld [vmem:[#allocation2 + $0x24] sm:$0xe] }
 0x327   : > { %4444 = vrot.lane.b32.xlu2 %v8912_v55, %s6848_s18  ;;  %v4099_v59 = vsel %vm1116_vm10, %v4094_v13, %v4098_v51  ;;  %v6778_v25 = vor.u32 %v6777_v43, %v8814_v49  ;;  %v5292_v49 = vrot.slane %v8974_v1, 1  ;;  %v6552_v43 = vld [vmem:[#allocation2 + $0x30] sm:$0xf0]  ;;  %v6606_v51 = vld [vmem:[#allocation2 + $0x78] sm:$0xf0] }
 0x328   : > { %v6780_v55 = vld [vmem:[#allocation2 + $0x24] sm:$0xe] }
 0x329   : > { %v5291_v12 = vrot.slane %v6778_v25, 1 }
 0x32b   : > { %v5293_v38 = vsel %vm1389_vm9, %v5291_v12, %v5292_v49  ;;  %v4994_v12 = vunpack.c.l.b16 %v3842_v58  ;;  %v6781_v49 = vor.u32 %v6780_v55, %v8858_v41  ;;  %v6597_v55 = vld [vmem:[#allocation2 + $0x30] sm:$0xf0] }
 0x32d   : > { %4318 = vrot.lane.b32.xlu1 %v4275_v56, %s6850_s20  ;;  %v5117_v56 = vrot.slane %v5115_v45, 1  ;;  %v6554_v45 = vor.u32 %v6553_v36, %v6552_v43  ;;  %v3834_v43 = vld [vmem:[#allocation2 + $0x38] sm:$0x1]  ;;  %v4782_v17 = vrot.slane %v6781_v49, 1 }
 0x32e   : > { %5208 = vrot.lane.b32.xlu0 %v5027_v53, %s6855_s25  ;;  %v5113_v53 = vshrl.u32 %v8637_v6, 16  ;;  %v5369_v6 = vsel %vm2494_vm12, %v6661_v24, %v4185_v44  ;;  %v4986_v41 = vunpack.c.l.b16 %v3834_v43 }
 0x32f   : > { %4314 = vrot.lane.b32.xlu2 %v4269_v11, %s6850_s20  ;;  %v4629_v11 = vrot.slane %v4627_v20, 1  ;;  %v8994_v34 = vsel %vm2527_vm13, %v5369_v6, %v4313_v37  ;;  %v4276_v25 = vrot.slane %v6554_v45, 1  ;;  %v8997_v20 = vpop.permute.xlu2 %4936  ;;  %v5139_v6 = vshll.u32 %v8862_v62, 16 }
 0x330   : > { %v5118_v18 = vor.u32 %v5117_v56, %v5113_v53  ;;  %v5002_v46 = vpack.c.b16 %v4986_v41, %v4986_v41 }
 0x331   : > { %v4630_v31 = vor.u32 %v4629_v11, %v4625_v39  ;;  %v4278_v53 = vsel %vm1389_vm9, %v4276_v25, %v4277_v22  ;;  %v9007_v11 = vpack.c.b16 %v4474_v32, %v4474_v32  ;;  %v5141_v37 = vrot.slane %v5139_v6, 1  ;;  %v3841_v22 = vld [vmem:[#allocation2 + $0x8c] sm:$0x1]  ;;  %v3836_v6 = vld [vmem:[#allocation2 + $0x50] sm:$0x1] }
 0x332   : > { %v5123_v63 = vsel %vm1116_vm10, %v5118_v18, %v5122_v50  ;;  %v4024_v50 = vshll.u32 %v8871_v26, 16  ;;  %v4623_v40 = vsel %vm1116_vm10, %v5118_v18, %v4622_v33  ;;  %v5137_v25 = vshrl.u32 %v8862_v62, 16 }
 0x333   : > { %v8989_v13 = vsel %vm1116_vm10, %v4630_v31, %v4634_v47  ;;  %v9010_v31 = vpack.c.b16 %v4994_v12, %v4994_v12  ;;  %v4783_v24 = vrot.slane %v9007_v11, 1  ;;  %v5295_v32 = vrot.slane %v5002_v46, 1 }
 0x334   : > { %v4026_v36 = vrot.slane %v4024_v50, 1  ;;  %v4993_v58 = vunpack.c.l.b16 %v3841_v22  ;;  %v4505_v22 = vshrl.u32 %v10222_v30, 16 }
 0x335   : > { %4332 = vrot.lane.b32.xlu1 %v4296_v21, %s6850_s20  ;;  %v6524_v21 = vld [vmem:[#allocation2 + $0x18] sm:$0xff]   ;;  %v5144_v45 = vshll.u32 %v9010_v31, 16 }
 0x336   : > { %4200 = vrot.lane.b32.xlu0 %v4099_v59, %s6851_s21  ;;  %v6608_v59 = vor.u32 %v6607_v7, %v6606_v51  ;;  %v4019_v56 = vshll.u32 %v6524_v21, 16  ;;  %v4017_v26 = vshrl.u32 %v6524_v21, 16  ;;  %v4524_v51 = vshll.u32 %v8955_v2, 16  ;;  %v6783_v2 = vld [vmem:[#allocation2 + $0x84] sm:$0xe] }
 0x337   : > { %4826 = vrot.lane.b32.xlu2 %v4781_v9, %s6852_s22  ;;  %v5313_v9 = vrot.slane %v8962_v19, 1  ;;  %v9017_v7 = vpop.permute.xlu2 %4952  ;;  %v4784_v21 = vsel %vm1389_vm9, %v4782_v17, %v4783_v24  ;;  %v6784_v43 = vor.u32 %v6783_v2, %v8897_v42  ;;  %v4507_v24 = vshll.u32 %v10222_v30, 16  ;;  %v3835_v2 = vld [vmem:[#allocation2 + $0x44] sm:$0x1] }
 0x338   : > { %v5312_v44 = vrot.slane %v6608_v59, 1  ;;  %v4021_v39 = vrot.slane %v4019_v56, 1  ;;  %v4526_v59 = vrot.slane %v4524_v51, 1  ;;  %v4007_v56 = vshll.u32 %v8918_v60, 16 }
 0x33a   : > { %v5314_v19 = vsel %vm1389_vm9, %v5312_v44, %v5313_v9  ;;  %v4022_v47 = vor.u32 %v4021_v39, %v4017_v26  ;;  %v5146_v9 = vrot.slane %v5144_v45, 1  ;;  %v4527_v44 = vsel %vm1116_vm10, %v8943_v4, %v4526_v59  ;;  %v9038_v26 = vpop.permute.xlu0 %4426  ;;  %v6786_v59 = vld [vmem:[#allocation2 + $0x3c] sm:$0xe] }
 0x33b   : > { %v4009_v49 = vrot.slane %v4007_v56, 1  ;;  %v9035_v39 = vpack.c.b16 %v4993_v58, %v4993_v58  ;;  %v4509_v45 = vrot.slane %v4507_v24, 1 }
 0x33d   : > { %4844 = vrot.lane.b32.xlu1 %v4808_v57, %s6852_s22  ;;  %v4122_v57 = vrot.slane %v4120_v0, 1  ;;  %v5316_v51 = vrot.slane %v9035_v39, 1 }
 0x33e   : > { %5224 = vrot.lane.b32.xlu0 %v5123_v63, %s6855_s25  ;;  %v4027_v63 = vsel %vm1116_vm10, %v4022_v47, %v4026_v36  ;;  %v4005_v36 = vshrl.u32 %v8918_v60, 16 }
 0x33f   : > { %5338 = vrot.lane.b32.xlu2 %v5293_v38, %s6854_s24  ;;  %v4123_v8 = vsel %vm1116_vm10, %v5118_v18, %v4122_v57  ;;  %v6598_v38 = vld [vmem:[#allocation2 + $0x30] sm:$0xe]  ;;  %v3771_v18 = vld [vmem:[#allocation2 + $0x38] sm:$0x1]  ;;  %v9041_v4 = vpop.permute.xlu2 %4442  ;;  %v4012_v57 = vshll.u32 %v8935_v3, 16 }
 0x340   : > { %v6599_v33 = vor.u32 %v6598_v38, %v6597_v55  ;;  %v4475_v0 = vunpack.c.l.b16 %v3771_v18  ;;  %v4010_v41 = vor.u32 %v4009_v49, %v4005_v36  ;;  %v4988_v38 = vunpack.c.l.b16 %v3836_v6  ;;  %v6574_v3 = vld [vmem:[#allocation2 + $0x30] sm:$0xe] }
 0x341   : > { %v4014_v42 = vrot.slane %v4012_v57, 1 }
 0x342   : > { %v5294_v50 = vrot.slane %v6599_v33, 1  ;;  %v4491_v17 = vpack.c.b16 %v4475_v0, %v4475_v0  ;;  %v10224_v33 = vld [vmem:[#allocation16_spill] sm:$0xff]  ;;  %v4987_v0 = vunpack.c.l.b16 %v3835_v2 }
 0x344   : > { %v4548_v55 = vshll.u32 %v4491_v17, 16  ;;  %v9071_v24 = vpack.c.b16 %v4987_v0, %v4987_v0  ;;  %v5127_v0 = vshll.u32 %v8895_v61, 16 }
 0x345   : > { %4320 = vrot.lane.b32.xlu1 %v4278_v53, %s6850_s20  ;;  %v9026_v53 = vor.u32 %v5141_v37, %v5137_v25  ;;  %v4512_v25 = vshll.u32 %v10224_v33, 16  ;;  %v6789_v33 = vld [vmem:[#allocation2 + $0x3c] sm:$0xe] }
 0x346   : > { %4714 = vrot.lane.b32.xlu0 %v4623_v40, %s6853_s23  ;;  %v5048_v40 = vshll.u32 %v5002_v46, 16  ;;  %v4015_v46 = vsel %vm1116_vm10, %v4010_v41, %v4014_v42  ;;  %v5031_v41 = vshll.u32 %v8812_v16, 16  ;;  %v4103_v42 = vshll.u32 %v8834_v5, 16 }
 0x347   : > { %5352 = vrot.lane.b32.xlu2 %v5314_v19, %s6854_s24  ;;  %v5147_v12 = vsel %vm1116_vm10, %v9026_v53, %v5146_v9  ;;  %v5296_v19 = vsel %vm1389_vm9, %v5294_v50, %v5295_v32  ;;  %v4550_v9 = vrot.slane %v4548_v55, 1  ;;  %v9058_v32 = vpack.c.b16 %v4988_v38, %v4988_v38 }
 0x348   : > { %v5050_v47 = vrot.slane %v5048_v40, 1  ;;  %v5067_v50 = vshll.u32 %v8820_v54, 16  ;;  %v4786_v40 = vrot.slane %v4491_v17, 1  ;;  %v6787_v17 = vor.u32 %v6786_v59, %v8877_v23  ;;  %v3772_v59 = vld [vmem:[#allocation2 + $0x44] sm:$0x1] }
 0x349   : > { %v4551_v49 = vsel %vm1116_vm10, %v8923_v15, %v4550_v9  ;;  %v5298_v38 = vrot.slane %v9071_v24, 1  ;;  %v4108_v9 = vshll.u32 %v8885_v10, 16 }
 0x34a   : > { %v5069_v57 = vrot.slane %v5067_v50, 1  ;;  %v5297_v23 = vrot.slane %v6787_v17, 1  ;;  %v5129_v17 = vrot.slane %v5127_v0, 1 }
 0x34c   : > { %v5299_v2 = vsel %vm1389_vm9, %v5297_v23, %v5298_v38  ;;  %v5132_v23 = vshll.u32 %v9035_v39, 16  ;;  %v6601_v39 = vld [vmem:[#allocation2 + $0x48] sm:$0xe] }
 0x34d   : > { %4188 = vrot.lane.b32.xlu1 %v4027_v63, %s6851_s21  ;;  %v5315_v63 = vrot.slane %v6784_v43, 1  ;;  %v5072_v43 = vshll.u32 %v9058_v32, 16 }
 0x34e   : > { %4204 = vrot.lane.b32.xlu0 %v4123_v8, %s6851_s21  ;;  %v5051_v8 = vsel %vm1116_vm10, %v8923_v15, %v5050_v47  ;;  %v5065_v15 = vshrl.u32 %v8820_v54, 16 }
 0x34f   : > { %4828 = vrot.lane.b32.xlu2 %v4784_v21, %s6852_s22  ;;  %v6573_v21 = vld [vmem:[#allocation2 + $0x30] sm:$0xf0]  ;;  %v5317_v37 = vsel %vm1389_vm9, %v5315_v63, %v5316_v51  ;;  %v5074_v6 = vrot.slane %v5072_v43, 1 }
 0x350   : > { %v6575_v18 = vor.u32 %v6574_v3, %v6573_v21  ;;  %v9063_v30 = vpop.permute.xlu1 %4824  ;;  %v6609_v3 = vld [vmem:[#allocation2 + $0x90] sm:$0xf0] }
 0x355   : > { %4698 = vrot.lane.b32.xlu1 %v4527_v44, %s6853_s23  ;;  %v4510_v44 = vor.u32 %v4509_v45, %v4505_v22  ;;  %v5033_v45 = vrot.slane %v5031_v41, 1  ;;  %v5029_v22 = vshrl.u32 %v8812_v16, 16  ;;  %v4536_v41 = vshll.u32 %v9007_v11, 16 }
 0x356   : > { %5228 = vrot.lane.b32.xlu0 %v5147_v12, %s6855_s25  ;;  %v4514_v12 = vrot.slane %v4512_v25, 1  ;;  %v4101_v25 = vshrl.u32 %v8834_v5, 16 }
 0x357   : > { %5340 = vrot.lane.b32.xlu2 %v5296_v19, %s6854_s24  ;;  %v4785_v19 = vrot.slane %v6575_v18, 1  ;;  %v4531_v18 = vshll.u32 %v8856_v29, 16 }
 0x358   : > { %v4515_v36 = vsel %vm1116_vm10, %v4510_v44, %v4514_v12  ;;  %v5034_v44 = vor.u32 %v5033_v45, %v5029_v22  ;;  %v5319_v12 = vrot.slane %v9010_v31, 1  ;;  %v6790_v31 = vor.u32 %v6789_v33, %v8890_v28 }
 0x359   : > { %v4787_v47 = vsel %vm1389_vm9, %v4785_v19, %v4786_v40  ;;  %v4110_v19 = vrot.slane %v4108_v9, 1  ;;  %v4533_v43 = vrot.slane %v4531_v18, 1  ;;  %v5055_v45 = vshll.u32 %v8875_v52, 16 }
 0x35a   : > { %v5134_v22 = vrot.slane %v5132_v23, 1  ;;  %v5053_v9 = vshrl.u32 %v8875_v52, 16  ;;  %v5060_v18 = vshll.u32 %v9071_v24, 16  ;;  %v5301_v24 = vrot.slane %v9058_v32, 1 }
 0x35b   : > { %v4553_v23 = vshrl.u32 %v8888_v48, 16 }
 0x35c   : > { %v5062_v52 = vrot.slane %v5060_v18, 1 }
 0x35d   : > { %5212 = vrot.lane.b32.xlu1 %v5051_v8, %s6855_s25  ;;  %v5070_v8 = vor.u32 %v5069_v57, %v5065_v15  ;;  %v4529_v57 = vshrl.u32 %v8856_v29, 16 }
 0x35e   : > { %4186 = vrot.lane.b32.xlu0 %v4015_v46, %s6851_s21  ;;  %v6610_v46 = vld [vmem:[#allocation2 + $0x90] sm:$0xe] }
 0x35f   : > { %5354 = vrot.lane.b32.xlu2 %v5317_v37, %s6854_s24  ;;  %v5075_v21 = vsel %vm1116_vm10, %v5070_v8, %v5074_v6  ;;  %v4105_v37 = vrot.slane %v4103_v42, 1  ;;  %v6611_v50 = vor.u32 %v6610_v46, %v6609_v3  ;;  %v9117_v42 = vld [vmem:[#allocation2 + $0x84] sm:$0xf0]  ;;  %v5125_v8 = vshrl.u32 %v8895_v61, 16  ;;  %v6600_v61 = vld [vmem:[#allocation2 + $0x48] sm:$0xf0] }
 0x360   : > { %v9056_v56 = vpop.permute.xlu0 %4940  ;;  %v4534_v38 = vor.u32 %v4533_v43, %v4529_v57  ;;  %v4538_v3 = vrot.slane %v4536_v41, 1  ;;  %v4788_v46 = vrot.slane %v6790_v31, 1  ;;  %v6602_v0 = vor.u32 %v6601_v39, %v6600_v61 }
 0x361   : > { %v9060_v58 = vpop.permute.xlu2 %4956  ;;  %v5318_v10 = vrot.slane %v6611_v50, 1  ;;  %v4031_v43 = vshll.u32 %v8793_v27, 16 }
 0x362   : > { %10225 = vst [vmem:[#allocation9_spill] sm:$0xff] %v9060_v58  ;;  %v6613_v58 = vld [vmem:[#allocation2 + $0xa8] sm:$0xe] }
 0x363   : > { %v5320_v15 = vsel %vm1389_vm9, %v5318_v10, %v5319_v12  ;;  %v4555_v12 = vshll.u32 %v8888_v48, 16  ;;  %v4033_v32 = vrot.slane %v4031_v43, 1  ;;  %v4029_v48 = vshrl.u32 %v8793_v27, 16 }
 0x364   : > { %v9088_v54 = vpop.permute.xlu1 %5336 }
 0x365   : > { %4702 = vrot.lane.b32.xlu1 %v4551_v49, %s6853_s23  ;;  %v4476_v49 = vunpack.c.l.b16 %v3772_v59  ;;  %v3715_v59 = vld [vmem:[#allocation2 + $0x8c] sm:$0x1]  ;;  %v4034_v39 = vor.u32 %v4033_v32, %v4029_v48  ;;  %v6798_v48 = vld [vmem:[#allocation2 + $0x3c] sm:$0xe] }
 0x366   : > { %4696 = vrot.lane.b32.xlu0 %v4515_v36, %s6853_s23  ;;  %v3971_v50 = vunpack.c.l.b16 %v3715_v59 }
 0x367   : > { %4830 = vrot.lane.b32.xlu2 %v4787_v47, %s6852_s22  ;;  %v9111_v6 = vpack.c.b16 %v4476_v49, %v4476_v49 }
 0x368   : > { %v9078_v63 = vpop.permute.xlu0 %4430  ;;  %v3987_v10 = vpack.c.b16 %v3971_v50, %v3971_v50  ;;  %v3709_v50 = vld [vmem:[#allocation2 + $0x44] sm:$0x1] }
 0x369   : > { %10226 = vst [vmem:[#allocation11_spill] sm:$0xff] %v9078_v63  ;;  %v4425_v51 = vpop.permute.xlu2 %4424  ;;  %v3838_v63 = vld [vmem:[#allocation2 + $0x68] sm:$0x1] }
 0x36a   : > { %v9083_v55 = vsel %vm2560_vm14, %v8994_v34, %v4425_v51  ;;  %v5036_v34 = vshll.u32 %v8974_v1, 16  ;;  %v4106_v1 = vor.u32 %v4105_v37, %v4101_v25  ;;  %v9115_v51 = vld [vmem:[#allocation2 + $0x84] sm:$0xff]   ;;  %v4789_v37 = vrot.slane %v9111_v6, 1 }
 0x36b   : > { %10228 = vst [vmem:[#allocation12_spill] sm:$0xff] %v9115_v51 }
 0x36c   : > { %v4111_v47 = vsel %vm1116_vm10, %v4106_v1, %v4110_v19  ;;  %v4790_v25 = vsel %vm1389_vm9, %v4788_v46, %v4789_v37  ;;  %v4127_v19 = vshll.u32 %v9115_v51, 16  ;;  %v4125_v46 = vshrl.u32 %v9115_v51, 16 }
 0x36d   : > { %5216 = vrot.lane.b32.xlu1 %v5075_v21, %s6855_s25  ;;  %v5130_v21 = vor.u32 %v5129_v17, %v5125_v8  ;;  %v4557_v17 = vrot.slane %v4555_v12, 1  ;;  %v4132_v37 = vshll.u32 %v3987_v10, 16 }
 0x36e   : > { %4712 = vrot.lane.b32.xlu0 %v8959_v35, %s6853_s23  ;;  %v5038_v35 = vrot.slane %v5036_v34, 1  ;;  %v5057_v34 = vrot.slane %v5055_v45, 1  ;;  %v4129_v41 = vrot.slane %v4127_v19, 1  ;;  %v9155_v45 = vld [vmem:[#allocation2 + $0x3c] sm:$0xff]  }
 0x36f   : > { %5342 = vrot.lane.b32.xlu2 %v5299_v2, %s6854_s24  ;;  %v4539_v2 = vsel %vm1116_vm10, %v4534_v38, %v4538_v3  ;;  %v5135_v33 = vsel %vm1116_vm10, %v5130_v21, %v5134_v22  ;;  %v4560_v38 = vshll.u32 %v9111_v6, 16  ;;  %10229 = vst [vmem:[#allocation6_spill] sm:$0xff] %v9155_v45  ;;  %v9157_v21 = vld [vmem:[#allocation2 + $0x3c] sm:$0xf0]  ;;  %v4558_v22 = vor.u32 %v4557_v17, %v4553_v23 }
 0x370   : > { %v9099_v16 = vpop.permute.xlu0 %4944  ;;  %v5039_v36 = vsel %vm1116_vm10, %v5034_v44, %v5038_v35  ;;  %v5058_v1 = vor.u32 %v5057_v34, %v5053_v9  ;;  %v4036_v6 = vshll.u32 %v8927_v14, 16  ;;  %v3822_v14 = vld [vmem:[#allocation2 + $0x9c] sm:$0xff]   ;;  %v4055_v17 = vshll.u32 %v9155_v45, 16 }
 0x371   : > { %10227 = vst [vmem:[#allocation4_spill] sm:$0xff] %v9099_v16  ;;  %v9101_v40 = vpop.permute.xlu2 %4440  ;;  %v4562_v61 = vrot.slane %v4560_v38, 1 }
 0x372   : > { %v5063_v57 = vsel %vm1116_vm10, %v5058_v1, %v5062_v52  ;;  %v4038_v9 = vrot.slane %v4036_v6, 1  ;;  %v4053_v6 = vshrl.u32 %v9155_v45, 16 }
 0x374   : > { %v4039_v19 = vsel %vm1116_vm10, %v4034_v39, %v4038_v9 }
 0x375   : > { %5210 = vrot.lane.b32.xlu1 %v5039_v36, %s6855_s25  ;;  %v3779_v36 = vld [vmem:[#allocation2 + $0x98] sm:$0x1] }
 0x376   : > { %4202 = vrot.lane.b32.xlu0 %v4111_v47, %s6851_s21  ;;  %v5300_v47 = vrot.slane %v6602_v0, 1  ;;  %v4483_v31 = vunpack.c.l.b16 %v3779_v36  ;;  %v6794_v0 = vld [vmem:[#allocation2 + $0x9c] sm:$0xf0]  ;;  %v4298_v36 = vrot.slane %v3987_v10, 1  ;;  %v4057_v10 = vrot.slane %v4055_v17, 1 }
 0x377   : > { %5356 = vrot.lane.b32.xlu2 %v5320_v15, %s6854_s24  ;;  %v9120_v29 = vpop.permute.xlu1 %4328  ;;  %v6792_v15 = vld [vmem:[#allocation2 + $0x84] sm:$0xe] }
 0x378   : > { %v9124_v11 = vpop.permute.xlu0 %4938  ;;  %v5302_v8 = vsel %vm1389_vm9, %v5300_v47, %v5301_v24  ;;  %v4499_v59 = vpack.c.b16 %v4483_v31, %v4483_v31  ;;  %v6793_v18 = vor.u32 %v6792_v15, %v9117_v42  ;;  %v3965_v24 = vunpack.c.l.b16 %v3709_v50  ;;  %v3843_v15 = vld [vmem:[#allocation2 + $0xa4] sm:$0x1]  ;;  %v6586_v31 = vld [vmem:[#allocation2 + $0x90] sm:$0xe] }
 0x379   : > { %v9127_v28 = vpop.permute.xlu2 %4954  ;;  %v4995_v32 = vunpack.c.l.b16 %v3843_v15  ;;  %v4058_v9 = vor.u32 %v4057_v10, %v4053_v6  ;;  %v9205_v15 = vld [vmem:[#allocation2 + $0x54] sm:$0xff]   ;;  %v6533_v10 = vld [vmem:[#allocation2 + $0x48] sm:$0xff]  }
 0x37a   : > { %v4644_v12 = vshll.u32 %v4499_v59, 16  ;;  %v4297_v43 = vrot.slane %v6793_v18, 1 }
 0x37c   : > { %v4646_v47 = vrot.slane %v4644_v12, 1  ;;  %v4299_v23 = vsel %vm1389_vm9, %v4297_v43, %v4298_v36  ;;  %v6799_v36 = vor.u32 %v6798_v48, %v9157_v21 }
 0x37d   : > { %4700 = vrot.lane.b32.xlu1 %v4539_v2, %s6853_s23 }
 0x37e   : > { %5226 = vrot.lane.b32.xlu0 %v5135_v33, %s6855_s25  ;;  %v4134_v33 = vrot.slane %v4132_v37, 1  ;;  %v4647_v38 = vsel %vm1116_vm10, %v9026_v53, %v4646_v47  ;;  %v6795_v37 = vld [vmem:[#allocation2 + $0x9c] sm:$0xe] }
 0x37f   : > { %4832 = vrot.lane.b32.xlu2 %v4790_v25, %s6852_s22  ;;  %v9138_v44 = vpop.permute.xlu1 %4840  ;;  %v4563_v25 = vsel %vm1116_vm10, %v4558_v22, %v4562_v61  ;;  %v4810_v61 = vrot.slane %v4499_v59, 1  ;;  %v6796_v43 = vor.u32 %v6795_v37, %v6794_v0  ;;  %v5149_v59 = vshrl.u32 %v3822_v14, 16 }
 0x380   : > { %v9140_v35 = vpop.permute.xlu0 %4428  ;;  %v4279_v37 = vrot.slane %v6799_v36, 1  ;;  %v4565_v36 = vshrl.u32 %v6533_v10, 16 }
 0x381   : > { %v9143_v49 = vpop.permute.xlu2 %4444 }
 0x385   : > { %5214 = vrot.lane.b32.xlu1 %v5063_v57, %s6855_s25 }
 0x386   : > { %4716 = vrot.lane.b32.xlu0 %v8989_v13, %s6853_s23  ;;  %v4130_v13 = vor.u32 %v4129_v41, %v4125_v46  ;;  %v6585_v41 = vld [vmem:[#allocation2 + $0x90] sm:$0xf0] }
 0x387   : > { %5344 = vrot.lane.b32.xlu2 %v5302_v8, %s6854_s24  ;;  %v9160_v3 = vpop.permute.xlu1 %4316  ;;  %v3981_v8 = vpack.c.b16 %v3965_v24, %v3965_v24  ;;  %v6587_v46 = vor.u32 %v6586_v31, %v6585_v41  ;;  %v6800_v41 = vld [vmem:[#allocation2 + $0x54] sm:$0xf0] }
 0x388   : > { %v9165_v2 = vpop.permute.xlu0 %4942  ;;  %v4135_v1 = vsel %vm1116_vm10, %v4130_v13, %v4134_v33  ;;  %v5151_v33 = vshll.u32 %v3822_v14, 16 }
 0x389   : > { %10230 = vst [vmem:[#allocation13_spill] sm:$0xff] %v9165_v2  ;;  %v9167_v34 = vpop.permute.xlu2 %4314  ;;  %v4060_v13 = vshll.u32 %v3981_v8, 16  ;;  %v4809_v18 = vrot.slane %v6587_v46, 1  ;;  %v4280_v0 = vrot.slane %v3981_v8, 1  ;;  %v5321_v46 = vrot.slane %v6796_v43, 1 }
 0x38a   : > { %v6801_v8 = vld [vmem:[#allocation2 + $0x54] sm:$0xe] }
 0x38b   : > { %v4062_v50 = vrot.slane %v4060_v13, 1  ;;  %v4811_v12 = vsel %vm1389_vm9, %v4809_v18, %v4810_v61  ;;  %v6576_v13 = vld [vmem:[#allocation2 + $0x48] sm:$0xf0]  ;;  %v6577_v61 = vld [vmem:[#allocation2 + $0x48] sm:$0xe]  ;;  %v4281_v18 = vsel %vm1389_vm9, %v4279_v37, %v4280_v0 }
 0x38d   : > { %4704 = vrot.lane.b32.xlu1 %v4563_v25, %s6853_s23  ;;  %v5011_v25 = vpack.c.b16 %v4995_v32, %v4995_v32  ;;  %v4063_v24 = vsel %vm1116_vm10, %v4058_v9, %v4062_v50  ;;  %v3837_v9 = vld [vmem:[#allocation2 + $0x5c] sm:$0x1] }
 0x38e   : > { %4206 = vrot.lane.b32.xlu0 %v4135_v1, %s6851_s21  ;;  %v3773_v1 = vld [vmem:[#allocation2 + $0x50] sm:$0x1] }
 0x38f   : > { %4190 = vrot.lane.b32.xlu2 %v4039_v19, %s6851_s21  ;;  %v9176_v52 = vpop.permute.xlu1 %4330  ;;  %v5156_v19 = vshll.u32 %v5011_v25, 16  ;;  %v4477_v47 = vunpack.c.l.b16 %v3773_v1  ;;  %v5322_v21 = vrot.slane %v5011_v25, 1  ;;  %v6578_v1 = vor.u32 %v6577_v61, %v6576_v13  ;;  %v9230_v13 = vld [vmem:[#allocation2 + $0x9c] sm:$0xf0] }
 0x390   : > { %v9178_v42 = vpop.permute.xlu0 %4432 }
 0x391   : > { %10231 = vst [vmem:[#allocation7_spill] sm:$0xff] %v9178_v42  ;;  %v9180_v57 = vpop.permute.xlu2 %4826  ;;  %v5158_v32 = vrot.slane %v5156_v19, 1  ;;  %v4493_v48 = vpack.c.b16 %v4477_v47, %v4477_v47  ;;  %v4989_v19 = vunpack.c.l.b16 %v3837_v9  ;;  %v5077_v9 = vshrl.u32 %v9205_v15, 16  ;;  %v6804_v42 = vld [vmem:[#allocation2 + $0x9c] sm:$0xe] }
 0x393   : > { %v4572_v50 = vshll.u32 %v4493_v48, 16  ;;  %v4792_v43 = vrot.slane %v4493_v48, 1 }
 0x395   : > { %4334 = vrot.lane.b32.xlu1 %v4299_v23, %s6850_s20  ;;  %v4574_v47 = vrot.slane %v4572_v50, 1 }
 0x396   : > { %4718 = vrot.lane.b32.xlu0 %v4647_v38, %s6853_s23 }
 0x397   : > { %4446 = vrot.lane.b32.xlu2 %v8862_v62, %s6848_s18  ;;  %v9190_v22 = vpop.permute.xlu1 %4842  ;;  %v5153_v62 = vrot.slane %v5151_v33, 1  ;;  %v5323_v33 = vsel %vm1389_vm9, %v5321_v46, %v5322_v21  ;;  %v5005_v46 = vpack.c.b16 %v4989_v19, %v4989_v19  ;;  %v5632_v19 = vld [vmem:[%s10150_s2 + $0x20] sm:$0xf] }
 0x398   : > { %v9193_v39 = vpop.permute.xlu0 %4192 }
 0x399   : > { %v9195_v53 = vpop.permute.xlu2 %5338  ;;  %v5154_v31 = vor.u32 %v5153_v62, %v5149_v59  ;;  %v3716_v59 = vld [vmem:[#allocation2 + $0x98] sm:$0x1] }
 0x39a   : > { %v3972_v21 = vunpack.c.l.b16 %v3716_v59 }
 0x39b   : > { %v5159_v6 = vsel %vm1116_vm10, %v5154_v31, %v5158_v32  ;;  %v5079_v31 = vshll.u32 %v9205_v15, 16  ;;  %v4791_v32 = vrot.slane %v6578_v1, 1 }
 0x39d   : > { %4846 = vrot.lane.b32.xlu1 %v4811_v12, %s6852_s22  ;;  %v4793_v37 = vsel %vm1389_vm9, %v4791_v32, %v4792_v43  ;;  %v5081_v61 = vrot.slane %v5079_v31, 1 }
 0x39e   : > { %4194 = vrot.lane.b32.xlu0 %v4063_v24, %s6851_s21 }
 0x39f   : > { %4958 = vrot.lane.b32.xlu2 %v3822_v14, %s6849_s19  ;;  %v9203_v17 = vpop.permute.xlu1 %4318  ;;  %v4567_v14 = vshll.u32 %v6533_v10, 16  ;;  %v5082_v43 = vor.u32 %v5081_v61, %v5077_v9  ;;  %v6662_v9 = vld [vmem:[#allocation2 + $0x30] sm:$0xff]  }
 0x3a0   : > { %10232 = vst [vmem:[#allocation14_spill] sm:$0xff] %v9203_v17  ;;  %v9207_v23 = vpop.permute.xlu0 %5208 }
 0x3a1   : > { %v9209_v38 = vpop.permute.xlu2 %5352  ;;  %v4569_v12 = vrot.slane %v4567_v14, 1  ;;  %v9228_v14 = vld [vmem:[#allocation2 + $0x9c] sm:$0xff]  }
 0x3a3   : > { %v9224_v0 = vor.u32 %v4569_v12, %v4565_v36  ;;  %v5304_v12 = vrot.slane %v5005_v46, 1  ;;  %v5650_v36 = vunpack.c.l.b16 %v5632_v19 }
 0x3a5   : > { %5230 = vrot.lane.b32.xlu1 %v5159_v6, %s6855_s25  ;;  %v6802_v6 = vor.u32 %v6801_v8, %v6800_v41  ;;  %v4575_v48 = vsel %vm1116_vm10, %v9224_v0, %v4574_v47  ;;  %v3988_v41 = vpack.c.b16 %v3972_v21, %v3972_v21  ;;  %v3780_v47 = vld [vmem:[#allocation2 + $0xa4] sm:$0x1]  ;;  %v5655_v45 = vpack.c.b16 %v5650_v36, %v5650_v36 }
 0x3a6   : > { %5358 = vrot.lane.b32.xlu0 %v5323_v33, %s6854_s24  ;;  %v4484_v16 = vunpack.c.l.b16 %v3780_v47 }
 0x3a7   : > { %4322 = vrot.lane.b32.xlu2 %v4281_v18, %s6850_s20  ;;  %v9217_v25 = vpop.permute.xlu1 %4332  ;;  %v5084_v18 = vshll.u32 %v5005_v46, 16  ;;  %v5303_v1 = vrot.slane %v6802_v6, 1  ;;  %v4144_v32 = vshll.u32 %v3988_v41, 16  ;;  %v5693_v61 = vsel %vm10234_vm2, %v5655_v45, 0  ;;  %vm10248_vm2 = vmmov %vm10242_vm3 }
 0x3a8   : > { %v9219_v62 = vpop.permute.xlu0 %4200  ;;  %5698 = vmatpush.bf16.msra.mxu1 %v5693_v61  ;;  %6623 = vmatpush.bf16.msra.mxu3 %v5693_v61  ;;  %v4301_v47 = vrot.slane %v3988_v41, 1  ;;  %v4649_v41 = vshrl.u32 %v9228_v14, 16 }
 0x3a9   : > { %v9221_v24 = vpop.permute.xlu2 %4828  ;;  %v5086_v31 = vrot.slane %v5084_v18, 1  ;;  %v5305_v21 = vsel %vm1389_vm9, %v5303_v1, %v5304_v12  ;;  %v5377_v18 = vsel %vm2494_vm12, %v6662_v9, %v9193_v39  ;;  %v6236_v9 = vld [vmem:[%s10150_s2 + $0x10] sm:$0xff] }
 0x3ab   : > { %v5087_v46 = vsel %vm1116_vm10, %v5082_v43, %v5086_v31  ;;  %v4146_v43 = vrot.slane %v4144_v32, 1  ;;  %v3710_v31 = vld [vmem:[#allocation2 + $0x50] sm:$0x1] }
 0x3ad   : > { %4434 = vrot.lane.b32.xlu1 %v6533_v10, %s6848_s18  ;;  %v6529_v10 = vld [vmem:[#allocation2 + $0x90] sm:$0xff]  }
 0x3ae   : > { %4834 = vrot.lane.b32.xlu0 %v4793_v37, %s6852_s22  ;;  %v4139_v59 = vshll.u32 %v6529_v10, 16  ;;  %v6564_v37 = vld [vmem:[#allocation2 + $0x90] sm:$0xf0]  ;;  %v4137_v12 = vshrl.u32 %v6529_v10, 16 }
 0x3af   : > { %4706 = vrot.lane.b32.xlu2 %v4575_v48, %s6853_s23  ;;  %v9236_v33 = vpop.permute.xlu1 %4844  ;;  %v6565_v48 = vld [vmem:[#allocation2 + $0x90] sm:$0xe] }
 0x3b0   : > { %v9239_v50 = vpop.permute.xlu0 %5224  ;;  %v4141_v6 = vrot.slane %v4139_v59, 1  ;;  %v6566_v36 = vor.u32 %v6565_v48, %v6564_v37  ;;  %v4651_v59 = vshll.u32 %v9228_v14, 16  ;;  %v4500_v48 = vpack.c.b16 %v4484_v16, %v4484_v16 }
 0x3b1   : > { %v9241_v8 = vpop.permute.xlu2 %5340  ;;  %v6805_v16 = vor.u32 %v6804_v42, %v9230_v13  ;;  %v9290_v13 = vld [vmem:[#allocation2 + $0xa8] sm:$0xff]  }
 0x3b2   : > { %10233 = vst [vmem:[#allocation8_spill] sm:$0xff] %v9241_v8  ;;  %v4142_v37 = vor.u32 %v4141_v6, %v4137_v12  ;;  %v4653_v32 = vrot.slane %v4651_v59, 1  ;;  %v4656_v6 = vshll.u32 %v4500_v48, 16  ;;  %v9278_v12 = vld [vmem:[#allocation2 + $0x54] sm:$0xf0] }
 0x3b4   : > { %v4147_v10 = vsel %vm1116_vm10, %v4142_v37, %v4146_v43  ;;  %v6235_v43 = vld [vmem:[%s10150_s2 + $0x8] sm:$0xff]  ;;  %v4654_v59 = vor.u32 %v4653_v32, %v4649_v41  ;;  %v4812_v37 = vrot.slane %v6805_v16, 1 }
 0x3b5   : > { %4946 = vrot.lane.b32.xlu1 %v9205_v15, %s6849_s19  ;;  %v6237_v15 = vld [vmem:[%s10150_s2 + $0x18] sm:$0xff] }
 0x3b6   : > { %5346 = vrot.lane.b32.xlu0 %v5305_v21, %s6854_s24  ;;  %v4300_v21 = vrot.slane %v6566_v36, 1  ;;  %5699 = vmatpush.bf16.msra.mxu1 %v6237_v15  ;;  %v9276_v36 = vld [vmem:[#allocation2 + $0x54] sm:$0xff]  }
 0x3b7   : > { %5218 = vrot.lane.b32.xlu2 %v5087_v46, %s6855_s25  ;;  %v4321_v19 = vpop.permute.xlu1 %4320  ;;  %v3844_v46 = vld [vmem:[#allocation2 + $0xb0] sm:$0x1]  ;;  %6624 = vmatpush.bf16.msra.mxu3 %v6237_v15 }
 0x3b8   : > { %v9259_v1 = vsel %vm2527_vm13, %v5377_v18, %v4321_v19  ;;  %v9261_v45 = vpop.permute.xlu0 %4714  ;;  %v3966_v18 = vunpack.c.l.b16 %v3710_v31  ;;  %v4302_v61 = vsel %vm1389_vm9, %v4300_v21, %v4301_v47  ;;  %v4996_v19 = vunpack.c.l.b16 %v3844_v46 }
 0x3b9   : > { %10235 = vst [vmem:[#allocation15_spill] sm:$0xff] %v9259_v1  ;;  %v9264_v39 = vpop.permute.xlu2 %5354  ;;  %v4658_v31 = vrot.slane %v4656_v6, 1  ;;  %v4813_v21 = vrot.slane %v4500_v48, 1  ;;  %v3774_v1 = vld [vmem:[#allocation2 + $0x5c] sm:$0x1] }
 0x3ba   : > { %5700 = vmatpush.bf16.msra.mxu1 %v6236_v9  ;;  %v3982_v42 = vpack.c.b16 %v3966_v18, %v3966_v18  ;;  %v5012_v46 = vpack.c.b16 %v4996_v19, %v4996_v19  ;;  %v5163_v18 = vshll.u32 %v9290_v13, 16 }
 0x3bb   : > { %6625 = vmatpush.bf16.msra.mxu3 %v6236_v9  ;;  %v4659_v32 = vsel %vm1116_vm10, %v4654_v59, %v4658_v31  ;;  %v6556_v9 = vld [vmem:[#allocation2 + $0x48] sm:$0xe]  ;;  %v4814_v6 = vsel %vm1389_vm9, %v4812_v37, %v4813_v21  ;;  %v4478_v59 = vunpack.c.l.b16 %v3774_v1  ;;  %v4579_v37 = vshll.u32 %v9276_v36, 16 }
 0x3bc   : > { %v4072_v41 = vshll.u32 %v3982_v42, 16  ;;  %v5168_v48 = vshll.u32 %v5012_v46, 16  ;;  %v5165_v51 = vrot.slane %v5163_v18, 1  ;;  %v5161_v21 = vshrl.u32 %v9290_v13, 16 }
 0x3bd   : > { %4208 = vrot.lane.b32.xlu1 %v4147_v10, %s6851_s21  ;;  %v6555_v10 = vld [vmem:[#allocation2 + $0x48] sm:$0xf0]  ;;  %v4581_v18 = vrot.slane %v4579_v37, 1 }
 0x3be   : > { %4448 = vrot.lane.b32.xlu0 %v9228_v14, %s6848_s18  ;;  %5701 = vmatpush.bf16.msra.mxu1 %v6235_v43  ;;  %v6557_v19 = vor.u32 %v6556_v9, %v6555_v10  ;;  %v4074_v31 = vrot.slane %v4072_v41, 1  ;;  %v4494_v10 = vpack.c.b16 %v4478_v59, %v4478_v59  ;;  %v9312_v41 = vor.u32 %v5165_v51, %v5161_v21  ;;  %v9323_v59 = vld [vmem:[#allocation2 + $0x9c] sm:$0xff]  }
 0x3bf   : > { %4336 = vrot.lane.b32.xlu2 %v4302_v61, %s6850_s20  ;;  %v9281_v15 = vpop.permute.xlu1 %4188  ;;  %v6234_v61 = vld [vmem:[%s10150_s2] sm:$0xff]  ;;  %6626 = vmatpush.bf16.msra.mxu3 %v6235_v43  ;;  %v4990_v9 = vunpack.c.l.b16 %v3838_v63  ;;  %v4577_v51 = vshrl.u32 %v9276_v36, 16 }
 0x3c0   : > { %v9286_v47 = vpop.permute.xlu0 %4204  ;;  %v4282_v8 = vrot.slane %v6557_v19, 1  ;;  %v4075_v1 = vsel %vm1116_vm10, %v9224_v0, %v4074_v31  ;;  %v4584_v0 = vshll.u32 %v4494_v10, 16  ;;  %v9325_v31 = vld [vmem:[#allocation2 + $0x9c] sm:$0xf0] }
 0x3c1   : > { %v9288_v14 = vpop.permute.xlu2 %4830  ;;  %v9327_v63 = vld [vmem:[#allocation2 + $0x60] sm:$0xff]  }
 0x3c2   : > { %10236 = vst [vmem:[#allocation10_spill] sm:$0xff] %v9288_v14  ;;  %5702 = vmatpush.bf16.msra.mxu1 %v6234_v61  ;;  %v5170_v14 = vrot.slane %v5168_v48, 1 }
 0x3c3   : > { %6627 = vmatpush.bf16.msra.mxu3 %v6234_v61 }
 0x3c4   : > { %v5171_v48 = vsel %vm1116_vm10, %v9312_v41, %v5170_v14  ;;  %v9331_v14 = vpack.c.b16 %v4990_v9, %v4990_v9 }
 0x3c5   : > { %4720 = vrot.lane.b32.xlu1 %v4659_v32, %s6853_s23  ;;  %v4283_v32 = vrot.slane %v3982_v42, 1  ;;  %v6807_v42 = vld [vmem:[#allocation2 + $0x54] sm:$0xe] }
 0x3c6   : > { %4960 = vrot.lane.b32.xlu0 %v9290_v13, %s6849_s19  ;;  %v5096_v17 = vshll.u32 %v9331_v14, 16 }
 0x3c7   : > { %4848 = vrot.lane.b32.xlu2 %v4814_v6, %s6852_s22  ;;  %v9302_v16 = vpop.permute.xlu1 %4698  ;;  %v6612_v6 = vld [vmem:[#allocation2 + $0xa8] sm:$0xf0]  ;;  %v4284_v61 = vsel %vm1389_vm9, %v4282_v8, %v4283_v32  ;;  %v5325_v8 = vrot.slane %v5012_v46, 1 }
 0x3c8   : > { %v9304_v2 = vpop.permute.xlu0 %5228 }
 0x3c9   : > { %10237 = vst [vmem:[#allocation5_spill] sm:$0xff] %v9304_v2  ;;  %v9306_v43 = vpop.permute.xlu2 %5342  ;;  %v3717_v2 = vld [vmem:[#allocation2 + $0xa4] sm:$0x1] }
 0x3ca   : > { %10238 = vst [vmem:[#allocation16_spill] sm:$0xff] %v9306_v43  ;;  %v6614_v43 = vor.u32 %v6613_v58, %v6612_v6  ;;  %v4582_v58 = vor.u32 %v4581_v18, %v4577_v51  ;;  %v5091_v6 = vshll.u32 %v9327_v63, 16  ;;  %v6810_v18 = vld [vmem:[#allocation2 + $0x9c] sm:$0xe] }
 0x3cc   : > { %v5324_v21 = vrot.slane %v6614_v43, 1  ;;  %v5093_v9 = vrot.slane %v5091_v6, 1 }
 0x3cd   : > { %4196 = vrot.lane.b32.xlu1 %v4075_v1, %s6851_s21  ;;  %v4586_v1 = vrot.slane %v4584_v0, 1 }
 0x3ce   : > { %4324 = vrot.lane.b32.xlu0 %v4284_v61, %s6850_s20  ;;  %v5326_v61 = vsel %vm1389_vm9, %v5324_v21, %v5325_v8  ;;  %v6603_v8 = vld [vmem:[#allocation2 + $0x60] sm:$0xf0]  ;;  %v3973_v21 = vunpack.c.l.b16 %v3717_v2 }
 0x3cf   : > { %5232 = vrot.lane.b32.xlu2 %v5171_v48, %s6855_s25  ;;  %v9320_v19 = vpop.permute.xlu1 %5212  ;;  %v6808_v48 = vor.u32 %v6807_v42, %v9278_v12  ;;  %v4587_v46 = vsel %vm1116_vm10, %v4582_v58, %v4586_v1  ;;  %v4795_v42 = vrot.slane %v4494_v10, 1  ;;  %v6604_v58 = vld [vmem:[#allocation2 + $0x60] sm:$0xe]  ;;  %v4151_v10 = vshll.u32 %v9323_v59, 16 }
 0x3d0   : > { %v4187_v32 = vpop.permute.xlu0 %4186 }
 0x3d1   : > { %v9329_v37 = vpop.permute.xlu2 %5356  ;;  %v5371_v51 = vsel %vm2494_vm12, %v8918_v60, %v4187_v32  ;;  %v4794_v12 = vrot.slane %v6808_v48, 1  ;;  %v6605_v48 = vor.u32 %v6604_v58, %v6603_v8  ;;  %v9387_v8 = vld [vmem:[#allocation2 + $0x54] sm:$0xff]  }
 0x3d2   : > { %10239 = vst [vmem:[#allocation17_spill] sm:$0xff] %v9329_v37  ;;  %v3781_v37 = vld [vmem:[#allocation2 + $0xb0] sm:$0x1]  ;;  %v5403_v2 = vsel %vm2527_vm13, %v5371_v51, %v9167_v34  ;;  %v6811_v51 = vor.u32 %v6810_v18, %v9325_v31  ;;  %v9389_v31 = vld [vmem:[#allocation2 + $0x54] sm:$0xf0] }
 0x3d5   : > { %5360 = vrot.lane.b32.xlu1 %v5326_v61, %s6854_s24  ;;  %v5089_v61 = vshrl.u32 %v9327_v63, 16 }
 0x3d6   : > { %4708 = vrot.lane.b32.xlu0 %v4587_v46, %s6853_s23 }
 0x3d7   : > { %4436 = vrot.lane.b32.xlu2 %v9276_v36, %s6848_s18  ;;  %v9342_v43 = vpop.permute.xlu1 %4702  ;;  %v5098_v36 = vrot.slane %v5096_v17, 1  ;;  %v9358_v32 = vor.u32 %v5093_v9, %v5089_v61  ;;  %v4796_v17 = vsel %vm1389_vm9, %v4794_v12, %v4795_v42  ;;  %v5306_v12 = vrot.slane %v6605_v48, 1  ;;  %v6588_v48 = vld [vmem:[#allocation2 + $0xa8] sm:$0xf0] }
 0x3d8   : > { %10240 = vst [vmem:[#allocation18_spill] sm:$0xff] %v9342_v43  ;;  %v4697_v0 = vpop.permute.xlu0 %4696  ;;  %v6663_v43 = vld [vmem:[#allocation2 + $0x60] sm:$0xff]   ;;  %v5307_v42 = vrot.slane %v9331_v14, 1 }
 0x3d9   : > { %v9346_v1 = vpop.permute.xlu2 %4832  ;;  %v5465_v46 = vsel %vm2593_vm15, %v9083_v55, %v4697_v0  ;;  %v5385_v6 = vsel %vm2494_vm12, %v6663_v43, %v9219_v62  ;;  %v3989_v0 = vpack.c.b16 %v3973_v21, %v3973_v21  ;;  %v4485_v43 = vunpack.c.l.b16 %v3781_v37 }
 0x3da   : > { %10241 = vst [vmem:[#allocation19_spill] sm:$0xff] %v9346_v1  ;;  %v5497_v60 = vsel %vm2626_vm0, %v5465_v46, %v9063_v30  ;;  %v9365_v1 = vld [vmem:[#allocation2 + $0xb4] sm:$0xff]   ;;  %v5417_v34 = vsel %vm2527_vm13, %v5385_v6, %v9120_v29  ;;  %v5099_v9 = vsel %vm1116_vm10, %v9358_v32, %v5098_v36  ;;  %v4153_v37 = vrot.slane %v4151_v10, 1 }
 0x3db   : > { %v5529_v55 = vsel %vm2659_vm1, %v5497_v60, %v8997_v20  ;;  %v9367_v30 = vld [vmem:[#allocation2 + $0xb4] sm:$0xf0]  ;;  %v5449_v58 = vsel %vm2560_vm14, %v5417_v34, %v9101_v40  ;;  %v4501_v21 = vpack.c.b16 %v4485_v43, %v4485_v43  ;;  %v4304_v61 = vrot.slane %v3989_v0, 1 }
 0x3dc   : > { %v5561_v62 = vsel %vm2692_vm4, %v5529_v55, %v9207_v23  ;;  %v5435_v23 = vsel %vm2560_vm14, %v5403_v2, %v9038_v26  ;;  %v4156_v26 = vshll.u32 %v3989_v0, 16  ;;  %v4303_v6 = vrot.slane %v6811_v51, 1  ;;  %v6589_v0 = vld [vmem:[#allocation2 + $0xa8] sm:$0xe] }
 0x3dd   : > { %4836 = vrot.lane.b32.xlu1 %v4796_v17, %s6852_s22  ;;  %v5593_v20 = vsel %vm10242_vm3, %v5561_v62, %v9088_v54  ;;  %v4149_v54 = vshrl.u32 %v9323_v59, 16  ;;  %v5467_v36 = vsel %vm2593_vm15, %v5435_v23, %v9302_v16  ;;  %v5308_v40 = vsel %vm1389_vm9, %v5306_v12, %v5307_v42  ;;  %v3845_v62 = vld [vmem:[#allocation2 + $0xbc] sm:$0x1]  ;;  %vm10249_vm3 = vmmov %vm10247_vm6 }
 0x3de   : > { %5220 = vrot.lane.b32.xlu0 %v5099_v9, %s6855_s25  ;;  %6210 = vmatmul.msk.bf16.vlgmr.msra.gmra.mxu1 %vm10243_vm7, %v5593_v20  ;;  %v4158_v55 = vrot.slane %v4156_v26, 1  ;;  %v5499_v17 = vsel %vm2626_vm0, %v5467_v36, %v9180_v57  ;;  %v4305_v43 = vsel %vm1389_vm9, %v4303_v6, %v4304_v61  ;;  %v4668_v9 = vshll.u32 %v4501_v21, 16  ;;  %v6664_v42 = vld [vmem:[#allocation2 + $0x18] sm:$0xff]   ;;  %vm10252_vm7 = vmmov %vm10248_vm2 }
 0x3df   : > { %4948 = vrot.lane.b32.xlu2 %v9327_v63, %s6849_s19  ;;  %v9383_v29 = vpop.permute.xlu1 %5216  ;;  %v4154_v60 = vor.u32 %v4153_v37, %v4149_v54  ;;  %v6590_v20 = vor.u32 %v6589_v0, %v6588_v48  ;;  %v4997_v51 = vunpack.c.l.b16 %v3845_v62  ;;  %v4816_v12 = vrot.slane %v4501_v21, 1 }
 0x3e0   : > { %v4713_v18 = vpop.permute.xlu0 %4712  ;;  %v5373_v54 = vsel %vm2494_vm12, %v6664_v42, %v9281_v15  ;;  %v4670_v61 = vrot.slane %v4668_v9, 1  ;;  %v4079_v21 = vshll.u32 %v9387_v8, 16  ;;  %v4077_v0 = vshrl.u32 %v9387_v8, 16  ;;  %v6665_v9 = vld [vmem:[#allocation2 + $0x78] sm:$0xff]   ;;  %v9473_v42 = vld [vmem:[#allocation2 + $0x6c] sm:$0xf0] }
 0x3e1   : > { %v9393_v46 = vpop.permute.xlu2 %5344  ;;  %v5481_v14 = vsel %vm2593_vm15, %v5449_v58, %v4713_v18  ;;  %v4159_v34 = vsel %vm1116_vm10, %v4154_v60, %v4158_v55  ;;  %v4815_v15 = vrot.slane %v6590_v20, 1  ;;  %v9432_v6 = vpack.c.b16 %v4997_v51, %v4997_v51 }
 0x3e2   : > { %v5513_v10 = vsel %vm2626_vm0, %v5481_v14, %v9138_v44  ;;  %v4081_v48 = vrot.slane %v4079_v21, 1  ;;  %v5173_v55 = vshrl.u32 %v9365_v1, 16 }
 0x3e3   : > { %v5545_v2 = vsel %vm2659_vm1, %v5513_v10, %v9017_v7  ;;  %v3711_v7 = vld [vmem:[#allocation2 + $0x5c] sm:$0x1]  ;;  %v6813_v10 = vld [vmem:[#allocation2 + $0x54] sm:$0xe] }
 0x3e4   : > { %v5577_v16 = vsel %vm2692_vm4, %v5545_v2, %v9239_v50  ;;  %v5531_v50 = vsel %vm2659_vm1, %v5499_v17, %v9124_v11  ;;  %v5175_v11 = vshll.u32 %v9365_v1, 16  ;;  %v5180_v17 = vshll.u32 %v9432_v6, 16 }
 0x3e5   : > { %5348 = vrot.lane.b32.xlu1 %v5308_v40, %s6854_s24  ;;  %v5609_v44 = vsel %vm10244_vm8, %v5577_v16, %v9209_v38  ;;  %v3967_v38 = vunpack.c.l.b16 %v3711_v7  ;;  %v6816_v40 = vld [vmem:[#allocation2 + $0xb4] sm:$0xe]  ;;  %v6814_v51 = vor.u32 %v6813_v10, %v9389_v31  ;;  %vm10253_vm8 = vmmov %vm10249_vm3 }
 0x3e6   : > { %4338 = vrot.lane.b32.xlu0 %v4305_v43, %s6850_s20  ;;  %6218 = vmatmul.msk.bf16.vlgmr.msra.gmra.mxu3 %vm10245_vm11, %v5609_v44  ;;  %v5177_v2 = vrot.slane %v5175_v11, 1  ;;  %vm10259_vm11 = vmmov %vm10248_vm2 }
 0x3e7   : > { %4210 = vrot.lane.b32.xlu2 %v4159_v34, %s6851_s21  ;;  %v5211_v57 = vpop.permute.xlu1 %5210  ;;  %v3983_v60 = vpack.c.b16 %v3967_v38, %v3967_v38  ;;  %v3775_v34 = vld [vmem:[#allocation2 + $0x68] sm:$0x1] }
 0x3e8   : > { %v5563_v23 = vsel %vm2692_vm4, %v5531_v50, %v5211_v57  ;;  %v4203_v37 = vpop.permute.xlu0 %4202  ;;  %v5178_v7 = vor.u32 %v5177_v2, %v5173_v55  ;;  %v5389_v57 = vsel %vm2494_vm12, %v6665_v9, %v9286_v47  ;;  %v4082_v50 = vor.u32 %v4081_v48, %v4077_v0  ;;  %v9471_v47 = vld [vmem:[#allocation2 + $0x6c] sm:$0xff]   ;;  %v6580_v2 = vld [vmem:[#allocation2 + $0x60] sm:$0xe]  ;;  %v10255_v0 = vld [vmem:[#allocation11_spill] sm:$0xff] }
 0x3e9   : > { %v9420_v26 = vpop.permute.xlu2 %4190  ;;  %v5387_v18 = vsel %vm2494_vm12, %v8834_v5, %v4203_v37  ;;  %v5595_v58 = vsel %vm10246_vm5, %v5563_v23, %v9195_v53  ;;  %v5405_v5 = vsel %vm2527_vm13, %v5373_v54, %v9160_v3  ;;  %v4084_v62 = vshll.u32 %v3983_v60, 16  ;;  %v6819_v55 = vld [vmem:[#allocation2 + $0x6c] sm:$0xe]  ;;  %vm10261_vm5 = vmmov %vm10249_vm3 }
 0x3ea   : > { %v5419_v36 = vsel %vm2527_vm13, %v5387_v18, %v9176_v52  ;;  %v4817_v52 = vsel %vm1389_vm9, %v4815_v15, %v4816_v12  ;;  %v5182_v23 = vrot.slane %v5180_v17, 1  ;;  %v4479_v38 = vunpack.c.l.b16 %v3775_v34  ;;  %v10254_v17 = vld [vmem:[#allocation9_spill] sm:$0xff] }
 0x3eb   : > { %v5451_v14 = vsel %vm2560_vm14, %v5419_v36, %v9041_v4  ;;  %v4671_v4 = vsel %vm1116_vm10, %v9312_v41, %v4670_v61  ;;  %v4086_v37 = vrot.slane %v4084_v62, 1  ;;  %v6817_v54 = vor.u32 %v6816_v40, %v9367_v30 }
 0x3ec   : > { %v5483_v53 = vsel %vm2593_vm15, %v5451_v14, %v9261_v45  ;;  %v5437_v45 = vsel %vm2560_vm14, %v5405_v5, %v9140_v35  ;;  %v4286_v18 = vrot.slane %v3983_v60, 1  ;;  %v4495_v61 = vpack.c.b16 %v4479_v38, %v4479_v38  ;;  %v3839_v60 = vld [vmem:[#allocation2 + $0x74] sm:$0x1] }
 0x3ed   : > { %4450 = vrot.lane.b32.xlu1 %v9290_v13, %s6848_s18  ;;  %v5515_v3 = vsel %vm2626_vm0, %v5483_v53, %v9190_v22  ;;  %v4087_v31 = vsel %vm1116_vm10, %v4082_v50, %v4086_v37  ;;  %v5375_v21 = vsel %vm2494_vm12, %v8793_v27, %v9420_v26  ;;  %v5327_v14 = vrot.slane %v6817_v54, 1  ;;  %v10251_v27 = vld [vmem:[#allocation8_spill] sm:$0xff] }
 0x3ee   : > { %4850 = vrot.lane.b32.xlu0 %v4817_v52, %s6852_s22  ;;  %6211 = vmatmul.msk.bf16.gmra.mxu1 %vm10247_vm6, %v5595_v58  ;;  %v5547_v35 = vsel %vm2659_vm1, %v5515_v3, %v9127_v28  ;;  %v5183_v28 = vsel %vm1116_vm10, %v5178_v7, %v5182_v23  ;;  %v5328_v15 = vrot.slane %v9432_v6, 1  ;;  %v4596_v10 = vshll.u32 %v4495_v61, 16  ;;  %v6579_v52 = vld [vmem:[#allocation2 + $0x60] sm:$0xf0]  ;;  %v9507_v3 = vld [vmem:[#allocation2 + $0xb4] sm:$0xff]   ;;  %vm10265_vm6 = vmmov %vm10248_vm2 }
 0x3ef   : > { %4722 = vrot.lane.b32.xlu2 %v4671_v4, %s6853_s23  ;;  %v4701_v13 = vpop.permute.xlu1 %4700  ;;  %v10250_v4 = vld [vmem:[#allocation14_spill] sm:$0xff]  ;;  %v6581_v40 = vor.u32 %v6580_v2, %v6579_v52  ;;  %v4798_v7 = vrot.slane %v4495_v61, 1 }
 0x3f0   : > { %v5469_v16 = vsel %vm2593_vm15, %v5437_v45, %v4701_v13  ;;  %v5227_v43 = vpop.permute.xlu0 %5226  ;;  %v5407_v48 = vsel %vm2527_vm13, %v5375_v21, %v10250_v4  ;;  %v9509_v45 = vld [vmem:[#allocation2 + $0xb4] sm:$0xf0]  ;;  %v6567_v4 = vld [vmem:[#allocation2 + $0xa8] sm:$0xf0] }
 0x3f1   : > { %v5501_v22 = vsel %vm2626_vm0, %v5469_v16, %v9221_v24  ;;  %v9456_v44 = vpop.permute.xlu2 %4446  ;;  %v5579_v20 = vsel %vm2692_vm4, %v5547_v35, %v5227_v43  ;;  %v5421_v24 = vsel %vm2527_vm13, %v5389_v57, %v9217_v25  ;;  %v5439_v62 = vsel %vm2560_vm14, %v5407_v48, %v10255_v0  ;;  %v10256_v57 = vld [vmem:[#allocation5_spill] sm:$0xff] }
 0x3f2   : > { %v5611_v12 = vsel %vm10248_vm2, %v5579_v20, %v9264_v39  ;;  %v5533_v39 = vsel %vm2659_vm1, %v5501_v22, %v9056_v56  ;;  %v5453_v11 = vsel %vm2560_vm14, %v5421_v24, %v9143_v49  ;;  %v3718_v56 = vld [vmem:[#allocation2 + $0xb0] sm:$0x1]  ;;  %v5103_v22 = vshll.u32 %v9471_v47, 16  ;;  %v3782_v24 = vld [vmem:[#allocation2 + $0xbc] sm:$0x1]  ;;  %vm10266_vm2 = vmmov %vm10249_vm3 }
 0x3f3   : > { %v5565_v5 = vsel %vm2692_vm4, %v5533_v39, %v9320_v19  ;;  %v3974_v6 = vunpack.c.l.b16 %v3718_v56  ;;  %v5329_v19 = vsel %vm1389_vm9, %v5327_v14, %v5328_v15  ;;  %v10257_v20 = vld [vmem:[#allocation18_spill] sm:$0xff]  ;;  %v4797_v23 = vrot.slane %v6581_v40, 1  ;;  %v10262_v14 = vld [vmem:[#allocation13_spill] sm:$0xff] }
 0x3f4   : > { %v5597_v26 = vsel %vm10252_vm7, %v5565_v5, %v10251_v27  ;;  %v5105_v38 = vrot.slane %v5103_v22, 1  ;;  %v5101_v39 = vshrl.u32 %v9471_v47, 16  ;;  %v4486_v61 = vunpack.c.l.b16 %v3782_v24  ;;  %v6568_v48 = vld [vmem:[#allocation2 + $0xa8] sm:$0xe]  ;;  %v9568_v22 = vld [vmem:[#allocation2 + $0xb4] sm:$0xf0]  ;;  %vm10272_vm7 = vmmov %vm10266_vm2 }
 0x3f5   : > { %4962 = vrot.lane.b32.xlu1 %v9365_v1, %s6849_s19  ;;  %v4285_v1 = vrot.slane %v6814_v51, 1  ;;  %v9521_v34 = vpack.c.b16 %v3974_v6, %v3974_v6  ;;  %v5471_v51 = vsel %vm2593_vm15, %v5439_v62, %v10257_v20  ;;  %v6569_v0 = vor.u32 %v6568_v48, %v6567_v4  ;;  %v6615_v48 = vld [vmem:[#allocation2 + $0xc0] sm:$0xf0] }
 0x3f6   : > { %5234 = vrot.lane.b32.xlu0 %v5183_v28, %s6855_s25  ;;  %6219 = vmatmul.msk.bf16.gmra.mxu3 %vm10249_vm3, %v5611_v12  ;;  %v4799_v28 = vsel %vm1389_vm9, %v4797_v23, %v4798_v7  ;;  %v10258_v12 = vld [vmem:[#allocation17_spill] sm:$0xff]  ;;  %v9551_v27 = vpack.c.b16 %v4486_v61, %v4486_v61  ;;  %v10267_v7 = vld [vmem:[#allocation7_spill] sm:$0xff]  ;;  %v9576_v23 = vld [vmem:[#allocation2 + $0xc0] sm:$0xff]  }
 0x3f7   : > { %4198 = vrot.lane.b32.xlu2 %v4087_v31, %s6851_s21  ;;  %v9480_v25 = vpop.permute.xlu1 %5214  ;;  %v4287_v53 = vsel %vm1389_vm9, %v4285_v1, %v4286_v18  ;;  %v4168_v54 = vshll.u32 %v9521_v34, 16  ;;  %v10260_v1 = vld [vmem:[#allocation10_spill] sm:$0xff]  ;;  %v4307_v20 = vrot.slane %v9521_v34, 1  ;;  %vm10271_vm3 = vmmov %vm10265_vm6 }
 0x3f8   : > { %v4717_v58 = vpop.permute.xlu0 %4716  ;;  %v5503_v18 = vsel %vm2626_vm0, %v5471_v51, %v10260_v1  ;;  %v6825_v61 = vld [vmem:[#allocation2 + $0xb4] sm:$0xe] }
 0x3f9   : > { %v9486_v36 = vpop.permute.xlu2 %4958  ;;  %v5485_v30 = vsel %vm2593_vm15, %v5453_v11, %v4717_v58  ;;  %v6820_v11 = vor.u32 %v6819_v55, %v9473_v42  ;;  %v5535_v15 = vsel %vm2659_vm1, %v5503_v18, %v10262_v14  ;;  %v4675_v42 = vshll.u32 %v9507_v3, 16  ;;  %v6822_v55 = vld [vmem:[#allocation2 + $0xb4] sm:$0xe] }
 0x3fa   : > { %v5517_v49 = vsel %vm2626_vm0, %v5485_v30, %v9236_v33  ;;  %v4991_v33 = vunpack.c.l.b16 %v3839_v60  ;;  %v5106_v30 = vor.u32 %v5105_v38, %v5101_v39  ;;  %v4170_v60 = vrot.slane %v4168_v54, 1 }
 0x3fb   : > { %v5549_v16 = vsel %vm2659_vm1, %v5517_v49, %v10254_v17  ;;  %v10263_v49 = vld [vmem:[#allocation12_spill] sm:$0xff]  ;;  %v5309_v2 = vrot.slane %v6820_v11, 1  ;;  %v4677_v17 = vrot.slane %v4675_v42, 1  ;;  %v5187_v54 = vshll.u32 %v9576_v23, 16  ;;  %v3719_v11 = vld [vmem:[#allocation2 + $0xbc] sm:$0x1] }
 0x3fc   : > { %v5007_v9 = vpack.c.b16 %v4991_v33, %v4991_v33  ;;  %v5581_v50 = vsel %vm2692_vm4, %v5549_v16, %v10256_v57  ;;  %v4171_v33 = vsel %vm1116_vm10, %v9312_v41, %v4170_v60  ;;  %v9566_v41 = vld [vmem:[#allocation2 + $0xb4] sm:$0xff]   ;;  %v4819_v42 = vrot.slane %v9551_v27, 1 }
 0x3fd   : > { %4326 = vrot.lane.b32.xlu1 %v4287_v53, %s6850_s20  ;;  %v5613_v31 = vsel %vm10259_vm11, %v5581_v50, %v10258_v12  ;;  %v3846_v53 = vld [vmem:[#allocation2 + $0xc8] sm:$0x1]  ;;  %v5189_v14 = vrot.slane %v5187_v54, 1  ;;  %vm10275_vm11 = vmmov %vm10266_vm2 }
 0x3fe   : > { %4438 = vrot.lane.b32.xlu0 %v9327_v63, %s6848_s18  ;;  %6212 = vmatmul.msk.bf16.gmra.mxu1 %vm10253_vm8, %v5597_v26  ;;  %v4598_v63 = vrot.slane %v4596_v10, 1  ;;  %v5108_v58 = vshll.u32 %v5007_v9, 16  ;;  %v5310_v56 = vrot.slane %v5007_v9, 1  ;;  %v4998_v6 = vunpack.c.l.b16 %v3846_v53  ;;  %v10268_v9 = vld [vmem:[#allocation15_spill] sm:$0xff]  ;;  %vm10273_vm8 = vmmov %vm10271_vm3 }
 0x3ff   : > { %5362 = vrot.lane.b32.xlu2 %v5329_v19, %s6854_s24  ;;  %v9512_v13 = vpop.permute.xlu1 %4704  ;;  %v5441_v57 = vsel %vm2560_vm14, %v10268_v9, %v10267_v7 }
 0x400   : > { %v4207_v43 = vpop.permute.xlu0 %4206  ;;  %v4599_v37 = vsel %vm1116_vm10, %v9358_v32, %v4598_v63  ;;  %v5110_v52 = vrot.slane %v5108_v58, 1  ;;  %v5311_v16 = vsel %vm1389_vm9, %v5309_v2, %v5310_v56  ;;  %v4673_v63 = vshrl.u32 %v9507_v3, 16 }
 0x401   : > { %v9519_v35 = vpop.permute.xlu2 %4322  ;;  %v5391_v10 = vsel %vm2494_vm12, %v10263_v49, %v4207_v43  ;;  %v4680_v43 = vshll.u32 %v9551_v27, 16  ;;  %v9583_v12 = vpack.c.b16 %v4998_v6, %v4998_v6  ;;  %v3783_v27 = vld [vmem:[#allocation2 + $0xc8] sm:$0x1] }
 0x402   : > { %v5111_v26 = vsel %vm1116_vm10, %v5106_v30, %v5110_v52 }
 0x403   : > { %v4682_v1 = vrot.slane %v4680_v43, 1 }
 0x405   : > { %4710 = vrot.lane.b32.xlu1 %v4599_v37, %s6853_s23  ;;  %v5473_v37 = vsel %vm2593_vm15, %v5441_v57, %v9512_v13  ;;  %v6823_v13 = vor.u32 %v6822_v55, %v9509_v45  ;;  %v10274_v55 = vld [vmem:[#allocation6_spill] sm:$0xff] }
 0x406   : > { %4950 = vrot.lane.b32.xlu0 %v9471_v47, %s6849_s19  ;;  %6220 = vmatmul.msk.bf16.gmra.mxu3 %vm10261_vm5, %v5613_v31  ;;  %v5567_v47 = vsel %vm2692_vm4, %v5535_v15, %v9480_v25  ;;  %v10264_v25 = vld [vmem:[#allocation16_spill] sm:$0xff]  ;;  %v4306_v31 = vrot.slane %v6569_v0, 1  ;;  %v4487_v0 = vunpack.c.l.b16 %v3783_v27  ;;  %vm10276_vm5 = vmmov %vm10271_vm3 }
 0x407   : > { %4838 = vrot.lane.b32.xlu2 %v4799_v28, %s6852_s22  ;;  %v4335_v32 = vpop.permute.xlu1 %4334  ;;  %v5599_v40 = vsel %vm10265_vm6, %v5567_v47, %v10264_v25  ;;  %v4678_v28 = vor.u32 %v4677_v17, %v4673_v63  ;;  %v10270_v15 = vld [vmem:[#allocation4_spill] sm:$0xff]  ;;  %v4818_v60 = vrot.slane %v6823_v13, 1  ;;  %v3975_v47 = vunpack.c.l.b16 %v3719_v11  ;;  %vm10277_vm6 = vmmov %vm10266_vm2 }
 0x408   : > { %v4719_v21 = vpop.permute.xlu0 %4718  ;;  %v5423_v19 = vsel %vm2527_vm13, %v5391_v10, %v4335_v32  ;;  %v4308_v39 = vsel %vm1389_vm9, %v4306_v31, %v4307_v20  ;;  %v5192_v32 = vshll.u32 %v9583_v12, 16  ;;  %v5185_v10 = vshrl.u32 %v9576_v23, 16  ;;  %v6841_v31 = vld [vmem:[#allocation2 + $0xcc] sm:$0xe] }
 0x409   : > { %v9544_v5 = vpop.permute.xlu2 %4706  ;;  %v5455_v50 = vsel %vm2560_vm14, %v5423_v19, %v9456_v44  ;;  %v10269_v44 = vld [vmem:[#allocation19_spill] sm:$0xff]  ;;  %v4683_v58 = vsel %vm1116_vm10, %v4678_v28, %v4682_v1  ;;  %v4820_v6 = vsel %vm1389_vm9, %v4818_v60, %v4819_v42  ;;  %v3991_v19 = vpack.c.b16 %v3975_v47, %v3975_v47  ;;  %v6591_v28 = vld [vmem:[#allocation2 + $0xc0] sm:$0xf0]  ;;  %v6592_v1 = vld [vmem:[#allocation2 + $0xc0] sm:$0xe] }
 0x40a   : > { %v5487_v38 = vsel %vm2593_vm15, %v5455_v50, %v4719_v21  ;;  %v5505_v34 = vsel %vm2626_vm0, %v5473_v37, %v10269_v44  ;;  %v5194_v52 = vrot.slane %v5192_v32, 1  ;;  %v5190_v4 = vor.u32 %v5189_v14, %v5185_v10  ;;  %v3847_v44 = vld [vmem:[#allocation2 + $0xd4] sm:$0x1] }
 0x40b   : > { %v5537_v45 = vsel %vm2659_vm1, %v5505_v34, %v10270_v15  ;;  %v5331_v63 = vrot.slane %v9583_v12, 1  ;;  %v4180_v43 = vshll.u32 %v3991_v19, 16  ;;  %v4310_v50 = vrot.slane %v3991_v19, 1 }
 0x40c   : > { %v5569_v2 = vsel %vm2692_vm4, %v5537_v45, %v9383_v29 }
 0x40d   : > { %5222 = vrot.lane.b32.xlu1 %v5111_v26, %s6855_s25  ;;  %v6616_v26 = vld [vmem:[#allocation2 + $0xc0] sm:$0xe]  ;;  %v5601_v25 = vsel %vm10273_vm8, %v5569_v2, %v9393_v46  ;;  %v4173_v46 = vshrl.u32 %v9566_v41, 16  ;;  %v4182_v54 = vrot.slane %v4180_v43, 1 }
 0x40e   : > { %4212 = vrot.lane.b32.xlu0 %v4171_v33, %s6851_s21  ;;  %6213 = vmatmul.msk.bf16.gmra.mxu1 %vm10266_vm2, %v5599_v40  ;;  %v5195_v33 = vsel %vm1116_vm10, %v5190_v4, %v5194_v52  ;;  %v6826_v40 = vor.u32 %v6825_v61, %v9568_v22  ;;  %v6617_v29 = vor.u32 %v6616_v26, %v6615_v48 }
 0x40f   : > { %5350 = vrot.lane.b32.xlu2 %v5311_v16, %s6854_s24  ;;  %v4847_v62 = vpop.permute.xlu1 %4846  ;;  %v6593_v61 = vor.u32 %v6592_v1, %v6591_v28 }
 0x410   : > { %v4195_v51 = vpop.permute.xlu0 %4194  ;;  %v5519_v18 = vsel %vm2626_vm0, %v5487_v38, %v4847_v62  ;;  %v4309_v57 = vrot.slane %v6826_v40, 1  ;;  %v4503_v38 = vpack.c.b16 %v4487_v0, %v4487_v0 }
 0x411   : > { %v9581_v24 = vpop.permute.xlu2 %5218  ;;  %v5551_v21 = vsel %vm2659_vm1, %v5519_v18, %v9486_v36  ;;  %v4175_v36 = vshll.u32 %v9566_v41, 16  ;;  %v5379_v17 = vsel %vm2494_vm12, %v10274_v55, %v4195_v51  ;;  %v5330_v51 = vrot.slane %v6617_v29, 1  ;;  %v3830_v18 = vld [vmem:[#allocation2 + $0xcc] sm:$0xff]  }
 0x412   : > { %v5411_v7 = vsel %vm2527_vm13, %v5379_v17, %v9519_v35  ;;  %v4311_v34 = vsel %vm1389_vm9, %v4309_v57, %v4310_v50  ;;  %v4692_v11 = vshll.u32 %v4503_v38, 16  ;;  %v4822_v15 = vrot.slane %v4503_v38, 1  ;;  %v6666_v17 = vld [vmem:[#allocation2 + $0x90] sm:$0xff]   ;;  %v6667_v38 = vld [vmem:[#allocation2 + $0x48] sm:$0xff]  }
 0x413   : > { %v4177_v16 = vrot.slane %v4175_v36, 1  ;;  %v5332_v12 = vsel %vm1389_vm9, %v5330_v51, %v5331_v63  ;;  %v4821_v60 = vrot.slane %v6593_v61, 1  ;;  %v5197_v48 = vshrl.u32 %v3830_v18, 16 }
 0x414   : > { %v4694_v45 = vrot.slane %v4692_v11, 1 }
 0x415   : > { %4340 = vrot.lane.b32.xlu1 %v4308_v39, %s6850_s20  ;;  %v4178_v37 = vor.u32 %v4177_v16, %v4173_v46  ;;  %v6840_v39 = vld [vmem:[#allocation2 + $0xcc] sm:$0xf0]  ;;  %v4823_v47 = vsel %vm1389_vm9, %v4821_v60, %v4822_v15 }
 0x416   : > { %4724 = vrot.lane.b32.xlu0 %v4683_v58, %s6853_s23 }
 0x417   : > { %4452 = vrot.lane.b32.xlu2 %v9507_v3, %s6848_s18  ;;  %v5231_v30 = vpop.permute.xlu1 %5230  ;;  %v4183_v13 = vsel %vm1116_vm10, %v4178_v37, %v4182_v54 }
 0x418   : > { %v5583_v56 = vsel %vm2692_vm4, %v5551_v21, %v5231_v30  ;;  %v5359_v53 = vpop.permute.xlu0 %5358  ;;  %v4999_v30 = vunpack.c.l.b16 %v3847_v44 }
 0x419   : > { %v9603_v49 = vpop.permute.xlu2 %4336  ;;  %v5615_v3 = vsel %vm10271_vm3, %v5583_v56, %v5359_v53  ;;  %v6842_v56 = vor.u32 %v6841_v31, %v6840_v39 }
 0x41a   : > { %6221 = vmatmul.msk.bf16.gmra.mxu3 %vm10272_vm7, %v5615_v3  ;;  %v5015_v42 = vpack.c.b16 %v4999_v30, %v4999_v30  ;;  %v4695_v3 = vsel %vm1116_vm10, %v5190_v4, %v4694_v45 }
 0x41b   : > { %v5333_v52 = vrot.slane %v6842_v56, 1 }
 0x41c   : > { %v5334_v2 = vrot.slane %v5015_v42, 1  ;;  %v5204_v26 = vshll.u32 %v5015_v42, 16 }
 0x41d   : > { %4852 = vrot.lane.b32.xlu1 %v4820_v6, %s6852_s22 }
 0x41e   : > { %5236 = vrot.lane.b32.xlu0 %v5195_v33, %s6855_s25  ;;  %6214 = vmatmul.msk.bf16.gmra.mxu1 %vm10275_vm11, %v5601_v25  ;;  %v5206_v19 = vrot.slane %v5204_v26, 1  ;;  %v5335_v33 = vsel %vm1389_vm9, %v5333_v52, %v5334_v2  ;;  %vm10278_vm9 = vmmov %vm10271_vm3 }
 0x41f   : > { %4964 = vrot.lane.b32.xlu2 %v9576_v23, %s6849_s19  ;;  %v4435_v62 = vpop.permute.xlu1 %4434 }
 0x420   : > { %v4835_v22 = vpop.permute.xlu0 %4834  ;;  %v5443_v20 = vsel %vm2560_vm14, %v5411_v7, %v4435_v62 }
 0x421   : > { %v9627_v9 = vpop.permute.xlu2 %4848  ;;  %v5475_v35 = vsel %vm2593_vm15, %v5443_v20, %v9544_v5 }
 0x422   : > { %v5507_v58 = vsel %vm2626_vm0, %v5475_v35, %v4835_v22 }
 0x425   : > { %5364 = vrot.lane.b32.xlu1 %v5332_v12, %s6854_s24 }
 0x426   : > { %4342 = vrot.lane.b32.xlu0 %v4311_v34, %s6850_s20  ;;  %s9970_s20 = scalar_lea.vmem %s10151_s3, %s6228_s14 }
 0x427   : > { %4214 = vrot.lane.b32.xlu2 %v4183_v13, %s6851_s21  ;;  %v4947_v32 = vpop.permute.xlu1 %4946 }
 0x428   : > { %v5347_v21 = vpop.permute.xlu0 %5346  ;;  %v5539_v14 = vsel %vm2659_vm1, %v5507_v58, %v4947_v32 }
 0x429   : > { %v5233_v5 = vpop.permute.xlu2 %5232  ;;  %v5571_v53 = vsel %vm2692_vm4, %v5539_v14, %v9581_v24  ;;  %v5199_v24 = vshll.u32 %v3830_v18, 16 }
 0x42a   : > { %v5603_v10 = vsel %vm10276_vm5, %v5571_v53, %v5347_v21 }
 0x42b   : > { %v5201_v6 = vrot.slane %v5199_v24, 1 }
 0x42d   : > { %4454 = vrot.lane.b32.xlu1 %v9576_v23, %s6848_s18  ;;  %v5202_v25 = vor.u32 %v5201_v6, %v5197_v48 }
 0x42e   : > { %4854 = vrot.lane.b32.xlu0 %v4823_v47, %s6852_s22  ;;  %6215 = vmatmul.msk.bf16.gmra.mxu1 %vm10277_vm6, %v5603_v10 }
 0x42f   : > { %4726 = vrot.lane.b32.xlu2 %v4695_v3, %s6853_s23  ;;  %v4209_v36 = vpop.permute.xlu1 %4208  ;;  %v5207_v4 = vsel %vm1116_vm10, %v5202_v25, %v5206_v19  ;;  %vm10279_vm10 = vmmov %vm10266_vm2 }
 0x430   : > { %v4449_v27 = vpop.permute.xlu0 %4448  ;;  %v5393_v29 = vsel %vm2494_vm12, %v6666_v17, %v4209_v36  ;;  %vm10280_vm2 = vmmov %vm10271_vm3  ;;  %v6668_v17 = vld [vmem:[#allocation2 + $0xa8] sm:$0xff]  }
 0x431   : > { %v4437_v23 = vpop.permute.xlu2 %4436  ;;  %v5425_v0 = vsel %vm2527_vm13, %v5393_v29, %v9603_v49  ;;  %vm10281_vm3 = vmmov %vm10277_vm6 }
 0x432   : > { %v5457_v62 = vsel %vm2560_vm14, %v5425_v0, %v4449_v27  ;;  %vm10282_vm7 = vmmov %vm10280_vm2 }
 0x433   : > { %vm10283_vm8 = vmmov %vm10281_vm3 }
 0x434   : > { %vm10284_vm11 = vmmov %vm10280_vm2 }
 0x435   : > { %4966 = vrot.lane.b32.xlu1 %v3830_v18, %s6849_s19  ;;  %vm10285_vm5 = vmmov %vm10281_vm3 }
 0x436   : > { %5366 = vrot.lane.b32.xlu0 %v5335_v33, %s6854_s24  ;;  %vm10286_vm6 = vmmov %vm10280_vm2 }
 0x437   : > { %v4721_v40 = vpop.permute.xlu1 %4720  ;;  %5238 = vrot.lane.b32.xlu2 %v5207_v4, %s6855_s25 }
 0x438   : > { %v4961_v55 = vpop.permute.xlu0 %4960  ;;  %v5489_v46 = vsel %vm2593_vm15, %v5457_v62, %v4721_v40 }
 0x439   : > { %v4949_v16 = vpop.permute.xlu2 %4948  ;;  %v5521_v22 = vsel %vm2626_vm0, %v5489_v46, %v9627_v9 }
 0x43a   : > { %v5553_v7 = vsel %vm2659_vm1, %v5521_v22, %v4961_v55 }
 0x43b   : > { %v5585_v20 = vsel %vm2692_vm4, %v5553_v7, %v5233_v5 }
 0x43f   : > { %v4197_v63 = vpop.permute.xlu1 %4196 }
 0x440   : > { %v4325_v43 = vpop.permute.xlu0 %4324  ;;  %v5381_v49 = vsel %vm2494_vm12, %v6667_v38, %v4197_v63 }
 0x441   : > { %v4211_v57 = vpop.permute.xlu2 %4210  ;;  %v5413_v28 = vsel %vm2527_vm13, %v5381_v49, %v4325_v43 }
 0x442   : > { %v5445_v31 = vsel %vm2560_vm14, %v5413_v28, %v4437_v23  ;;  %v5395_v11 = vsel %vm2494_vm12, %v9323_v59, %v4211_v57 }
 0x447   : > { %v5361_v50 = vpop.permute.xlu1 %5360 }
 0x448   : > { %v5617_v51 = vsel %vm10278_vm9, %v5585_v20, %v5361_v50  ;;  %v4709_v37 = vpop.permute.xlu0 %4708  ;;  %vm10287_vm9 = vmmov %vm10281_vm3 }
 0x449   : > { %6222 = vmatmul.msk.bf16.gmra.mxu3 %vm10279_vm10, %v5617_v51  ;;  %v4723_v12 = vpop.permute.xlu2 %4722  ;;  %v5477_v9 = vsel %vm2593_vm15, %v5445_v31, %v4709_v37  ;;  %vm10289_vm10 = vmmov %vm10281_vm3 }
 0x44f   : > { %v4837_v54 = vpop.permute.xlu1 %4836 }
 0x450   : > { %v5221_v1 = vpop.permute.xlu0 %5220  ;;  %v5509_v44 = vsel %vm2626_vm0, %v5477_v9, %v4837_v54 }
 0x451   : > { %v5541_v35 = vsel %vm2659_vm1, %v5509_v44, %v4949_v16  ;;  %v4199_v39 = vpop.permute.xlu2 %4198 }
 0x452   : > { %v5573_v34 = vsel %vm2692_vm4, %v5541_v35, %v5221_v1  ;;  %v5383_v3 = vsel %vm2494_vm12, %v9387_v8, %v4199_v39 }
 0x457   : > { %v5349_v18 = vpop.permute.xlu1 %5348 }
 0x458   : > { %v5605_v13 = vsel %vm10280_vm2, %v5573_v34, %v5349_v18  ;;  %v4339_v58 = vpop.permute.xlu0 %4338 }
 0x459   : > { %6216 = vmatmul.msk.bf16.gmra.mxu1 %vm10281_vm3, %v5605_v13  ;;  %v5427_v32 = vsel %vm2527_vm13, %v5395_v11, %v4339_v58  ;;  %v5363_v14 = vpop.permute.xlu2 %5362 }
 0x45b   : > { %v9689_v48 = vpop.f32.mrf.mxu1 }
 0x45f   : > { %v4451_v61 = vpop.permute.xlu1 %4450 }
 0x460   : > { %v4851_v30 = vpop.permute.xlu0 %4850  ;;  %v5459_v21 = vsel %vm2560_vm14, %v5427_v32, %v4451_v61 }
 0x461   : > { %v5491_v5 = vsel %vm2593_vm15, %v5459_v21, %v4723_v12  ;;  %v4839_v59 = vpop.permute.xlu2 %4838 }
 0x462   : > { %v5523_v15 = vsel %vm2626_vm0, %v5491_v5, %v4851_v30 }
 0x463   : > { %v9695_v4 = vpop.f32.mrf.mxu1 }
 0x467   : > { %v4963_v45 = vpop.permute.xlu1 %4962 }
 0x468   : > { %v5235_v56 = vpop.permute.xlu0 %5234  ;;  %v5555_v60 = vsel %vm2659_vm1, %v5523_v15, %v4963_v45 }
 0x469   : > { %v5587_v42 = vsel %vm2692_vm4, %v5555_v60, %v5235_v56  ;;  %v5351_v36 = vpop.permute.xlu2 %5350  ;;  %v9726_v30 = vpop.f32.mrf.mxu3 }
 0x46a   : > { %v5619_v53 = vsel %vm10282_vm7, %v5587_v42, %v5363_v14 }
 0x46b   : > { %6223 = vmatmul.msk.bf16.gmra.mxu3 %vm10283_vm8, %v5619_v53  ;;  %v9701_v63 = vpop.f32.mrf.mxu1 }
 0x46f   : > { %v4327_v47 = vpop.permute.xlu1 %4326 }
 0x470   : > { %v4439_v10 = vpop.permute.xlu0 %4438  ;;  %v5415_v52 = vsel %vm2527_vm13, %v5383_v3, %v4327_v47  ;;  %v5855_v3 = vmul.f32 %v9695_v4, %v9695_v4 }
 0x471   : > { %v5447_v2 = vsel %vm2560_vm14, %v5415_v52, %v4439_v10  ;;  %v4453_v33 = vpop.permute.xlu2 %4452  ;;  %v9730_v14 = vpop.f32.mrf.mxu3  ;;  %v5854_v52 = vmul.f32 %v9689_v48, %v9689_v48 }
 0x473   : > { %v9707_v51 = vpop.f32.mrf.mxu1 }
 0x477   : > { %v4711_v24 = vpop.permute.xlu1 %4710 }
 0x478   : > { %v4951_v26 = vpop.permute.xlu0 %4950  ;;  %v5479_v27 = vsel %vm2593_vm15, %v5447_v2, %v4711_v24  ;;  %v5856_v2 = vmul.f32 %v9701_v63, %v9701_v63  ;;  %v5784_v24 = vsel %vm2494_vm12, %v9689_v48, 0.0 }
 0x479   : > { %v5511_v23 = vsel %vm2626_vm0, %v5479_v27, %v4839_v59  ;;  %v4965_v0 = vpop.permute.xlu2 %4964  ;;  %v9734_v15 = vpop.f32.mrf.mxu3  ;;  %v5787_v27 = vsel %vm2494_vm12, %v9701_v63, 0.0 }
 0x47a   : > { %v5543_v6 = vsel %vm2659_vm1, %v5511_v23, %v4951_v26  ;;  %v5887_v26 = vsel %vm2494_vm12, %v5855_v3, 0.0  ;;  %v5857_v23 = vmul.f32 %v9707_v51, %v9707_v51 }
 0x47b   : > { %v9715_v54 = vpop.f32.mrf.mxu1 }
 0x47f   : > { %v5223_v19 = vpop.permute.xlu1 %5222 }
 0x480   : > { %v5575_v25 = vsel %vm2692_vm4, %v5543_v6, %v5223_v19  ;;  %v4213_v8 = vpop.permute.xlu0 %4212 }
 0x481   : > { %v5607_v40 = vsel %vm10284_vm11, %v5575_v25, %v5351_v36  ;;  %v5397_v29 = vsel %vm2494_vm12, %v6668_v17, %v4213_v8  ;;  %v4215_v50 = vpop.permute.xlu2 %4214  ;;  %v9738_v56 = vpop.f32.mrf.mxu3  ;;  %v5785_v36 = vsel %vm2494_vm12, %v9695_v4, 0.0  ;;  %v5889_v25 = vsel %vm2494_vm12, %v5856_v2, 0.0 }
 0x482   : > { %6217 = vmatmul.msk.bf16.gmra.mxu1 %vm10285_vm5, %v5607_v40  ;;  %v5399_v31 = vsel %vm2494_vm12, %v9566_v41, %v4215_v50  ;;  %v5786_v6 = vadd.f32 %v5785_v36, %v5784_v24  ;;  %v5789_v8 = vsel %vm2494_vm12, %v9707_v51, 0.0  ;;  %v5858_v40 = vmul.f32 %v9715_v54, %v9715_v54 }
 0x483   : > { %v9721_v32 = vpop.f32.mrf.mxu1 }
 0x484   : > { %v5788_v17 = vadd.f32 %v5787_v27, %v5786_v6 }
 0x487   : > { %v4341_v55 = vpop.permute.xlu1 %4340 }
 0x488   : > { %v4725_v16 = vpop.permute.xlu0 %4724  ;;  %v5429_v62 = vsel %vm2527_vm13, %v5397_v29, %v4341_v55  ;;  %v5891_v29 = vsel %vm2494_vm12, %v5857_v23, 0.0 }
 0x489   : > { %v5461_v46 = vsel %vm2560_vm14, %v5429_v62, %v4453_v33  ;;  %v4727_v12 = vpop.permute.xlu2 %4726  ;;  %v9742_v42 = vpop.f32.mrf.mxu3  ;;  %v5886_v33 = vsel %vm2494_vm12, %v5854_v52, 0.0 }
 0x48a   : > { %v5493_v43 = vsel %vm2593_vm15, %v5461_v46, %v4725_v16  ;;  %v5888_v55 = vadd.f32 %v5887_v26, %v5886_v33  ;;  %v5791_v16 = vsel %vm2494_vm12, %v9715_v54, 0.0 }
 0x48b   : > { %v9728_v21 = vpop.f32.mrf.mxu1 }
 0x48c   : > { %v5890_v46 = vadd.f32 %v5889_v25, %v5888_v55 }
 0x48e   : > { %v5892_v50 = vadd.f32 %v5891_v29, %v5890_v46 }
 0x48f   : > { %v4853_v22 = vpop.permute.xlu1 %4852 }
 0x490   : > { %v5237_v7 = vpop.permute.xlu0 %5236  ;;  %v5525_v57 = vsel %vm2626_vm0, %v5493_v43, %v4853_v22  ;;  %v5790_v43 = vadd.f32 %v5789_v8, %v5788_v17  ;;  %v5893_v22 = vsel %vm2494_vm12, %v5858_v40, 0.0 }
 0x491   : > { %v5557_v20 = vsel %vm2659_vm1, %v5525_v57, %v4965_v0  ;;  %v5239_v39 = vpop.permute.xlu2 %5238  ;;  %v9746_v59 = vpop.f32.mrf.mxu3  ;;  %v5859_v0 = vmul.f32 %v9721_v32, %v9721_v32  ;;  %v5860_v57 = vmul.f32 %v9728_v21, %v9728_v21 }
 0x492   : > { %v5589_v37 = vsel %vm2692_vm4, %v5557_v20, %v5237_v7  ;;  %v5793_v7 = vsel %vm2494_vm12, %v9721_v32, 0.0  ;;  %v5792_v20 = vadd.f32 %v5791_v16, %v5790_v43 }
 0x493   : > { %v9732_v5 = vpop.f32.mrf.mxu1 }
 0x497   : > { %v5365_v38 = vpop.permute.xlu1 %5364 }
 0x498   : > { %v5621_v49 = vsel %vm10286_vm6, %v5589_v37, %v5365_v38  ;;  %v4343_v28 = vpop.permute.xlu0 %4342  ;;  %v5895_v37 = vsel %vm2494_vm12, %v5859_v0, 0.0  ;;  %v5795_v38 = vsel %vm2494_vm12, %v9728_v21, 0.0 }
 0x499   : > { %6224 = vmatmul.msk.bf16.gmra.mxu3 %vm10287_vm9, %v5621_v49  ;;  %v5431_v9 = vsel %vm2527_vm13, %v5399_v31, %v4343_v28  ;;  %vm10288_vm13 = vmmov %vm10280_vm2  ;;  %v5861_v49 = vmul.f32 %v9732_v5, %v9732_v5  ;;  %v5894_v28 = vadd.f32 %v5893_v22, %v5892_v50  ;;  %v5794_v31 = vadd.f32 %v5793_v7, %v5792_v20 }
 0x49b   : > { %v9736_v45 = vpop.f32.mrf.mxu1 }
 0x49d   : > { %v9750_v10 = vpop.f32.mrf.mxu3 }
 0x49f   : > { %v4455_v1 = vpop.permute.xlu1 %4454 }
 0x4a0   : > { %v4855_v44 = vpop.permute.xlu0 %4854  ;;  %v5463_v35 = vsel %vm2560_vm14, %v5431_v9, %v4455_v1  ;;  %v5797_v9 = vsel %vm2494_vm12, %v9732_v5, 0.0  ;;  %v5862_v1 = vmul.f32 %v9736_v45, %v9736_v45 }
 0x4a1   : > { %v5495_v34 = vsel %vm2593_vm15, %v5463_v35, %v4727_v12  ;;  %v5897_v12 = vsel %vm2494_vm12, %v5860_v57, 0.0  ;;  %v5796_v35 = vadd.f32 %v5795_v38, %v5794_v31 }
 0x4a2   : > { %v5527_v18 = vsel %vm2626_vm0, %v5495_v34, %v4855_v44  ;;  %v5896_v44 = vadd.f32 %v5895_v37, %v5894_v28 }
 0x4a3   : > { %v9740_v60 = vpop.f32.mrf.mxu1 }
 0x4a4   : > { %v5801_v3 = vsel %vm2494_vm12, %v9740_v60, 0.0 }
 0x4a5   : > { %v9780_v62 = vpop.f32.mrf.mxu3 }
 0x4a7   : > { %v4967_v13 = vpop.permute.xlu1 %4966 }
 0x4a8   : > { %v5559_v58 = vsel %vm2659_vm1, %v5527_v18, %v4967_v13  ;;  %v5367_v11 = vpop.permute.xlu0 %5366  ;;  %v5899_v18 = vsel %vm2494_vm12, %v5861_v49, 0.0  ;;  %v5863_v13 = vmul.f32 %v9740_v60, %v9740_v60 }
 0x4a9   : > { %v5591_v41 = vsel %vm2692_vm4, %v5559_v58, %v5239_v39  ;;  %v5799_v39 = vsel %vm2494_vm12, %v9736_v45, 0.0 }
 0x4aa   : > { %v5623_v61 = vsel %vm10288_vm13, %v5591_v41, %v5367_v11  ;;  %v5898_v11 = vadd.f32 %v5897_v12, %v5896_v44  ;;  %v5798_v41 = vadd.f32 %v5797_v9, %v5796_v35  ;;  %v5903_v24 = vsel %vm2494_vm12, %v5863_v13, 0.0 }
 0x4ab   : > { %6225 = vmatmul.msk.bf16.gmra.mxu3 %vm10289_vm10, %v5623_v61  ;;  %v9744_v53 = vpop.f32.mrf.mxu1  ;;  %v5901_v61 = vsel %vm2494_vm12, %v5862_v1, 0.0  ;;  %v5870_v35 = vmul.f32 %v9726_v30, %v9726_v30 }
 0x4ac   : > { %v5864_v52 = vmul.f32 %v9744_v53, %v9744_v53  ;;  %v5900_v36 = vadd.f32 %v5899_v18, %v5898_v11  ;;  %v5800_v2 = vadd.f32 %v5799_v39, %v5798_v41  ;;  %v5803_v26 = vsel %vm2494_vm12, %v9744_v53, 0.0 }
 0x4ad   : > { %v5815_v41 = vsel %vm2494_vm12, %v9726_v30, 0.0 }
 0x4ae   : > { %v5902_v23 = vadd.f32 %v5901_v61, %v5900_v36  ;;  %v5802_v6 = vadd.f32 %v5801_v3, %v5800_v2  ;;  %v5905_v33 = vsel %vm2494_vm12, %v5864_v52, 0.0  ;;  %v5871_v61 = vmul.f32 %v9730_v14, %v9730_v14 }
 0x4b0   : > { %v5904_v40 = vadd.f32 %v5903_v24, %v5902_v23  ;;  %v5804_v55 = vadd.f32 %v5803_v26, %v5802_v6  ;;  %v5917_v24 = vsel %vm2494_vm12, %v5870_v35, 0.0  ;;  %v5817_v26 = vsel %vm2494_vm12, %v9730_v14, 0.0 }
 0x4b1   : > { %v5827_v35 = vsel %vm2494_vm12, %v9750_v10, 0.0 }
 0x4b2   : > { %v5906_v46 = vadd.f32 %v5905_v33, %v5904_v40  ;;  %v5919_v33 = vsel %vm2494_vm12, %v5871_v61, 0.0  ;;  %v5829_v61 = vsel %vm2494_vm12, %v9780_v62, 0.0 }
 0x4b3   : > { %v9748_v47 = vpop.f32.mrf.mxu1 }
 0x4b4   : > { %v5865_v27 = vmul.f32 %v9748_v47, %v9748_v47  ;;  %v5805_v25 = vsel %vm2494_vm12, %v9748_v47, 0.0 }
 0x4b5   : > { %v5806_v43 = vadd.f32 %v5805_v25, %v5804_v55  ;;  %v5819_v25 = vsel %vm2494_vm12, %v9734_v15, 0.0 }
 0x4b6   : > { %v5907_v29 = vsel %vm2494_vm12, %v5865_v27, 0.0  ;;  %v5872_v27 = vmul.f32 %v9734_v15, %v9734_v15 }
 0x4b7   : > { %v5908_v20 = vadd.f32 %v5907_v29, %v5906_v46 }
 0x4b8   : > { %v5921_v29 = vsel %vm2494_vm12, %v5872_v27, 0.0 }
 0x4cc   : > { %v9804_v58 = vpop.f32.mrf.mxu3 }
 0x4cd   : > { %v5831_v27 = vsel %vm2494_vm12, %v9804_v58, 0.0 }
 0x4d4   : > { %v9828_v22 = vpop.f32.mrf.mxu3 }
 0x4d6   : > { %v9767_v19 = vpop.f32.mrf.mxu1 }
 0x4d7   : > { %v5866_v8 = vmul.f32 %v9767_v19, %v9767_v19  ;;  %v5807_v16 = vsel %vm2494_vm12, %v9767_v19, 0.0 }
 0x4d8   : > { %v5808_v37 = vadd.f32 %v5807_v16, %v5806_v43  ;;  %v5821_v16 = vsel %vm2494_vm12, %v9738_v56, 0.0 }
 0x4d9   : > { %v5909_v7 = vsel %vm2494_vm12, %v5866_v8, 0.0  ;;  %v5873_v8 = vmul.f32 %v9738_v56, %v9738_v56 }
 0x4da   : > { %v5910_v28 = vadd.f32 %v5909_v7, %v5908_v20 }
 0x4db   : > { %v5923_v7 = vsel %vm2494_vm12, %v5873_v8, 0.0  ;;  %v5833_v8 = vsel %vm2494_vm12, %v9828_v22, 0.0 }
 0x4de   : > { %v9797_v34 = vpop.f32.mrf.mxu1 }
 0x4df   : > { %v5867_v0 = vmul.f32 %v9797_v34, %v9797_v34  ;;  %v5809_v57 = vsel %vm2494_vm12, %v9797_v34, 0.0 }
 0x4e0   : > { %v5810_v31 = vadd.f32 %v5809_v57, %v5808_v37  ;;  %v5823_v57 = vsel %vm2494_vm12, %v9742_v42, 0.0 }
 0x4e1   : > { %v5911_v38 = vsel %vm2494_vm12, %v5867_v0, 0.0  ;;  %v5874_v0 = vmul.f32 %v9742_v42, %v9742_v42 }
 0x4e2   : > { %v5912_v9 = vadd.f32 %v5911_v38, %v5910_v28 }
 0x4e3   : > { %v5925_v38 = vsel %vm2494_vm12, %v5874_v0, 0.0 }
 0x4ee   : > { %v9851_v3 = vpop.f32.mrf.mxu3 }
 0x4f6   : > { %v9877_v28 = vpop.f32.mrf.mxu3 }
 0x4ff   : > { %v9821_v17 = vpop.f32.mrf.mxu1 }
 0x500   : > { %v5868_v50 = vmul.f32 %v9821_v17, %v9821_v17  ;;  %v5811_v49 = vsel %vm2494_vm12, %v9821_v17, 0.0 }
 0x501   : > { %v5812_v1 = vadd.f32 %v5811_v49, %v5810_v31  ;;  %v5825_v49 = vsel %vm2494_vm12, %v9746_v59, 0.0  ;;  %v5876_v31 = vmul.f32 %v9750_v10, %v9750_v10 }
 0x502   : > { %v5913_v12 = vsel %vm2494_vm12, %v5868_v50, 0.0  ;;  %v5875_v50 = vmul.f32 %v9746_v59, %v9746_v59 }
 0x503   : > { %v5914_v13 = vadd.f32 %v5913_v12, %v5912_v9 }
 0x507   : > { %v9839_v44 = vpop.f32.mrf.mxu1 }
 0x508   : > { %v5813_v18 = vsel %vm2494_vm12, %v9839_v44, 0.0  ;;  %v5869_v39 = vmul.f32 %v9839_v44, %v9839_v44 }
 0x509   : > { %v5814_v11 = vadd.f32 %v5813_v18, %v5812_v1  ;;  %v5927_v1 = vsel %vm2494_vm12, %v5875_v50, 0.0 }
 0x50a   : > { %v5915_v52 = vsel %vm2494_vm12, %v5869_v39, 0.0 }
 0x50b   : > { %v5816_v36 = vadd.f32 %v5815_v41, %v5814_v11  ;;  %v5916_v2 = vadd.f32 %v5915_v52, %v5914_v13  ;;  %v5929_v13 = vsel %vm2494_vm12, %v5876_v31, 0.0  ;;  %v5877_v11 = vmul.f32 %v9780_v62, %v9780_v62 }
 0x50d   : > { %v5818_v23 = vadd.f32 %v5817_v26, %v5816_v36  ;;  %v5918_v6 = vadd.f32 %v5917_v24, %v5916_v2  ;;  %v5931_v2 = vsel %vm2494_vm12, %v5877_v11, 0.0  ;;  %v5878_v24 = vmul.f32 %v9804_v58, %v9804_v58 }
 0x50f   : > { %v5820_v40 = vadd.f32 %v5819_v25, %v5818_v23  ;;  %v5920_v55 = vadd.f32 %v5919_v33, %v5918_v6  ;;  %v5933_v6 = vsel %vm2494_vm12, %v5878_v24, 0.0  ;;  %v5879_v33 = vmul.f32 %v9828_v22, %v9828_v22 }
 0x511   : > { %v5822_v46 = vadd.f32 %v5821_v16, %v5820_v40  ;;  %v5922_v43 = vadd.f32 %v5921_v29, %v5920_v55  ;;  %v5935_v55 = vsel %vm2494_vm12, %v5879_v33, 0.0  ;;  %v5880_v29 = vmul.f32 %v9851_v3, %v9851_v3 }
 0x513   : > { %v5824_v20 = vadd.f32 %v5823_v57, %v5822_v46  ;;  %v5924_v37 = vadd.f32 %v5923_v7, %v5922_v43  ;;  %v5835_v46 = vsel %vm2494_vm12, %v9851_v3, 0.0  ;;  %v5937_v7 = vsel %vm2494_vm12, %v5880_v29, 0.0 }
 0x514   : > { %v5881_v57 = vmul.f32 %v9877_v28, %v9877_v28 }
 0x515   : > { %v5826_v12 = vadd.f32 %v5825_v49, %v5824_v20  ;;  %v5926_v9 = vadd.f32 %v5925_v38, %v5924_v37  ;;  %v5837_v20 = vsel %vm2494_vm12, %v9877_v28, 0.0 }
 0x516   : > { %v5939_v38 = vsel %vm2494_vm12, %v5881_v57, 0.0 }
 0x517   : > { %v5928_v18 = vadd.f32 %v5927_v1, %v5926_v9  ;;  %v5828_v39 = vadd.f32 %v5827_v35, %v5826_v12 }
 0x519   : > { %v5930_v41 = vadd.f32 %v5929_v13, %v5928_v18  ;;  %v5830_v36 = vadd.f32 %v5829_v61, %v5828_v39 }
 0x51b   : > { %v5932_v26 = vadd.f32 %v5931_v2, %v5930_v41  ;;  %v5832_v23 = vadd.f32 %v5831_v27, %v5830_v36 }
 0x51c   : > { %v9889_v52 = vpop.f32.mrf.mxu3 }
 0x51d   : > { %v5934_v25 = vadd.f32 %v5933_v6, %v5932_v26  ;;  %v5834_v40 = vadd.f32 %v5833_v8, %v5832_v23  ;;  %v5882_v49 = vmul.f32 %v9889_v52, %v9889_v52  ;;  %v5839_v9 = vsel %vm2494_vm12, %v9889_v52, 0.0 }
 0x51f   : > { %v5936_v16 = vadd.f32 %v5935_v55, %v5934_v25  ;;  %v5836_v43 = vadd.f32 %v5835_v46, %v5834_v40  ;;  %v5941_v18 = vsel %vm2494_vm12, %v5882_v49, 0.0  ;;  %v10290_v49 = vld [vmem:[#allocation3_spill] sm:$0xff] }
 0x521   : > { %v5938_v50 = vadd.f32 %v5937_v7, %v5936_v16  ;;  %v5838_v37 = vadd.f32 %v5837_v20, %v5836_v43 }
 0x523   : > { %v5940_v31 = vadd.f32 %v5939_v38, %v5938_v50  ;;  %v5840_v35 = vadd.f32 %v5839_v9, %v5838_v37 }
 0x524   : > { %v9904_v0 = vpop.f32.mrf.mxu3 }
 0x525   : > { %v5883_v1 = vmul.f32 %v9904_v0, %v9904_v0  ;;  %v5841_v39 = vsel %vm2494_vm12, %v9904_v0, 0.0  ;;  %v5942_v11 = vadd.f32 %v5941_v18, %v5940_v31 }
 0x526   : > { %v5842_v36 = vadd.f32 %v5841_v39, %v5840_v35 }
 0x527   : > { %v5943_v41 = vsel %vm2494_vm12, %v5883_v1, 0.0 }
 0x528   : > { %v5944_v24 = vadd.f32 %v5943_v41, %v5942_v11 }
 0x52e   : > { %v9916_v12 = vpop.f32.mrf.mxu3 }
 0x52f   : > { %v5884_v13 = vmul.f32 %v9916_v12, %v9916_v12  ;;  %v5843_v61 = vsel %vm2494_vm12, %v9916_v12, 0.0 }
 0x530   : > { %v5844_v26 = vadd.f32 %v5843_v61, %v5842_v36 }
 0x531   : > { %v5945_v2 = vsel %vm2494_vm12, %v5884_v13, 0.0 }
 0x532   : > { %v5946_v33 = vadd.f32 %v5945_v2, %v5944_v24 }
 0x536   : > { %v9931_v27 = vpop.f32.mrf.mxu3 }
 0x537   : > { %v5845_v23 = vsel %vm2494_vm12, %v9931_v27, 0.0  ;;  %v5885_v6 = vmul.f32 %v9931_v27, %v9931_v27 }
 0x538   : > { %v5846_v25 = vadd.f32 %v5845_v23, %v5844_v26 }
 0x539   : > { %v5947_v8 = vsel %vm2494_vm12, %v5885_v6, 0.0 }
 0x53a   : > { %v5847_v40 = vrot.slane %v5846_v25, 4  ;;  %v5948_v55 = vadd.f32 %v5947_v8, %v5946_v33 }
 0x53c   : > { %v5848_v29 = vadd.f32 %v5847_v40, %v5846_v25  ;;  %v5949_v16 = vrot.slane %v5948_v55, 4 }
 0x53e   : > { %v5849_v46 = vrot.slane %v5848_v29, 2  ;;  %v5950_v43 = vadd.f32 %v5949_v16, %v5948_v55 }
 0x540   : > { %v5850_v7 = vadd.f32 %v5849_v46, %v5848_v29  ;;  %v5951_v57 = vrot.slane %v5950_v43, 2  ;;  %v6669_v46 = vld [vmem:[%s6902_s17] sm:$0xff] }
 0x542   : > { %v5851_v50 = vrot.slane %v5850_v7, 1  ;;  %v5952_v20 = vadd.f32 %v5951_v57, %v5950_v43 }
 0x544   : > { %v5852_v37 = vadd.f32 %v5851_v50, %v5850_v7  ;;  %v5953_v38 = vrot.slane %v5952_v20, 1  ;;  %v6670_v7 = vld [vmem:[%s6902_s17 + $0x8] sm:$0xff]  ;;  %v6671_v50 = vld [vmem:[%s6902_s17 + $0x10] sm:$0xff] }
 0x546   : > { %v9939_v31 = vmul.f32 %v5852_v37, %v10290_v49  ;;  %v5954_v9 = vadd.f32 %v5953_v38, %v5952_v20 }
 0x548   : > { %v5955_v1 = vmul.f32 %v5954_v9, %v10290_v49  ;;  %v5956_v35 = vmul.f32 %v9939_v31, %v9939_v31  ;;  %v5959_v23 = vsub.f32 %v9689_v48, %v9939_v31  ;;  %v5960_v6 = vsub.f32 %v9695_v4, %v9939_v31 }
 0x549   : > { %v5961_v33 = vsub.f32 %v9701_v63, %v9939_v31  ;;  %v5962_v25 = vsub.f32 %v9707_v51, %v9939_v31  ;;  %v5963_v8 = vsub.f32 %v9715_v54, %v9939_v31  ;;  %v5964_v4 = vsub.f32 %v9721_v32, %v9939_v31 }
 0x54a   : > { %v5957_v18 = vsub.f32 %v5955_v1, %v5956_v35  ;;  %v5965_v63 = vsub.f32 %v9728_v21, %v9939_v31  ;;  %v5966_v54 = vsub.f32 %v9732_v5, %v9939_v31  ;;  %v5967_v32 = vsub.f32 %v9736_v45, %v9939_v31  ;;  %v6672_v45 = vld [vmem:[%s6902_s17 + $0x18] sm:$0xff]  ;;  %v6673_v1 = vld [vmem:[%s6902_s17 + $0x20] sm:$0xff] }
 0x54b   : > { %v5968_v5 = vsub.f32 %v9740_v60, %v9939_v31  ;;  %v5969_v49 = vsub.f32 %v9744_v53, %v9939_v31  ;;  %v5970_v60 = vsub.f32 %v9748_v47, %v9939_v31  ;;  %v5971_v53 = vsub.f32 %v9767_v19, %v9939_v31 }
 0x54c   : > { %v5958_v39 = vmax.f32 %v5957_v18, 0.0  ;;  %v5972_v47 = vsub.f32 %v9797_v34, %v9939_v31  ;;  %v5973_v19 = vsub.f32 %v9821_v17, %v9939_v31  ;;  %v5974_v34 = vsub.f32 %v9839_v44, %v9939_v31 }
 0x54d   : > { %v5975_v17 = vsub.f32 %v9726_v30, %v9939_v31  ;;  %v5976_v44 = vsub.f32 %v9730_v14, %v9939_v31  ;;  %v5977_v30 = vsub.f32 %v9734_v15, %v9939_v31  ;;  %v5978_v14 = vsub.f32 %v9738_v56, %v9939_v31 }
 0x54e   : > { %v5991_v13 = vadd.f32 1e-05, %v5958_v39  ;;  %v6674_v39 = vld [vmem:[%s6902_s17 + $0x28] sm:$0xff]  ;;  %v5979_v15 = vsub.f32 %v9742_v42, %v9939_v31  ;;  %v5980_v56 = vsub.f32 %v9746_v59, %v9939_v31  ;;  %v5981_v42 = vsub.f32 %v9750_v10, %v9939_v31 }
 0x54f   : > { %v5982_v59 = vsub.f32 %v9780_v62, %v9939_v31  ;;  %v5983_v10 = vsub.f32 %v9804_v58, %v9939_v31  ;;  %v5984_v62 = vsub.f32 %v9828_v22, %v9939_v31  ;;  %v5985_v58 = vsub.f32 %v9851_v3, %v9939_v31 }
 0x550   : > { %6650 = vrsqrt.f32 %v5991_v13  ;;  %vm5998_vm15 = vweird.f32 %v5991_v13  ;;  %v5986_v22 = vsub.f32 %v9877_v28, %v9939_v31  ;;  %v5987_v3 = vsub.f32 %v9889_v52, %v9939_v31 }
 0x551   : > { %v5988_v28 = vsub.f32 %v9904_v0, %v9939_v31  ;;  %v5989_v52 = vsub.f32 %v9916_v12, %v9939_v31  ;;  %v5990_v0 = vsub.f32 %v9931_v27, %v9939_v31  ;;  %v6696_v31 = vld [vmem:[%s6902_s17 + $0xd8] sm:$0xff] }
 0x556   : > { %v6651_v11 = vpop.eup %6650 }
 0x557   : > { %v5993_v41 = vmul.f32 %v6651_v11, %v5991_v13  ;;  %vm5999_vm14 = vweird.f32 %v6651_v11 }
 0x558   : > { %vm6000_vm0 = vmor %vm5998_vm15, %vm5999_vm14 }
 0x559   : > { %v5994_v61 = vmul.f32 %v6651_v11, %v5993_v41  ;;  %v6675_v41 = vld [vmem:[%s6902_s17 + $0x30] sm:$0xff] }
 0x55b   : > { %v5995_v36 = vmul.f32 0.5, %v5994_v61 }
 0x55d   : > { %v5996_v2 = vsub.f32 1.5, %v5995_v36 }
 0x55f   : > { %v5997_v24 = vmul.f32 %v6651_v11, %v5996_v2  ;;  %v6676_v2 = vld [vmem:[%s6902_s17 + $0x38] sm:$0xff] }
 0x561   : > { %v9944_v26 = vsel %vm6000_vm0, %v6651_v11, %v5997_v24 }
 0x562   : > { %v6002_v40 = vmul.f32 %v9944_v26, %v5959_v23  ;;  %v6003_v55 = vmul.f32 %v9944_v26, %v5960_v6  ;;  %v6004_v48 = vmul.f32 %v9944_v26, %v5961_v33  ;;  %v6005_v29 = vmul.f32 %v9944_v26, %v5962_v25  ;;  %v6677_v6 = vld [vmem:[%s6902_s17 + $0x40] sm:$0xff] }
 0x563   : > { %v6006_v51 = vmul.f32 %v9944_v26, %v5963_v8  ;;  %v6007_v16 = vmul.f32 %v9944_v26, %v5964_v4  ;;  %v6008_v21 = vmul.f32 %v9944_v26, %v5965_v63  ;;  %v6009_v37 = vmul.f32 %v9944_v26, %v5966_v54  ;;  %v6678_v8 = vld [vmem:[%s6902_s17 + $0x48] sm:$0xff]  ;;  %v6680_v63 = vld [vmem:[%s6902_s17 + $0x58] sm:$0xff] }
 0x564   : > { %v6034_v43 = vadd.f32 %v6669_v46, %v6002_v40  ;;  %v6035_v57 = vadd.f32 %v6670_v7, %v6003_v55  ;;  %v6036_v20 = vadd.f32 %v6671_v50, %v6004_v48  ;;  %v6037_v38 = vadd.f32 %v6672_v45, %v6005_v29  ;;  %v6679_v48 = vld [vmem:[%s6902_s17 + $0x50] sm:$0xff]  ;;  %v6682_v46 = vld [vmem:[%s6902_s17 + $0x68] sm:$0xff] }
 0x565   : > { %v6010_v9 = vmul.f32 %v9944_v26, %v5967_v32  ;;  %v6038_v35 = vadd.f32 %v6673_v1, %v6006_v51  ;;  %v6011_v18 = vmul.f32 %v9944_v26, %v5968_v5  ;;  %v6039_v13 = vadd.f32 %v6674_v39, %v6007_v16  ;;  %v6681_v32 = vld [vmem:[%s6902_s17 + $0x60] sm:$0xff]  ;;  %v6684_v5 = vld [vmem:[%s6902_s17 + $0x78] sm:$0xff]  ;;  %v6686_v1 = vld [vmem:[%s6902_s17 + $0x88] sm:$0xff] }
 0x566   : > { %6066 = vst.msk [vmem:[%s9970_s20] sm:$0xff] %vm2494_vm12, %v6034_v43  ;;  %v6012_v11 = vmul.f32 %v9944_v26, %v5969_v49  ;;  %v6040_v61 = vadd.f32 %v6675_v41, %v6008_v21  ;;  %v6013_v36 = vmul.f32 %v9944_v26, %v5970_v60  ;;  %v6041_v24 = vadd.f32 %v6676_v2, %v6009_v37  ;;  %v6690_v2 = vld [vmem:[%s6902_s17 + $0xa8] sm:$0xff] }
 0x567   : > { %6067 = vst.msk [vmem:[%s9970_s20 + $0x8] sm:$0xff] %vm2494_vm12, %v6035_v57  ;;  %v6014_v23 = vmul.f32 %v9944_v26, %v5971_v53  ;;  %v6042_v33 = vadd.f32 %v6677_v6, %v6010_v9  ;;  %v6015_v25 = vmul.f32 %v9944_v26, %v5972_v47  ;;  %v6043_v40 = vadd.f32 %v6678_v8, %v6011_v18  ;;  %v6683_v57 = vld [vmem:[%s6902_s17 + $0x70] sm:$0xff]  ;;  %v6688_v53 = vld [vmem:[%s6902_s17 + $0x98] sm:$0xff] }
 0x568   : > { %6068 = vst.msk [vmem:[%s9970_s20 + $0x10] sm:$0xff] %vm2494_vm12, %v6036_v20  ;;  %v6016_v55 = vmul.f32 %v9944_v26, %v5973_v19  ;;  %v6044_v4 = vadd.f32 %v6679_v48, %v6012_v11  ;;  %v6017_v29 = vmul.f32 %v9944_v26, %v5974_v34  ;;  %v6045_v51 = vadd.f32 %v6680_v63, %v6013_v36  ;;  %v6687_v18 = vld [vmem:[%s6902_s17 + $0x90] sm:$0xff]  ;;  %v6692_v34 = vld [vmem:[%s6902_s17 + $0xb8] sm:$0xff]  ;;  %v6694_v48 = vld [vmem:[%s6902_s17 + $0xc8] sm:$0xff] }
 0x569   : > { %6069 = vst.msk [vmem:[%s9970_s20 + $0x18] sm:$0xff] %vm2494_vm12, %v6037_v38  ;;  %v6018_v54 = vmul.f32 %v9944_v26, %v5975_v17  ;;  %v6046_v16 = vadd.f32 %v6681_v32, %v6014_v23  ;;  %v6019_v21 = vmul.f32 %v9944_v26, %v5976_v44  ;;  %v6047_v43 = vadd.f32 %v6682_v46, %v6015_v25  ;;  %v6685_v38 = vld [vmem:[%s6902_s17 + $0x80] sm:$0xff]  ;;  %v6691_v23 = vld [vmem:[%s6902_s17 + $0xb0] sm:$0xff] }
 0x56a   : > { %6070 = vst.msk [vmem:[%s9970_s20 + $0x20] sm:$0xff] %vm2494_vm12, %v6038_v35  ;;  %v6020_v7 = vmul.f32 %v9944_v26, %v5977_v30  ;;  %v6048_v50 = vadd.f32 %v6683_v57, %v6016_v55  ;;  %v6021_v20 = vmul.f32 %v9944_v26, %v5978_v14  ;;  %v6049_v37 = vadd.f32 %v6684_v5, %v6017_v29  ;;  %v6695_v44 = vld [vmem:[%s6902_s17 + $0xd0] sm:$0xff] }
 0x56b   : > { %6071 = vst.msk [vmem:[%s9970_s20 + $0x28] sm:$0xff] %vm2494_vm12, %v6039_v13  ;;  %v6022_v45 = vmul.f32 %v9944_v26, %v5979_v15  ;;  %v6050_v49 = vadd.f32 %v6685_v38, %v6018_v54  ;;  %v6023_v9 = vmul.f32 %v9944_v26, %v5980_v56  ;;  %v6051_v35 = vadd.f32 %v6686_v1, %v6019_v21  ;;  %v6698_v54 = vld [vmem:[%s6902_s17 + $0xe8] sm:$0xff] }
 0x56c   : > { %6072 = vst.msk [vmem:[%s9970_s20 + $0x30] sm:$0xff] %vm2494_vm12, %v6040_v61  ;;  %v6024_v60 = vmul.f32 %v9944_v26, %v5981_v42  ;;  %v6052_v39 = vadd.f32 %v6687_v18, %v6020_v7  ;;  %v6025_v13 = vmul.f32 %v9944_v26, %v5982_v59  ;;  %v6053_v11 = vadd.f32 %v6688_v53, %v6021_v20  ;;  %v6689_v61 = vld [vmem:[%s6902_s17 + $0xa0] sm:$0xff] }
 0x56d   : > { %6073 = vst.msk [vmem:[%s9970_s20 + $0x38] sm:$0xff] %vm2494_vm12, %v6041_v24  ;;  %v6026_v41 = vmul.f32 %v9944_v26, %v5983_v10  ;;  %v6054_v47 = vadd.f32 %v6689_v61, %v6022_v45  ;;  %v6027_v36 = vmul.f32 %v9944_v26, %v5984_v62  ;;  %v6055_v24 = vadd.f32 %v6690_v2, %v6023_v9 }
 0x56e   : > { %6074 = vst.msk [vmem:[%s9970_s20 + $0x40] sm:$0xff] %vm2494_vm12, %v6042_v33  ;;  %v6028_v19 = vmul.f32 %v9944_v26, %v5985_v58  ;;  %v6056_v6 = vadd.f32 %v6691_v23, %v6024_v60  ;;  %v6029_v33 = vmul.f32 %v9944_v26, %v5986_v22  ;;  %v6057_v25 = vadd.f32 %v6692_v34, %v6025_v13 }
 0x56f   : > { %6075 = vst.msk [vmem:[%s9970_s20 + $0x48] sm:$0xff] %vm2494_vm12, %v6043_v40  ;;  %v6030_v8 = vmul.f32 %v9944_v26, %v5987_v3  ;;  %v6693_v40 = vld [vmem:[%s6902_s17 + $0xc0] sm:$0xff]  ;;  %v6031_v55 = vmul.f32 %v9944_v26, %v5988_v28  ;;  %v6032_v12 = vmul.f32 %v9944_v26, %v5989_v52  ;;  %v6033_v27 = vmul.f32 %v9944_v26, %v5990_v0  ;;  %v6700_v26 = vld [vmem:[%s6902_s17 + $0xf8] sm:$0xff] }
 0x570   : > { %6076 = vst.msk [vmem:[%s9970_s20 + $0x50] sm:$0xff] %vm2494_vm12, %v6044_v4  ;;  %v6058_v17 = vadd.f32 %v6693_v40, %v6026_v41  ;;  %v6059_v4 = vadd.f32 %v6694_v48, %v6027_v36  ;;  %v6060_v29 = vadd.f32 %v6695_v44, %v6028_v19  ;;  %v6061_v63 = vadd.f32 %v6696_v31, %v6029_v33 }
 0x571   : > { %6077 = vst.msk [vmem:[%s9970_s20 + $0x58] sm:$0xff] %vm2494_vm12, %v6045_v51  ;;  %v6697_v51 = vld [vmem:[%s6902_s17 + $0xe0] sm:$0xff]  ;;  %v6063_v32 = vadd.f32 %v6698_v54, %v6031_v55  ;;  %v6065_v21 = vadd.f32 %v6700_v26, %v6033_v27 }
 0x572   : > { %6078 = vst.msk [vmem:[%s9970_s20 + $0x60] sm:$0xff] %vm2494_vm12, %v6046_v16  ;;  %v6062_v30 = vadd.f32 %v6697_v51, %v6030_v8  ;;  %v6699_v16 = vld [vmem:[%s6902_s17 + $0xf0] sm:$0xff] }
 0x573   : > { %6079 = vst.msk [vmem:[%s9970_s20 + $0x68] sm:$0xff] %vm2494_vm12, %v6047_v43  ;;  %v6064_v14 = vadd.f32 %v6699_v16, %v6032_v12 }
 0x574   : > { %6080 = vst.msk [vmem:[%s9970_s20 + $0x70] sm:$0xff] %vm2494_vm12, %v6048_v50 }
 0x575   : > { %6081 = vst.msk [vmem:[%s9970_s20 + $0x78] sm:$0xff] %vm2494_vm12, %v6049_v37 }
 0x576   : > { %6082 = vst.msk [vmem:[%s9970_s20 + $0x80] sm:$0xff] %vm2494_vm12, %v6050_v49 }
 0x577   : > { %6083 = vst.msk [vmem:[%s9970_s20 + $0x88] sm:$0xff] %vm2494_vm12, %v6051_v35 }
 0x578   : > { %6084 = vst.msk [vmem:[%s9970_s20 + $0x90] sm:$0xff] %vm2494_vm12, %v6052_v39 }
 0x579   : > { %6085 = vst.msk [vmem:[%s9970_s20 + $0x98] sm:$0xff] %vm2494_vm12, %v6053_v11 }
 0x57a   : > { %6086 = vst.msk [vmem:[%s9970_s20 + $0xa0] sm:$0xff] %vm2494_vm12, %v6054_v47 }
 0x57b   : > { %6087 = vst.msk [vmem:[%s9970_s20 + $0xa8] sm:$0xff] %vm2494_vm12, %v6055_v24 }
 0x57c   : > { %6088 = vst.msk [vmem:[%s9970_s20 + $0xb0] sm:$0xff] %vm2494_vm12, %v6056_v6 }
 0x57d   : > { %6089 = vst.msk [vmem:[%s9970_s20 + $0xb8] sm:$0xff] %vm2494_vm12, %v6057_v25 }
 0x57e   : > { %6090 = vst.msk [vmem:[%s9970_s20 + $0xc0] sm:$0xff] %vm2494_vm12, %v6058_v17 }
 0x57f   : > { %6091 = vst.msk [vmem:[%s9970_s20 + $0xc8] sm:$0xff] %vm2494_vm12, %v6059_v4 }
 0x580   : > { %6092 = vst.msk [vmem:[%s9970_s20 + $0xd0] sm:$0xff] %vm2494_vm12, %v6060_v29 }
 0x581   : > { %6093 = vst.msk [vmem:[%s9970_s20 + $0xd8] sm:$0xff] %vm2494_vm12, %v6061_v63 }
 0x582   : > { %6094 = vst.msk [vmem:[%s9970_s20 + $0xe0] sm:$0xff] %vm2494_vm12, %v6062_v30 }
 0x583   : > { %6095 = vst.msk [vmem:[%s9970_s20 + $0xe8] sm:$0xff] %vm2494_vm12, %v6063_v32 }
 0x584   : > { %6096 = vst.msk [vmem:[%s9970_s20 + $0xf0] sm:$0xff] %vm2494_vm12, %v6064_v14 }
 0x585   : > { %6097 = vst.msk [vmem:[%s9970_s20 + $0xf8] sm:$0xff] %vm2494_vm12, %v6065_v21 }
 0x586 PF: > { %s13_s12 = sadd.s32 1, %s6845_s12  }
 0x587   : > { %p10_p4 = scmp.ge.s32.totalorder %s13_s12, 4  }
 0x589   :  { %12 = sbr.rel (!%p10_p4) target bundleno = 1 (0x1), region = 65 }

</bundles_post_ra>
